<compile_context>
chip_gen: v5e
topology: v5e:2x2
jax: 0.10.0
libtpu: 0.0.40
codegen_flags: <defaults>
</compile_context>

<pallas_src>
import functools

import numpy as np
import jax
import jax.numpy as jnp
from jax.experimental import pallas as pl
from jax.experimental.pallas import tpu as pltpu


# ----------------------------- Pallas kernel ------------------------------ #
def _bottleneck_kernel(x_ref, mask_ref, *refs, W, residual_flags):
    """Fused BottleneckBlock for one batch element (channel-major layout).

    x_ref    : (1, Cin, H*W)      input tile, spatial flattened on lanes
    mask_ref : (9, H*W)           0/1 boundary masks for the 3x3 depthwise taps
    then, for each of the len(residual_flags) bottlenecks (BN folded):
      w1 (Cmid, Cin) bf16, b1 (Cmid, 1) f32, dw (Cmid, 9) f32, bd (Cmid, 1) f32,
      w2 (Cout, Cmid) bf16, b2 (Cout, 1) f32
    o_ref    : (1, Cout, H*W)     (last ref)
    """
    n_blocks = len(residual_flags)
    o_ref = refs[-1]
    p_refs = refs[:-1]
    P = x_ref.shape[2]

    # Static per-tap lane shifts; masks are loaded once (hoisted out of loops).
    tap_shift = []
    for t in range(9):
        oh, ow = t // 3 - 1, t % 3 - 1
        tap_shift.append((-(oh * W + ow)) % P)
    mask_rows = [mask_ref[t:t + 1, :] for t in range(9)]       # (1, P) each

    x = x_ref[0].astype(jnp.float32)                           # (Cin, P)

    for i in range(n_blocks):
        w1, b1, dwt, bd, w2, b2 = p_refs[6 * i:6 * i + 6]

        # --- 1x1 expansion conv + folded BN + ReLU (MXU bf16 ops, f32 acc) ---
        h = jnp.dot(w1[...], x.astype(jnp.bfloat16),
                    preferred_element_type=jnp.float32) + b1[...]
        h = jnp.maximum(h, 0.0)                                # (Cmid, P) f32

        # --- 3x3 depthwise conv (stride 1, pad 1) via lane rolls + masks ---
        acc = None
        for t in range(9):
            sh = tap_shift[t]
            shifted = h if sh == 0 else pltpu.roll(h, shift=sh, axis=1)
            if t != 4:                      # centre tap never crosses an edge
                shifted = mask_rows[t] * shifted
            term = dwt[:, t:t + 1] * shifted
            acc = term if acc is None else acc + term
        h = jnp.maximum(acc + bd[...], 0.0)                    # (Cmid, P) f32

        # --- 1x1 projection conv + folded BN (no ReLU) ---
        out = jnp.dot(w2[...], h.astype(jnp.bfloat16),
                      preferred_element_type=jnp.float32) + b2[...]
        if residual_flags[i]:               # blocks with relu=True: out += x
            out = out + x
        x = out

    o_ref[0] = x.astype(o_ref.dtype)


def _dw_masks(H, W):
    """(9, H*W) 0/1 masks: tap (dh, dw) valid at flattened output position p."""
    P = H * W
    hh, ww = np.divmod(np.arange(P), W)
    m = np.zeros((9, P), np.float32)
    for t in range(9):
        oh, ow = t // 3 - 1, t % 3 - 1
        valid = ((hh + oh >= 0) & (hh + oh < H) &
                 (ww + ow >= 0) & (ww + ow < W))
        m[t] = valid.astype(np.float32)
    return jnp.asarray(m)


def bottleneck_block_forward(x_nchw, block_params, residual_flags):
    """Full BottleneckBlock forward (NCHW in/out) as a single pallas_call."""
    N, Cin, H, W = x_nchw.shape
    P = H * W
    assert P % 128 == 0, "H*W should be a multiple of 128 for lane-dense tiles"
    for i, res in enumerate(residual_flags):
        if res:
            assert block_params[i][0].shape[1] == block_params[i][4].shape[0], (
                "residual add requires in_channels == out_channels")

    Cout = block_params[-1][4].shape[0]

    # Flatten params; pre-cast the two 1x1-conv weights of each block to bf16
    # so the MXU operands need no per-step in-kernel cast.
    flat_params = []
    for (w1, b1, dw, bd, w2, b2) in block_params:
        flat_params.extend([w1.astype(jnp.bfloat16), b1, dw, bd,
                            w2.astype(jnp.bfloat16), b2])

    masks = _dw_masks(H, W)
    x = x_nchw.reshape(N, Cin, P)                    # free reshape (NCHW order)

    kern = functools.partial(_bottleneck_kernel, W=W,
                             residual_flags=tuple(residual_flags))
    param_specs = [pl.BlockSpec(p.shape, lambda n: (0, 0)) for p in flat_params]

    out = pl.pallas_call(
        kern,
        out_shape=jax.ShapeDtypeStruct((N, Cout, P), x_nchw.dtype),
        grid=(N,),
        in_specs=[pl.BlockSpec((1, Cin, P), lambda n: (n, 0, 0)),
                  pl.BlockSpec((9, P), lambda n: (0, 0))] + param_specs,
        out_specs=pl.BlockSpec((1, Cout, P), lambda n: (n, 0, 0)),
        compiler_params=pltpu.CompilerParams(
            dimension_semantics=("parallel",)),
    )(x, masks, *flat_params)
    return out.reshape(N, Cout, H, W)


# --------------------------- parameter plumbing ---------------------------- #
def _fold_bn(gamma, beta, mean, var, eps=1e-5):
    inv = gamma / jnp.sqrt(var + eps)
    return inv, beta - mean * inv


def _bn_params(key, c):
    k = jax.random.split(key, 4)
    gamma = 1.0 + 0.1 * jax.random.normal(k[0], (c,), jnp.float32)
    beta = 0.1 * jax.random.normal(k[1], (c,), jnp.float32)
    mean = 0.1 * jax.random.normal(k[2], (c,), jnp.float32)
    var = jnp.abs(jax.random.normal(k[3], (c,), jnp.float32)) + 0.5
    return gamma, beta, mean, var


def make_rb_params(key, cin, cout, temp=6, ksize=3):
    """BN-folded parameters for one ResidualBottleneck (channel-major)."""
    cmid = cin * temp
    ks = jax.random.split(key, 9)

    # conv1 (1x1, cin -> cmid) + BN
    w1 = jax.random.normal(ks[0], (cmid, cin), jnp.float32) / np.sqrt(cin)
    b1 = 0.1 * jax.random.normal(ks[1], (cmid,), jnp.float32)
    inv1, sh1 = _fold_bn(*_bn_params(ks[2], cmid))
    w1f = w1 * inv1[:, None]                               # (cmid, cin)
    b1f = (b1 * inv1 + sh1)[:, None]                       # (cmid, 1)

    # depthwise conv (3x3, cmid groups) + BN
    dw = jax.random.normal(ks[3], (cmid, ksize, ksize), jnp.float32) / ksize
    bd = 0.1 * jax.random.normal(ks[4], (cmid,), jnp.float32)
    inv2, sh2 = _fold_bn(*_bn_params(ks[5], cmid))
    dwf = (dw * inv2[:, None, None]).reshape(cmid, ksize * ksize)  # (cmid, 9)
    bdf = (bd * inv2 + sh2)[:, None]                       # (cmid, 1)

    # conv2 (1x1, cmid -> cout) + BN (no ReLU)
    w2 = jax.random.normal(ks[6], (cout, cmid), jnp.float32) / np.sqrt(cmid)
    b2 = 0.1 * jax.random.normal(ks[7], (cout,), jnp.float32)
    inv3, sh3 = _fold_bn(*_bn_params(ks[8], cout))
    w2f = w2 * inv3[:, None]                               # (cout, cmid)
    b2f = (b2 * inv3 + sh3)[:, None]                       # (cout, 1)

    return (w1f, b1f, dwf, bdf, w2f, b2f)


# ------------------------ pure-JAX reference check ------------------------- #
def rb_reference(x, params, residual):
    """One ResidualBottleneck on NCHW, same bf16-operand matmul precision."""
    w1, b1, dw, bd, w2, b2 = params
    N, Cin, H, W = x.shape
    Cmid, Cout = w1.shape[0], w2.shape[0]
    xf = x.reshape(N, Cin, H * W)
    h = jnp.einsum('mc,ncp->nmp', w1.astype(jnp.bfloat16),
                   xf.astype(jnp.bfloat16),
                   preferred_element_type=jnp.float32) + b1[None]
    h = jnp.maximum(h, 0.0).reshape(N, Cmid, H, W)
    hp = jnp.pad(h, ((0, 0), (0, 0), (1, 1), (1, 1)))
    acc = None
    for t in range(9):
        dh, dwi = t // 3, t % 3
        term = dw[None, :, t, None, None] * hp[:, :, dh:dh + H, dwi:dwi + W]
        acc = term if acc is None else acc + term
    d = jnp.maximum(acc + bd[None, :, :, None], 0.0)       # (N, Cmid, H, W)
    o = jnp.einsum('mc,ncp->nmp', w2.astype(jnp.bfloat16),
                   d.reshape(N, Cmid, H * W).astype(jnp.bfloat16),
                   preferred_element_type=jnp.float32) + b2[None]
    o = o.reshape(N, Cout, H, W)
    if residual:
        o = o + x
    return o


# ---------------------------------- main ----------------------------------- #
if __name__ == "__main__":
    key = jax.random.PRNGKey(0)
    N, in_channels, H, W = 2, 4, 16, 16
    out_channels, temp, loop = 4, 6, 3

    kx, kp = jax.random.split(key)
    x_nchw = jax.random.normal(kx, (N, in_channels, H, W), jnp.float32)

    pkeys = jax.random.split(kp, loop)
    block_params = []
    residual_flags = []
    for i in range(loop):
        cin = in_channels if i == 0 else out_channels
        block_params.append(make_rb_params(pkeys[i], cin, out_channels, temp))
        residual_flags.append(i != 0)      # block 0: relu=False -> no residual

    out_nchw = bottleneck_block_forward(x_nchw, block_params, residual_flags)
    out_nchw = jax.block_until_ready(out_nchw)

    # reference (same folded params, same precision, pure JAX)
    ref = x_nchw
    for i, params in enumerate(block_params):
        ref = rb_reference(ref, params, residual=residual_flags[i])

    np.testing.assert_allclose(np.asarray(out_nchw), np.asarray(ref),
                               atol=1e-3, rtol=1e-3)
    print("KERNEL_OK")
</pallas_src>

<mosaic_0001>
module attributes {stable_mosaic.version = 11 : i64} {
  func.func @_bottleneck_kernel(%arg0: i32, %arg1: memref<1x4x256xf32, #tpu.memory_space<vmem>>, %arg2: memref<9x256xf32, #tpu.memory_space<vmem>>, %arg3: memref<24x4xbf16, #tpu.memory_space<vmem>>, %arg4: memref<24x1xf32, #tpu.memory_space<vmem>>, %arg5: memref<24x9xf32, #tpu.memory_space<vmem>>, %arg6: memref<24x1xf32, #tpu.memory_space<vmem>>, %arg7: memref<4x24xbf16, #tpu.memory_space<vmem>>, %arg8: memref<4x1xf32, #tpu.memory_space<vmem>>, %arg9: memref<24x4xbf16, #tpu.memory_space<vmem>>, %arg10: memref<24x1xf32, #tpu.memory_space<vmem>>, %arg11: memref<24x9xf32, #tpu.memory_space<vmem>>, %arg12: memref<24x1xf32, #tpu.memory_space<vmem>>, %arg13: memref<4x24xbf16, #tpu.memory_space<vmem>>, %arg14: memref<4x1xf32, #tpu.memory_space<vmem>>, %arg15: memref<24x4xbf16, #tpu.memory_space<vmem>>, %arg16: memref<24x1xf32, #tpu.memory_space<vmem>>, %arg17: memref<24x9xf32, #tpu.memory_space<vmem>>, %arg18: memref<24x1xf32, #tpu.memory_space<vmem>>, %arg19: memref<4x24xbf16, #tpu.memory_space<vmem>>, %arg20: memref<4x1xf32, #tpu.memory_space<vmem>>, %arg21: memref<1x4x256xf32, #tpu.memory_space<vmem>>) attributes {dimension_semantics = [#tpu.dimension_semantics<parallel>], iteration_bounds = array<i64: 2>, scalar_prefetch = 0 : i64, scratch_operands = 0 : i64, tpu.core_type = #tpu.core_type<tc>, window_params = [{transform_indices = @transform_0, window_bounds = array<i64: 1, 4, 256>}, {pipeline_mode = #tpu.pipeline_mode<synchronous>, transform_indices = @transform_1, window_bounds = array<i64: 9, 256>}, {pipeline_mode = #tpu.pipeline_mode<synchronous>, transform_indices = @transform_2, window_bounds = array<i64: 24, 4>}, {pipeline_mode = #tpu.pipeline_mode<synchronous>, transform_indices = @transform_3, window_bounds = array<i64: 24, 1>}, {pipeline_mode = #tpu.pipeline_mode<synchronous>, transform_indices = @transform_4, window_bounds = array<i64: 24, 9>}, {pipeline_mode = #tpu.pipeline_mode<synchronous>, transform_indices = @transform_5, window_bounds = array<i64: 24, 1>}, {pipeline_mode = #tpu.pipeline_mode<synchronous>, transform_indices = @transform_6, window_bounds = array<i64: 4, 24>}, {pipeline_mode = #tpu.pipeline_mode<synchronous>, transform_indices = @transform_7, window_bounds = array<i64: 4, 1>}, {pipeline_mode = #tpu.pipeline_mode<synchronous>, transform_indices = @transform_8, window_bounds = array<i64: 24, 4>}, {pipeline_mode = #tpu.pipeline_mode<synchronous>, transform_indices = @transform_9, window_bounds = array<i64: 24, 1>}, {pipeline_mode = #tpu.pipeline_mode<synchronous>, transform_indices = @transform_10, window_bounds = array<i64: 24, 9>}, {pipeline_mode = #tpu.pipeline_mode<synchronous>, transform_indices = @transform_11, window_bounds = array<i64: 24, 1>}, {pipeline_mode = #tpu.pipeline_mode<synchronous>, transform_indices = @transform_12, window_bounds = array<i64: 4, 24>}, {pipeline_mode = #tpu.pipeline_mode<synchronous>, transform_indices = @transform_13, window_bounds = array<i64: 4, 1>}, {pipeline_mode = #tpu.pipeline_mode<synchronous>, transform_indices = @transform_14, window_bounds = array<i64: 24, 4>}, {pipeline_mode = #tpu.pipeline_mode<synchronous>, transform_indices = @transform_15, window_bounds = array<i64: 24, 1>}, {pipeline_mode = #tpu.pipeline_mode<synchronous>, transform_indices = @transform_16, window_bounds = array<i64: 24, 9>}, {pipeline_mode = #tpu.pipeline_mode<synchronous>, transform_indices = @transform_17, window_bounds = array<i64: 24, 1>}, {pipeline_mode = #tpu.pipeline_mode<synchronous>, transform_indices = @transform_18, window_bounds = array<i64: 4, 24>}, {pipeline_mode = #tpu.pipeline_mode<synchronous>, transform_indices = @transform_19, window_bounds = array<i64: 4, 1>}, {transform_indices = @transform_20, window_bounds = array<i64: 1, 4, 256>}]} {
    %c0 = arith.constant 0 : index
    %c0_0 = arith.constant 0 : index
    %0 = vector.load %arg2[%c0, %c0_0] : memref<9x256xf32, #tpu.memory_space<vmem>>, vector<1x256xf32>
    %c1 = arith.constant 1 : index
    %c0_1 = arith.constant 0 : index
    %1 = vector.load %arg2[%c1, %c0_1] : memref<9x256xf32, #tpu.memory_space<vmem>>, vector<1x256xf32>
    %c2 = arith.constant 2 : index
    %c0_2 = arith.constant 0 : index
    %2 = vector.load %arg2[%c2, %c0_2] : memref<9x256xf32, #tpu.memory_space<vmem>>, vector<1x256xf32>
    %c3 = arith.constant 3 : index
    %c0_3 = arith.constant 0 : index
    %3 = vector.load %arg2[%c3, %c0_3] : memref<9x256xf32, #tpu.memory_space<vmem>>, vector<1x256xf32>
    %c5 = arith.constant 5 : index
    %c0_4 = arith.constant 0 : index
    %4 = vector.load %arg2[%c5, %c0_4] : memref<9x256xf32, #tpu.memory_space<vmem>>, vector<1x256xf32>
    %c6 = arith.constant 6 : index
    %c0_5 = arith.constant 0 : index
    %5 = vector.load %arg2[%c6, %c0_5] : memref<9x256xf32, #tpu.memory_space<vmem>>, vector<1x256xf32>
    %c7 = arith.constant 7 : index
    %c0_6 = arith.constant 0 : index
    %6 = vector.load %arg2[%c7, %c0_6] : memref<9x256xf32, #tpu.memory_space<vmem>>, vector<1x256xf32>
    %c8 = arith.constant 8 : index
    %c0_7 = arith.constant 0 : index
    %7 = vector.load %arg2[%c8, %c0_7] : memref<9x256xf32, #tpu.memory_space<vmem>>, vector<1x256xf32>
    %c0_8 = arith.constant 0 : index
    %c0_9 = arith.constant 0 : index
    %c0_10 = arith.constant 0 : index
    %8 = vector.load %arg1[%c0_8, %c0_9, %c0_10] : memref<1x4x256xf32, #tpu.memory_space<vmem>>, vector<1x4x256xf32>
    %9 = vector.shape_cast %8 : vector<1x4x256xf32> to vector<4x256xf32>
    %c0_11 = arith.constant 0 : index
    %c0_12 = arith.constant 0 : index
    %10 = vector.load %arg3[%c0_11, %c0_12] : memref<24x4xbf16, #tpu.memory_space<vmem>>, vector<24x4xbf16>
    %11 = arith.truncf %9 : vector<4x256xf32> to vector<4x256xbf16>
    %cst = arith.constant dense<0.000000e+00> : vector<24x256xf32>
    %12 = tpu.matmul %10, %11, %cst {dimension_numbers = #tpu.dot_dimension_numbers<[1], [0], [0], [1], [0, 0, 1, 1], [], []>} : vector<24x4xbf16>, vector<4x256xbf16>, vector<24x256xf32> -> vector<24x256xf32>
    %c0_13 = arith.constant 0 : index
    %c0_14 = arith.constant 0 : index
    %13 = vector.load %arg4[%c0_13, %c0_14] : memref<24x1xf32, #tpu.memory_space<vmem>>, vector<24x1xf32>
    %14 = vector.broadcast %13 : vector<24x1xf32> to vector<24x256xf32>
    %15 = arith.addf %12, %14 : vector<24x256xf32>
    %cst_15 = arith.constant 0.000000e+00 : f32
    %16 = vector.broadcast %cst_15 : f32 to vector<24x256xf32>
    %17 = arith.maximumf %15, %16 : vector<24x256xf32>
    %c17_i32 = arith.constant 17 : i32
    %18 = tpu.dynamic_rotate %17 by %c17_i32 dim 1 : vector<24x256xf32>, i32 -> vector<24x256xf32>
    %19 = vector.broadcast %0 : vector<1x256xf32> to vector<24x256xf32>
    %20 = arith.mulf %19, %18 : vector<24x256xf32>
    %c0_16 = arith.constant 0 : index
    %c0_17 = arith.constant 0 : index
    %21 = vector.load %arg5[%c0_16, %c0_17] : memref<24x9xf32, #tpu.memory_space<vmem>>, vector<24x1xf32>
    %22 = vector.broadcast %21 : vector<24x1xf32> to vector<24x256xf32>
    %23 = arith.mulf %22, %20 : vector<24x256xf32>
    %c16_i32 = arith.constant 16 : i32
    %24 = tpu.dynamic_rotate %17 by %c16_i32 dim 1 : vector<24x256xf32>, i32 -> vector<24x256xf32>
    %25 = vector.broadcast %1 : vector<1x256xf32> to vector<24x256xf32>
    %26 = arith.mulf %25, %24 : vector<24x256xf32>
    %c0_18 = arith.constant 0 : index
    %c1_19 = arith.constant 1 : index
    %27 = vector.load %arg5[%c0_18, %c1_19] : memref<24x9xf32, #tpu.memory_space<vmem>>, vector<24x1xf32>
    %28 = vector.broadcast %27 : vector<24x1xf32> to vector<24x256xf32>
    %29 = arith.mulf %28, %26 : vector<24x256xf32>
    %30 = arith.addf %23, %29 : vector<24x256xf32>
    %c15_i32 = arith.constant 15 : i32
    %31 = tpu.dynamic_rotate %17 by %c15_i32 dim 1 : vector<24x256xf32>, i32 -> vector<24x256xf32>
    %32 = vector.broadcast %2 : vector<1x256xf32> to vector<24x256xf32>
    %33 = arith.mulf %32, %31 : vector<24x256xf32>
    %c0_20 = arith.constant 0 : index
    %c2_21 = arith.constant 2 : index
    %34 = vector.load %arg5[%c0_20, %c2_21] : memref<24x9xf32, #tpu.memory_space<vmem>>, vector<24x1xf32>
    %35 = vector.broadcast %34 : vector<24x1xf32> to vector<24x256xf32>
    %36 = arith.mulf %35, %33 : vector<24x256xf32>
    %37 = arith.addf %30, %36 : vector<24x256xf32>
    %c1_i32 = arith.constant 1 : i32
    %38 = tpu.dynamic_rotate %17 by %c1_i32 dim 1 : vector<24x256xf32>, i32 -> vector<24x256xf32>
    %39 = vector.broadcast %3 : vector<1x256xf32> to vector<24x256xf32>
    %40 = arith.mulf %39, %38 : vector<24x256xf32>
    %c0_22 = arith.constant 0 : index
    %c3_23 = arith.constant 3 : index
    %41 = vector.load %arg5[%c0_22, %c3_23] : memref<24x9xf32, #tpu.memory_space<vmem>>, vector<24x1xf32>
    %42 = vector.broadcast %41 : vector<24x1xf32> to vector<24x256xf32>
    %43 = arith.mulf %42, %40 : vector<24x256xf32>
    %44 = arith.addf %37, %43 : vector<24x256xf32>
    %c0_24 = arith.constant 0 : index
    %c4 = arith.constant 4 : index
    %45 = vector.load %arg5[%c0_24, %c4] : memref<24x9xf32, #tpu.memory_space<vmem>>, vector<24x1xf32>
    %46 = vector.broadcast %45 : vector<24x1xf32> to vector<24x256xf32>
    %47 = arith.mulf %46, %17 : vector<24x256xf32>
    %48 = arith.addf %44, %47 : vector<24x256xf32>
    %c255_i32 = arith.constant 255 : i32
    %49 = tpu.dynamic_rotate %17 by %c255_i32 dim 1 : vector<24x256xf32>, i32 -> vector<24x256xf32>
    %50 = vector.broadcast %4 : vector<1x256xf32> to vector<24x256xf32>
    %51 = arith.mulf %50, %49 : vector<24x256xf32>
    %c0_25 = arith.constant 0 : index
    %c5_26 = arith.constant 5 : index
    %52 = vector.load %arg5[%c0_25, %c5_26] : memref<24x9xf32, #tpu.memory_space<vmem>>, vector<24x1xf32>
    %53 = vector.broadcast %52 : vector<24x1xf32> to vector<24x256xf32>
    %54 = arith.mulf %53, %51 : vector<24x256xf32>
    %55 = arith.addf %48, %54 : vector<24x256xf32>
    %c241_i32 = arith.constant 241 : i32
    %56 = tpu.dynamic_rotate %17 by %c241_i32 dim 1 : vector<24x256xf32>, i32 -> vector<24x256xf32>
    %57 = vector.broadcast %5 : vector<1x256xf32> to vector<24x256xf32>
    %58 = arith.mulf %57, %56 : vector<24x256xf32>
    %c0_27 = arith.constant 0 : index
    %c6_28 = arith.constant 6 : index
    %59 = vector.load %arg5[%c0_27, %c6_28] : memref<24x9xf32, #tpu.memory_space<vmem>>, vector<24x1xf32>
    %60 = vector.broadcast %59 : vector<24x1xf32> to vector<24x256xf32>
    %61 = arith.mulf %60, %58 : vector<24x256xf32>
    %62 = arith.addf %55, %61 : vector<24x256xf32>
    %c240_i32 = arith.constant 240 : i32
    %63 = tpu.dynamic_rotate %17 by %c240_i32 dim 1 : vector<24x256xf32>, i32 -> vector<24x256xf32>
    %64 = vector.broadcast %6 : vector<1x256xf32> to vector<24x256xf32>
    %65 = arith.mulf %64, %63 : vector<24x256xf32>
    %c0_29 = arith.constant 0 : index
    %c7_30 = arith.constant 7 : index
    %66 = vector.load %arg5[%c0_29, %c7_30] : memref<24x9xf32, #tpu.memory_space<vmem>>, vector<24x1xf32>
    %67 = vector.broadcast %66 : vector<24x1xf32> to vector<24x256xf32>
    %68 = arith.mulf %67, %65 : vector<24x256xf32>
    %69 = arith.addf %62, %68 : vector<24x256xf32>
    %c239_i32 = arith.constant 239 : i32
    %70 = tpu.dynamic_rotate %17 by %c239_i32 dim 1 : vector<24x256xf32>, i32 -> vector<24x256xf32>
    %71 = vector.broadcast %7 : vector<1x256xf32> to vector<24x256xf32>
    %72 = arith.mulf %71, %70 : vector<24x256xf32>
    %c0_31 = arith.constant 0 : index
    %c8_32 = arith.constant 8 : index
    %73 = vector.load %arg5[%c0_31, %c8_32] : memref<24x9xf32, #tpu.memory_space<vmem>>, vector<24x1xf32>
    %74 = vector.broadcast %73 : vector<24x1xf32> to vector<24x256xf32>
    %75 = arith.mulf %74, %72 : vector<24x256xf32>
    %76 = arith.addf %69, %75 : vector<24x256xf32>
    %c0_33 = arith.constant 0 : index
    %c0_34 = arith.constant 0 : index
    %77 = vector.load %arg6[%c0_33, %c0_34] : memref<24x1xf32, #tpu.memory_space<vmem>>, vector<24x1xf32>
    %78 = vector.broadcast %77 : vector<24x1xf32> to vector<24x256xf32>
    %79 = arith.addf %76, %78 : vector<24x256xf32>
    %cst_35 = arith.constant 0.000000e+00 : f32
    %80 = vector.broadcast %cst_35 : f32 to vector<24x256xf32>
    %81 = arith.maximumf %79, %80 : vector<24x256xf32>
    %c0_36 = arith.constant 0 : index
    %c0_37 = arith.constant 0 : index
    %82 = vector.load %arg7[%c0_36, %c0_37] : memref<4x24xbf16, #tpu.memory_space<vmem>>, vector<4x24xbf16>
    %83 = arith.truncf %81 : vector<24x256xf32> to vector<24x256xbf16>
    %cst_38 = arith.constant dense<0.000000e+00> : vector<4x256xf32>
    %84 = tpu.matmul %82, %83, %cst_38 {dimension_numbers = #tpu.dot_dimension_numbers<[1], [0], [0], [1], [0, 0, 1, 1], [], []>} : vector<4x24xbf16>, vector<24x256xbf16>, vector<4x256xf32> -> vector<4x256xf32>
    %c0_39 = arith.constant 0 : index
    %c0_40 = arith.constant 0 : index
    %85 = vector.load %arg8[%c0_39, %c0_40] : memref<4x1xf32, #tpu.memory_space<vmem>>, vector<4x1xf32>
    %86 = vector.broadcast %85 : vector<4x1xf32> to vector<4x256xf32>
    %87 = arith.addf %84, %86 : vector<4x256xf32>
    %c0_41 = arith.constant 0 : index
    %c0_42 = arith.constant 0 : index
    %88 = vector.load %arg9[%c0_41, %c0_42] : memref<24x4xbf16, #tpu.memory_space<vmem>>, vector<24x4xbf16>
    %89 = arith.truncf %87 : vector<4x256xf32> to vector<4x256xbf16>
    %cst_43 = arith.constant dense<0.000000e+00> : vector<24x256xf32>
    %90 = tpu.matmul %88, %89, %cst_43 {dimension_numbers = #tpu.dot_dimension_numbers<[1], [0], [0], [1], [0, 0, 1, 1], [], []>} : vector<24x4xbf16>, vector<4x256xbf16>, vector<24x256xf32> -> vector<24x256xf32>
    %c0_44 = arith.constant 0 : index
    %c0_45 = arith.constant 0 : index
    %91 = vector.load %arg10[%c0_44, %c0_45] : memref<24x1xf32, #tpu.memory_space<vmem>>, vector<24x1xf32>
    %92 = vector.broadcast %91 : vector<24x1xf32> to vector<24x256xf32>
    %93 = arith.addf %90, %92 : vector<24x256xf32>
    %cst_46 = arith.constant 0.000000e+00 : f32
    %94 = vector.broadcast %cst_46 : f32 to vector<24x256xf32>
    %95 = arith.maximumf %93, %94 : vector<24x256xf32>
    %c17_i32_47 = arith.constant 17 : i32
    %96 = tpu.dynamic_rotate %95 by %c17_i32_47 dim 1 : vector<24x256xf32>, i32 -> vector<24x256xf32>
    %97 = vector.broadcast %0 : vector<1x256xf32> to vector<24x256xf32>
    %98 = arith.mulf %97, %96 : vector<24x256xf32>
    %c0_48 = arith.constant 0 : index
    %c0_49 = arith.constant 0 : index
    %99 = vector.load %arg11[%c0_48, %c0_49] : memref<24x9xf32, #tpu.memory_space<vmem>>, vector<24x1xf32>
    %100 = vector.broadcast %99 : vector<24x1xf32> to vector<24x256xf32>
    %101 = arith.mulf %100, %98 : vector<24x256xf32>
    %c16_i32_50 = arith.constant 16 : i32
    %102 = tpu.dynamic_rotate %95 by %c16_i32_50 dim 1 : vector<24x256xf32>, i32 -> vector<24x256xf32>
    %103 = vector.broadcast %1 : vector<1x256xf32> to vector<24x256xf32>
    %104 = arith.mulf %103, %102 : vector<24x256xf32>
    %c0_51 = arith.constant 0 : index
    %c1_52 = arith.constant 1 : index
    %105 = vector.load %arg11[%c0_51, %c1_52] : memref<24x9xf32, #tpu.memory_space<vmem>>, vector<24x1xf32>
    %106 = vector.broadcast %105 : vector<24x1xf32> to vector<24x256xf32>
    %107 = arith.mulf %106, %104 : vector<24x256xf32>
    %108 = arith.addf %101, %107 : vector<24x256xf32>
    %c15_i32_53 = arith.constant 15 : i32
    %109 = tpu.dynamic_rotate %95 by %c15_i32_53 dim 1 : vector<24x256xf32>, i32 -> vector<24x256xf32>
    %110 = vector.broadcast %2 : vector<1x256xf32> to vector<24x256xf32>
    %111 = arith.mulf %110, %109 : vector<24x256xf32>
    %c0_54 = arith.constant 0 : index
    %c2_55 = arith.constant 2 : index
    %112 = vector.load %arg11[%c0_54, %c2_55] : memref<24x9xf32, #tpu.memory_space<vmem>>, vector<24x1xf32>
    %113 = vector.broadcast %112 : vector<24x1xf32> to vector<24x256xf32>
    %114 = arith.mulf %113, %111 : vector<24x256xf32>
    %115 = arith.addf %108, %114 : vector<24x256xf32>
    %c1_i32_56 = arith.constant 1 : i32
    %116 = tpu.dynamic_rotate %95 by %c1_i32_56 dim 1 : vector<24x256xf32>, i32 -> vector<24x256xf32>
    %117 = vector.broadcast %3 : vector<1x256xf32> to vector<24x256xf32>
    %118 = arith.mulf %117, %116 : vector<24x256xf32>
    %c0_57 = arith.constant 0 : index
    %c3_58 = arith.constant 3 : index
    %119 = vector.load %arg11[%c0_57, %c3_58] : memref<24x9xf32, #tpu.memory_space<vmem>>, vector<24x1xf32>
    %120 = vector.broadcast %119 : vector<24x1xf32> to vector<24x256xf32>
    %121 = arith.mulf %120, %118 : vector<24x256xf32>
    %122 = arith.addf %115, %121 : vector<24x256xf32>
    %c0_59 = arith.constant 0 : index
    %c4_60 = arith.constant 4 : index
    %123 = vector.load %arg11[%c0_59, %c4_60] : memref<24x9xf32, #tpu.memory_space<vmem>>, vector<24x1xf32>
    %124 = vector.broadcast %123 : vector<24x1xf32> to vector<24x256xf32>
    %125 = arith.mulf %124, %95 : vector<24x256xf32>
    %126 = arith.addf %122, %125 : vector<24x256xf32>
    %c255_i32_61 = arith.constant 255 : i32
    %127 = tpu.dynamic_rotate %95 by %c255_i32_61 dim 1 : vector<24x256xf32>, i32 -> vector<24x256xf32>
    %128 = vector.broadcast %4 : vector<1x256xf32> to vector<24x256xf32>
    %129 = arith.mulf %128, %127 : vector<24x256xf32>
    %c0_62 = arith.constant 0 : index
    %c5_63 = arith.constant 5 : index
    %130 = vector.load %arg11[%c0_62, %c5_63] : memref<24x9xf32, #tpu.memory_space<vmem>>, vector<24x1xf32>
    %131 = vector.broadcast %130 : vector<24x1xf32> to vector<24x256xf32>
    %132 = arith.mulf %131, %129 : vector<24x256xf32>
    %133 = arith.addf %126, %132 : vector<24x256xf32>
    %c241_i32_64 = arith.constant 241 : i32
    %134 = tpu.dynamic_rotate %95 by %c241_i32_64 dim 1 : vector<24x256xf32>, i32 -> vector<24x256xf32>
    %135 = vector.broadcast %5 : vector<1x256xf32> to vector<24x256xf32>
    %136 = arith.mulf %135, %134 : vector<24x256xf32>
    %c0_65 = arith.constant 0 : index
    %c6_66 = arith.constant 6 : index
    %137 = vector.load %arg11[%c0_65, %c6_66] : memref<24x9xf32, #tpu.memory_space<vmem>>, vector<24x1xf32>
    %138 = vector.broadcast %137 : vector<24x1xf32> to vector<24x256xf32>
    %139 = arith.mulf %138, %136 : vector<24x256xf32>
    %140 = arith.addf %133, %139 : vector<24x256xf32>
    %c240_i32_67 = arith.constant 240 : i32
    %141 = tpu.dynamic_rotate %95 by %c240_i32_67 dim 1 : vector<24x256xf32>, i32 -> vector<24x256xf32>
    %142 = vector.broadcast %6 : vector<1x256xf32> to vector<24x256xf32>
    %143 = arith.mulf %142, %141 : vector<24x256xf32>
    %c0_68 = arith.constant 0 : index
    %c7_69 = arith.constant 7 : index
    %144 = vector.load %arg11[%c0_68, %c7_69] : memref<24x9xf32, #tpu.memory_space<vmem>>, vector<24x1xf32>
    %145 = vector.broadcast %144 : vector<24x1xf32> to vector<24x256xf32>
    %146 = arith.mulf %145, %143 : vector<24x256xf32>
    %147 = arith.addf %140, %146 : vector<24x256xf32>
    %c239_i32_70 = arith.constant 239 : i32
    %148 = tpu.dynamic_rotate %95 by %c239_i32_70 dim 1 : vector<24x256xf32>, i32 -> vector<24x256xf32>
    %149 = vector.broadcast %7 : vector<1x256xf32> to vector<24x256xf32>
    %150 = arith.mulf %149, %148 : vector<24x256xf32>
    %c0_71 = arith.constant 0 : index
    %c8_72 = arith.constant 8 : index
    %151 = vector.load %arg11[%c0_71, %c8_72] : memref<24x9xf32, #tpu.memory_space<vmem>>, vector<24x1xf32>
    %152 = vector.broadcast %151 : vector<24x1xf32> to vector<24x256xf32>
    %153 = arith.mulf %152, %150 : vector<24x256xf32>
    %154 = arith.addf %147, %153 : vector<24x256xf32>
    %c0_73 = arith.constant 0 : index
    %c0_74 = arith.constant 0 : index
    %155 = vector.load %arg12[%c0_73, %c0_74] : memref<24x1xf32, #tpu.memory_space<vmem>>, vector<24x1xf32>
    %156 = vector.broadcast %155 : vector<24x1xf32> to vector<24x256xf32>
    %157 = arith.addf %154, %156 : vector<24x256xf32>
    %cst_75 = arith.constant 0.000000e+00 : f32
    %158 = vector.broadcast %cst_75 : f32 to vector<24x256xf32>
    %159 = arith.maximumf %157, %158 : vector<24x256xf32>
    %c0_76 = arith.constant 0 : index
    %c0_77 = arith.constant 0 : index
    %160 = vector.load %arg13[%c0_76, %c0_77] : memref<4x24xbf16, #tpu.memory_space<vmem>>, vector<4x24xbf16>
    %161 = arith.truncf %159 : vector<24x256xf32> to vector<24x256xbf16>
    %cst_78 = arith.constant dense<0.000000e+00> : vector<4x256xf32>
    %162 = tpu.matmul %160, %161, %cst_78 {dimension_numbers = #tpu.dot_dimension_numbers<[1], [0], [0], [1], [0, 0, 1, 1], [], []>} : vector<4x24xbf16>, vector<24x256xbf16>, vector<4x256xf32> -> vector<4x256xf32>
    %c0_79 = arith.constant 0 : index
    %c0_80 = arith.constant 0 : index
    %163 = vector.load %arg14[%c0_79, %c0_80] : memref<4x1xf32, #tpu.memory_space<vmem>>, vector<4x1xf32>
    %164 = vector.broadcast %163 : vector<4x1xf32> to vector<4x256xf32>
    %165 = arith.addf %162, %164 : vector<4x256xf32>
    %166 = arith.addf %165, %87 : vector<4x256xf32>
    %c0_81 = arith.constant 0 : index
    %c0_82 = arith.constant 0 : index
    %167 = vector.load %arg15[%c0_81, %c0_82] : memref<24x4xbf16, #tpu.memory_space<vmem>>, vector<24x4xbf16>
    %168 = arith.truncf %166 : vector<4x256xf32> to vector<4x256xbf16>
    %cst_83 = arith.constant dense<0.000000e+00> : vector<24x256xf32>
    %169 = tpu.matmul %167, %168, %cst_83 {dimension_numbers = #tpu.dot_dimension_numbers<[1], [0], [0], [1], [0, 0, 1, 1], [], []>} : vector<24x4xbf16>, vector<4x256xbf16>, vector<24x256xf32> -> vector<24x256xf32>
    %c0_84 = arith.constant 0 : index
    %c0_85 = arith.constant 0 : index
    %170 = vector.load %arg16[%c0_84, %c0_85] : memref<24x1xf32, #tpu.memory_space<vmem>>, vector<24x1xf32>
    %171 = vector.broadcast %170 : vector<24x1xf32> to vector<24x256xf32>
    %172 = arith.addf %169, %171 : vector<24x256xf32>
    %cst_86 = arith.constant 0.000000e+00 : f32
    %173 = vector.broadcast %cst_86 : f32 to vector<24x256xf32>
    %174 = arith.maximumf %172, %173 : vector<24x256xf32>
    %c17_i32_87 = arith.constant 17 : i32
    %175 = tpu.dynamic_rotate %174 by %c17_i32_87 dim 1 : vector<24x256xf32>, i32 -> vector<24x256xf32>
    %176 = vector.broadcast %0 : vector<1x256xf32> to vector<24x256xf32>
    %177 = arith.mulf %176, %175 : vector<24x256xf32>
    %c0_88 = arith.constant 0 : index
    %c0_89 = arith.constant 0 : index
    %178 = vector.load %arg17[%c0_88, %c0_89] : memref<24x9xf32, #tpu.memory_space<vmem>>, vector<24x1xf32>
    %179 = vector.broadcast %178 : vector<24x1xf32> to vector<24x256xf32>
    %180 = arith.mulf %179, %177 : vector<24x256xf32>
    %c16_i32_90 = arith.constant 16 : i32
    %181 = tpu.dynamic_rotate %174 by %c16_i32_90 dim 1 : vector<24x256xf32>, i32 -> vector<24x256xf32>
    %182 = vector.broadcast %1 : vector<1x256xf32> to vector<24x256xf32>
    %183 = arith.mulf %182, %181 : vector<24x256xf32>
    %c0_91 = arith.constant 0 : index
    %c1_92 = arith.constant 1 : index
    %184 = vector.load %arg17[%c0_91, %c1_92] : memref<24x9xf32, #tpu.memory_space<vmem>>, vector<24x1xf32>
    %185 = vector.broadcast %184 : vector<24x1xf32> to vector<24x256xf32>
    %186 = arith.mulf %185, %183 : vector<24x256xf32>
    %187 = arith.addf %180, %186 : vector<24x256xf32>
    %c15_i32_93 = arith.constant 15 : i32
    %188 = tpu.dynamic_rotate %174 by %c15_i32_93 dim 1 : vector<24x256xf32>, i32 -> vector<24x256xf32>
    %189 = vector.broadcast %2 : vector<1x256xf32> to vector<24x256xf32>
    %190 = arith.mulf %189, %188 : vector<24x256xf32>
    %c0_94 = arith.constant 0 : index
    %c2_95 = arith.constant 2 : index
    %191 = vector.load %arg17[%c0_94, %c2_95] : memref<24x9xf32, #tpu.memory_space<vmem>>, vector<24x1xf32>
    %192 = vector.broadcast %191 : vector<24x1xf32> to vector<24x256xf32>
    %193 = arith.mulf %192, %190 : vector<24x256xf32>
    %194 = arith.addf %187, %193 : vector<24x256xf32>
    %c1_i32_96 = arith.constant 1 : i32
    %195 = tpu.dynamic_rotate %174 by %c1_i32_96 dim 1 : vector<24x256xf32>, i32 -> vector<24x256xf32>
    %196 = vector.broadcast %3 : vector<1x256xf32> to vector<24x256xf32>
    %197 = arith.mulf %196, %195 : vector<24x256xf32>
    %c0_97 = arith.constant 0 : index
    %c3_98 = arith.constant 3 : index
    %198 = vector.load %arg17[%c0_97, %c3_98] : memref<24x9xf32, #tpu.memory_space<vmem>>, vector<24x1xf32>
    %199 = vector.broadcast %198 : vector<24x1xf32> to vector<24x256xf32>
    %200 = arith.mulf %199, %197 : vector<24x256xf32>
    %201 = arith.addf %194, %200 : vector<24x256xf32>
    %c0_99 = arith.constant 0 : index
    %c4_100 = arith.constant 4 : index
    %202 = vector.load %arg17[%c0_99, %c4_100] : memref<24x9xf32, #tpu.memory_space<vmem>>, vector<24x1xf32>
    %203 = vector.broadcast %202 : vector<24x1xf32> to vector<24x256xf32>
    %204 = arith.mulf %203, %174 : vector<24x256xf32>
    %205 = arith.addf %201, %204 : vector<24x256xf32>
    %c255_i32_101 = arith.constant 255 : i32
    %206 = tpu.dynamic_rotate %174 by %c255_i32_101 dim 1 : vector<24x256xf32>, i32 -> vector<24x256xf32>
    %207 = vector.broadcast %4 : vector<1x256xf32> to vector<24x256xf32>
    %208 = arith.mulf %207, %206 : vector<24x256xf32>
    %c0_102 = arith.constant 0 : index
    %c5_103 = arith.constant 5 : index
    %209 = vector.load %arg17[%c0_102, %c5_103] : memref<24x9xf32, #tpu.memory_space<vmem>>, vector<24x1xf32>
    %210 = vector.broadcast %209 : vector<24x1xf32> to vector<24x256xf32>
    %211 = arith.mulf %210, %208 : vector<24x256xf32>
    %212 = arith.addf %205, %211 : vector<24x256xf32>
    %c241_i32_104 = arith.constant 241 : i32
    %213 = tpu.dynamic_rotate %174 by %c241_i32_104 dim 1 : vector<24x256xf32>, i32 -> vector<24x256xf32>
    %214 = vector.broadcast %5 : vector<1x256xf32> to vector<24x256xf32>
    %215 = arith.mulf %214, %213 : vector<24x256xf32>
    %c0_105 = arith.constant 0 : index
    %c6_106 = arith.constant 6 : index
    %216 = vector.load %arg17[%c0_105, %c6_106] : memref<24x9xf32, #tpu.memory_space<vmem>>, vector<24x1xf32>
    %217 = vector.broadcast %216 : vector<24x1xf32> to vector<24x256xf32>
    %218 = arith.mulf %217, %215 : vector<24x256xf32>
    %219 = arith.addf %212, %218 : vector<24x256xf32>
    %c240_i32_107 = arith.constant 240 : i32
    %220 = tpu.dynamic_rotate %174 by %c240_i32_107 dim 1 : vector<24x256xf32>, i32 -> vector<24x256xf32>
    %221 = vector.broadcast %6 : vector<1x256xf32> to vector<24x256xf32>
    %222 = arith.mulf %221, %220 : vector<24x256xf32>
    %c0_108 = arith.constant 0 : index
    %c7_109 = arith.constant 7 : index
    %223 = vector.load %arg17[%c0_108, %c7_109] : memref<24x9xf32, #tpu.memory_space<vmem>>, vector<24x1xf32>
    %224 = vector.broadcast %223 : vector<24x1xf32> to vector<24x256xf32>
    %225 = arith.mulf %224, %222 : vector<24x256xf32>
    %226 = arith.addf %219, %225 : vector<24x256xf32>
    %c239_i32_110 = arith.constant 239 : i32
    %227 = tpu.dynamic_rotate %174 by %c239_i32_110 dim 1 : vector<24x256xf32>, i32 -> vector<24x256xf32>
    %228 = vector.broadcast %7 : vector<1x256xf32> to vector<24x256xf32>
    %229 = arith.mulf %228, %227 : vector<24x256xf32>
    %c0_111 = arith.constant 0 : index
    %c8_112 = arith.constant 8 : index
    %230 = vector.load %arg17[%c0_111, %c8_112] : memref<24x9xf32, #tpu.memory_space<vmem>>, vector<24x1xf32>
    %231 = vector.broadcast %230 : vector<24x1xf32> to vector<24x256xf32>
    %232 = arith.mulf %231, %229 : vector<24x256xf32>
    %233 = arith.addf %226, %232 : vector<24x256xf32>
    %c0_113 = arith.constant 0 : index
    %c0_114 = arith.constant 0 : index
    %234 = vector.load %arg18[%c0_113, %c0_114] : memref<24x1xf32, #tpu.memory_space<vmem>>, vector<24x1xf32>
    %235 = vector.broadcast %234 : vector<24x1xf32> to vector<24x256xf32>
    %236 = arith.addf %233, %235 : vector<24x256xf32>
    %cst_115 = arith.constant 0.000000e+00 : f32
    %237 = vector.broadcast %cst_115 : f32 to vector<24x256xf32>
    %238 = arith.maximumf %236, %237 : vector<24x256xf32>
    %c0_116 = arith.constant 0 : index
    %c0_117 = arith.constant 0 : index
    %239 = vector.load %arg19[%c0_116, %c0_117] : memref<4x24xbf16, #tpu.memory_space<vmem>>, vector<4x24xbf16>
    %240 = arith.truncf %238 : vector<24x256xf32> to vector<24x256xbf16>
    %cst_118 = arith.constant dense<0.000000e+00> : vector<4x256xf32>
    %241 = tpu.matmul %239, %240, %cst_118 {dimension_numbers = #tpu.dot_dimension_numbers<[1], [0], [0], [1], [0, 0, 1, 1], [], []>} : vector<4x24xbf16>, vector<24x256xbf16>, vector<4x256xf32> -> vector<4x256xf32>
    %c0_119 = arith.constant 0 : index
    %c0_120 = arith.constant 0 : index
    %242 = vector.load %arg20[%c0_119, %c0_120] : memref<4x1xf32, #tpu.memory_space<vmem>>, vector<4x1xf32>
    %243 = vector.broadcast %242 : vector<4x1xf32> to vector<4x256xf32>
    %244 = arith.addf %241, %243 : vector<4x256xf32>
    %245 = arith.addf %244, %166 : vector<4x256xf32>
    %c0_121 = arith.constant 0 : index
    %c0_122 = arith.constant 0 : index
    %c0_123 = arith.constant 0 : index
    %246 = vector.load %arg21[%c0_121, %c0_122, %c0_123] : memref<1x4x256xf32, #tpu.memory_space<vmem>>, vector<1x4x256xf32>
    %247 = vector.shape_cast %246 : vector<1x4x256xf32> to vector<4x256xf32>
    %248 = vector.shape_cast %245 : vector<4x256xf32> to vector<1x4x256xf32>
    tpu.vector_store %arg21[%c0_121, %c0_122, %c0_123], %248 {strides = array<i32>} : memref<1x4x256xf32, #tpu.memory_space<vmem>>, vector<1x4x256xf32>,
    return
  }
  func.func @transform_0(%arg0: i32) -> (i32, i32, i32) {
    %c0_i32 = arith.constant 0 : i32
    %c0_i32_0 = arith.constant 0 : i32
    %c0_i32_1 = arith.constant 0 : i32
    return %arg0, %c0_i32, %c0_i32_0 : i32, i32, i32
  }
  func.func @transform_1(%arg0: i32) -> (i32, i32) {
    %c0_i32 = arith.constant 0 : i32
    %c0_i32_0 = arith.constant 0 : i32
    %c0_i32_1 = arith.constant 0 : i32
    return %c0_i32, %c0_i32_0 : i32, i32
  }
  func.func @transform_2(%arg0: i32) -> (i32, i32) {
    %c0_i32 = arith.constant 0 : i32
    %c0_i32_0 = arith.constant 0 : i32
    %c0_i32_1 = arith.constant 0 : i32
    return %c0_i32, %c0_i32_0 : i32, i32
  }
  func.func @transform_3(%arg0: i32) -> (i32, i32) {
    %c0_i32 = arith.constant 0 : i32
    %c0_i32_0 = arith.constant 0 : i32
    %c0_i32_1 = arith.constant 0 : i32
    return %c0_i32, %c0_i32_0 : i32, i32
  }
  func.func @transform_4(%arg0: i32) -> (i32, i32) {
    %c0_i32 = arith.constant 0 : i32
    %c0_i32_0 = arith.constant 0 : i32
    %c0_i32_1 = arith.constant 0 : i32
    return %c0_i32, %c0_i32_0 : i32, i32
  }
  func.func @transform_5(%arg0: i32) -> (i32, i32) {
    %c0_i32 = arith.constant 0 : i32
    %c0_i32_0 = arith.constant 0 : i32
    %c0_i32_1 = arith.constant 0 : i32
    return %c0_i32, %c0_i32_0 : i32, i32
  }
  func.func @transform_6(%arg0: i32) -> (i32, i32) {
    %c0_i32 = arith.constant 0 : i32
    %c0_i32_0 = arith.constant 0 : i32
    %c0_i32_1 = arith.constant 0 : i32
    return %c0_i32, %c0_i32_0 : i32, i32
  }
  func.func @transform_7(%arg0: i32) -> (i32, i32) {
    %c0_i32 = arith.constant 0 : i32
    %c0_i32_0 = arith.constant 0 : i32
    %c0_i32_1 = arith.constant 0 : i32
    return %c0_i32, %c0_i32_0 : i32, i32
  }
  func.func @transform_8(%arg0: i32) -> (i32, i32) {
    %c0_i32 = arith.constant 0 : i32
    %c0_i32_0 = arith.constant 0 : i32
    %c0_i32_1 = arith.constant 0 : i32
    return %c0_i32, %c0_i32_0 : i32, i32
  }
  func.func @transform_9(%arg0: i32) -> (i32, i32) {
    %c0_i32 = arith.constant 0 : i32
    %c0_i32_0 = arith.constant 0 : i32
    %c0_i32_1 = arith.constant 0 : i32
    return %c0_i32, %c0_i32_0 : i32, i32
  }
  func.func @transform_10(%arg0: i32) -> (i32, i32) {
    %c0_i32 = arith.constant 0 : i32
    %c0_i32_0 = arith.constant 0 : i32
    %c0_i32_1 = arith.constant 0 : i32
    return %c0_i32, %c0_i32_0 : i32, i32
  }
  func.func @transform_11(%arg0: i32) -> (i32, i32) {
    %c0_i32 = arith.constant 0 : i32
    %c0_i32_0 = arith.constant 0 : i32
    %c0_i32_1 = arith.constant 0 : i32
    return %c0_i32, %c0_i32_0 : i32, i32
  }
  func.func @transform_12(%arg0: i32) -> (i32, i32) {
    %c0_i32 = arith.constant 0 : i32
    %c0_i32_0 = arith.constant 0 : i32
    %c0_i32_1 = arith.constant 0 : i32
    return %c0_i32, %c0_i32_0 : i32, i32
  }
  func.func @transform_13(%arg0: i32) -> (i32, i32) {
    %c0_i32 = arith.constant 0 : i32
    %c0_i32_0 = arith.constant 0 : i32
    %c0_i32_1 = arith.constant 0 : i32
    return %c0_i32, %c0_i32_0 : i32, i32
  }
  func.func @transform_14(%arg0: i32) -> (i32, i32) {
    %c0_i32 = arith.constant 0 : i32
    %c0_i32_0 = arith.constant 0 : i32
    %c0_i32_1 = arith.constant 0 : i32
    return %c0_i32, %c0_i32_0 : i32, i32
  }
  func.func @transform_15(%arg0: i32) -> (i32, i32) {
    %c0_i32 = arith.constant 0 : i32
    %c0_i32_0 = arith.constant 0 : i32
    %c0_i32_1 = arith.constant 0 : i32
    return %c0_i32, %c0_i32_0 : i32, i32
  }
  func.func @transform_16(%arg0: i32) -> (i32, i32) {
    %c0_i32 = arith.constant 0 : i32
    %c0_i32_0 = arith.constant 0 : i32
    %c0_i32_1 = arith.constant 0 : i32
    return %c0_i32, %c0_i32_0 : i32, i32
  }
  func.func @transform_17(%arg0: i32) -> (i32, i32) {
    %c0_i32 = arith.constant 0 : i32
    %c0_i32_0 = arith.constant 0 : i32
    %c0_i32_1 = arith.constant 0 : i32
    return %c0_i32, %c0_i32_0 : i32, i32
  }
  func.func @transform_18(%arg0: i32) -> (i32, i32) {
    %c0_i32 = arith.constant 0 : i32
    %c0_i32_0 = arith.constant 0 : i32
    %c0_i32_1 = arith.constant 0 : i32
    return %c0_i32, %c0_i32_0 : i32, i32
  }
  func.func @transform_19(%arg0: i32) -> (i32, i32) {
    %c0_i32 = arith.constant 0 : i32
    %c0_i32_0 = arith.constant 0 : i32
    %c0_i32_1 = arith.constant 0 : i32
    return %c0_i32, %c0_i32_0 : i32, i32
  }
  func.func @transform_20(%arg0: i32) -> (i32, i32, i32) {
    %c0_i32 = arith.constant 0 : i32
    %c0_i32_0 = arith.constant 0 : i32
    %c0_i32_1 = arith.constant 0 : i32
    return %arg0, %c0_i32, %c0_i32_0 : i32, i32, i32
  }
}

</mosaic_0001>

<bundles_post_ra>
// kernel: tpu_custom_call.1
= control target key start
LH: loop header
LB: loop body
LE: loop exit
PB: predicated region body
PF: predicated region fallthrough
CT: control target
= control target key end

     0   :  { %s4754_s0 = inlined_call_operand.vmem [shape: f32[2,4,256], index: 0, kind: input, shape index: {}]   ;;  %s4755_s1 = inlined_call_operand.vmem [shape: f32[9,256], index: 1, kind: input, shape index: {}]   ;;  %s4756_s2 = inlined_call_operand.vmem [shape: bf16[24,4], index: 2, kind: input, shape index: {}]   ;;  %s4757_s3 = inlined_call_operand.vmem [shape: f32[24,1], index: 3, kind: input, shape index: {}]   ;;  %s4758_s4 = inlined_call_operand.vmem [shape: f32[24,9], index: 4, kind: input, shape index: {}]   ;;  %s4759_s5 = inlined_call_operand.vmem [shape: f32[24,1], index: 5, kind: input, shape index: {}]   ;;  %s4760_s6 = inlined_call_operand.vmem [shape: bf16[4,24], index: 6, kind: input, shape index: {}]   ;;  %s4761_s7 = inlined_call_operand.vmem [shape: f32[4,1], index: 7, kind: input, shape index: {}]   ;;  %s4762_s8 = inlined_call_operand.vmem [shape: bf16[24,4], index: 8, kind: input, shape index: {}]   ;;  %s4763_s9 = inlined_call_operand.vmem [shape: f32[24,1], index: 9, kind: input, shape index: {}]   ;;  %s4764_s10 = inlined_call_operand.vmem [shape: f32[24,9], index: 10, kind: input, shape index: {}]   ;;  %s4765_s11 = inlined_call_operand.vmem [shape: f32[24,1], index: 11, kind: input, shape index: {}]   ;;  %s4766_s12 = inlined_call_operand.vmem [shape: bf16[4,24], index: 12, kind: input, shape index: {}]   ;;  %s4767_s13 = inlined_call_operand.vmem [shape: f32[4,1], index: 13, kind: input, shape index: {}]   ;;  %s4768_s14 = inlined_call_operand.vmem [shape: bf16[24,4], index: 14, kind: input, shape index: {}]   ;;  %s4769_s15 = inlined_call_operand.vmem [shape: f32[24,1], index: 15, kind: input, shape index: {}]   ;;  %s4770_s16 = inlined_call_operand.vmem [shape: f32[24,9], index: 16, kind: input, shape index: {}]   ;;  %s4771_s17 = inlined_call_operand.vmem [shape: f32[24,1], index: 17, kind: input, shape index: {}]   ;;  %s4772_s18 = inlined_call_operand.vmem [shape: bf16[4,24], index: 18, kind: input, shape index: {}]   ;;  %s4773_s19 = inlined_call_operand.vmem [shape: f32[4,1], index: 19, kind: input, shape index: {}]   ;;  %s4774_s20 = inlined_call_operand.hbm [shape: f32[2,4,256], index: 20, kind: output, shape index: {}]  }
   0x1   :  { %4883 = sst [smem:[#allocation38_spill]] %s4754_s0 }
   0x2   :  { %4884 = sst [smem:[#allocation39_spill]] %s4755_s1 }
   0x3   :  { %4885 = sst [smem:[#allocation40_spill]] %s4756_s2 }
   0x4   :  { %4886 = sst [smem:[#allocation41_spill]] %s4757_s3 }
   0x5   :  { %4887 = sst [smem:[#allocation42_spill]] %s4758_s4 }
   0x6   :  { %4888 = sst [smem:[#allocation43_spill]] %s4759_s5 }
   0x7   :  { %4889 = sst [smem:[#allocation44_spill]] %s4760_s6 }
   0x8   :  { %4890 = sst [smem:[#allocation45_spill]] %s4761_s7 }
   0x9   :  { %4891 = sst [smem:[#allocation46_spill]] %s4762_s8 }
   0xa   :  { %25 = vsyncpa [#allocation3], 0 }
   0xb   :  { %27 = vsyncpa [#allocation3 + $0x1], 0  ;;  %s2873_s1 = smov 0   ;;  %s2875_s22 = smov 0  }
   0xc   :  { %s2877_s23 = smov 0   ;;  %s2879_s24 = smov 0  }
   0xd LB: > { %4892 = sst [smem:[#allocation5_spill]] %s2737_s1  ;;  %s2894_s2 = sadd.s32 4294967295, %s2749_s24   ;;  %s2749_s24 = sphi %s2879_s24, %s5049_s24   ;;  %s2745_s23 = sphi %s2877_s23, %s5051_s23   ;;  %s2741_s22 = sphi %s2875_s22, %s5053_s22   ;;  %s2737_s1 = sphi %s2873_s1, %s5052_s1  }
   0xe   : > { %4893 = sst [smem:[#allocation6_spill]] %s2745_s23  ;;  %s2498_s25 = sadd.s32 4294967294, %s2749_s24  }
   0xf   : > { %4894 = sst [smem:[#allocation7_spill]] %s2749_s24  ;;  %s2898_s3 = sadd.s32 1, %s2749_s24  }
  0x10   : > { %4895 = sst [smem:[#allocation8_spill]] %s2898_s3  ;;  %s465_s26 = sadd.s32 1, %s2745_s23 }
  0x11   : > { %s462_s27 = ssub.s32 %s2749_s24, %s2898_s3  ;;  %p475_p0 = scmp.ne.s32.totalorder %s2745_s23, %s2741_s22 }
  0x12   : > { %p463_p1 = scmp.eq.s32.totalorder %s462_s27, 0  ;;  %p476_p2 = scmp.eq.s32.totalorder %s2894_s2, 1 }
  0x13   : > { %p481_p3 = scmp.ne.s32.totalorder %s2741_s22, %s2737_s1  ;;  %p482_p4 = scmp.eq.s32.totalorder %s2498_s25, 1 }
  0x14   : > { %s2909_s28 = scalar_select %p463_p1, %s2745_s23, %s465_s26  }
  0x15   : > { %p2911_p5 = por %p476_p2, %p475_p0  ;;  %p2915_p6 = por %p482_p4, %p481_p3 }
  0x16   : > { %4896 = sst [smem:[#allocation9_spill]] %s2909_s28  ;;  %p2501_p7 = scmp.ge.s32.totalorder %s2749_s24, 1 }
  0x17   : > { %s4897_s4 = scalar_select %p2911_p5, 1, 0 }
  0x18   : > { %s4899_s29 = scalar_select %p2915_p6, 1, 0 }
  0x19   : > { %4898 = sst [smem:[#allocation10_spill]] %s4897_s4  ;;  %p565_p8 = scmp.lt.s32.totalorder %s2749_s24, 3 }
  0x1a   : > { %4900 = sst [smem:[#allocation11_spill]] %s4899_s29 }
  0x1b   : > { %p566_p9 = pnand %p2501_p7, %p565_p8 }
  0x1d   : > { %569 = sbr.rel (%p566_p9) target bundleno = 1757 (0x6dd), region = 100 }
  0x22   : > { %s4901_s21 = sld [smem:[#allocation41_spill]]  ;;  %p623_p10 = scmp.lt.s32.totalorder %s2894_s2, 1  ;;  %v4797_v2 = vmov 0   ;;  %v4807_v7 = vmov 1   ;;  %vm689_vm0 = vcmask 1041408   ;;  %vm682_vm1 = vcmask 31744  }
  0x23   : > { %2609 = vset.pattern.permute.xlu1 %v4797_v2  ;;  %2608 = vset.pattern.permute.xlu0 %v4797_v2  ;;  %s4902_s3 = sld [smem:[#allocation42_spill]]  ;;  %v4803_v16 = vmov 3   ;;  %v4805_v17 = vmov 2   ;;  %v4801_v18 = vmov 5   ;;  %v4795_v22 = vmov 4   ;;  %s4814_s0 = smov 1  }
  0x24   : > { %s624_s27 = scalar_select %p623_p10, %s2894_s2, 1  ;;  %2610 = vset.pattern.permute.xlu2 %v4797_v2  ;;  %v4799_v23 = vmov 6   ;;  %v4791_v53 = vmov 7   ;;  %v4793_v62 = vmov 8   ;;  %vm1241_vm10 = vcmask 1043456  }
  0x25   : > { %s4903_s26 = sld [smem:[#allocation38_spill]]  ;;  %s4834_s25 = smov 17   ;;  %vm1237_vm11 = vcmask 195584  }
  0x26   : > { %s2547_s30 = sshll.u32 %s624_s27, 3  ;;  %s4904_s28 = sld [smem:[#allocation40_spill]] }
  0x27   : > { %s4836_s23 = smov 15   ;;  %s4812_s1 = smov 16  }
  0x28   : > { %v658_v0 = vld [vmem:[%s4901_s21 + $0x10] sm:$0xff]  ;;  %v656_v1 = vld [vmem:[%s4901_s21] sm:$0xff]  ;;  %v657_v6 = vld [vmem:[%s4901_s21 + $0x8] sm:$0xff]  ;;  %s4838_s24 = smov 113   ;;  %s4789_s4 = smov 112  }
  0x29   : > { %671 = vperm.xlu1 %2609, %v658_v0   ;;  %661 = vperm.xlu0 %2608, %v656_v1   ;;  %v2934_v3 = vld [vmem:[%s4902_s3 + $0x10] sm:$0xff]  ;;  %v2944_v5 = vld [vmem:[%s4902_s3 + $0x8] sm:$0xff]  ;;  %v2962_v15 = vld [vmem:[%s4902_s3] sm:$0xff]  ;;  %s4908_s5 = sld [smem:[#allocation43_spill]]  ;;  %s4973_s27 = smov 127  }
  0x2a   : > { %785 = vperm.xlu2 %2610, %v2934_v3   ;;  %s4949_s7 = sld [smem:[#allocation45_spill]] }
  0x2b   : > { %s627_s29 = scalar_lea.vmem %s4903_s26, %s2547_s30  ;;  %s4810_s26 = smov 127  }
  0x2c   : > { %v644_v4 = vld [vmem:[%s627_s29] sm:$0xff]  ;;  %v647_v19 = vld [vmem:[%s4904_s28 + $0x8] sm:$0xf]  ;;  %s4787_s29 = smov 111   ;;  %s4958_s6 = sld [smem:[#allocation44_spill]] }
  0x2d   : > { %649 = vst [vmem:[#allocation1] ss:$2 sm:$0xff] %v644_v4  ;;  %v2548_v14 = vld [vmem:[%s4904_s28] sm:$0xff]  ;;  %v679_v20 = vunpack.c.l.b16 %v647_v19  ;;  %s4968_s8 = sld [smem:[#allocation46_spill]]  ;;  %s4974_s30 = smov 112  }
  0x2f   : > { %v681_v21 = vpack.c.b16 %v679_v20, %v679_v20  ;;  %v1197_v19 = vld [vmem:[%s4908_s5 + $0x8] sm:$0xff] }
  0x31   : > { %780 = vperm.xlu1 %2609, %v2944_v5   ;;  %666 = vperm.xlu0 %2608, %v657_v6  }
  0x32   : > { %2613 = vset.pattern.permute.xlu2 %v4807_v7 }
  0x33   : > { %833 = vperm.xlu2 %2613, %v2934_v3  }
  0x34   : > { %v650_v8 = vld.sshfl [vmem:[#allocation1] sm:$0xff pattern:$0x75316420]  ;;  %v651_v9 = vld.sshfl [vmem:[#allocation1 + $0x8] sm:$0xff pattern:$0x75316420] }
  0x35   : > { %v654_v10 = vpack.c.bf16 %v650_v8, %v650_v8  ;;  %v655_v11 = vpack.c.bf16 %v651_v9, %v651_v9 }
  0x37   : > { %v691_v12 = vsel %vm689_vm0, %v654_v10, 0  ;;  %v694_v13 = vsel %vm689_vm0, %v655_v11, 0 }
  0x38   : > { %703 = vmatpush.bf16.msra.mxu0 %v691_v12  ;;  %721 = vmatpush.bf16.msra.mxu1 %v694_v13 }
  0x39   : > { %2612 = vset.pattern.permute.xlu1 %v4807_v7  ;;  %775 = vperm.xlu0 %2608, %v2962_v15  }
  0x3a   : > { %829 = vperm.xlu1 %2612, %v2944_v5  }
  0x3b   : > { %2516 = vmatmul.msk.bf16.vlgmr.msra.gmra.mxu0 %vm682_vm1, %v2548_v14  ;;  %2615 = vset.pattern.permute.xlu2 %v4803_v16 }
  0x3c   : > { %2518 = vmatmul.msk.bf16.vlgmr.msra.gmra.mxu1 %vm682_vm1, %v2548_v14  ;;  %941 = vperm.xlu2 %2615, %v2934_v3  }
  0x41   : > { %2611 = vset.pattern.permute.xlu0 %v4807_v7 }
  0x42   : > { %2614 = vset.pattern.permute.xlu1 %v4805_v17  ;;  %825 = vperm.xlu0 %2611, %v2962_v15  }
  0x43   : > { %879 = vperm.xlu1 %2614, %v2962_v15  }
  0x44   : > { %2617 = vset.pattern.permute.xlu2 %v4801_v18 }
  0x45   : > { %1019 = vperm.xlu2 %2617, %v2934_v3  }
  0x4a   : > { %2616 = vset.pattern.permute.xlu0 %v4795_v22 }
  0x4b   : > { %887 = vperm.xlu1 %2614, %v2934_v3   ;;  %2517 = vmatmul.msk.bf16.gmra.mxu0 %vm682_vm1, %v681_v21 }
  0x4c   : > { %2519 = vmatmul.msk.bf16.gmra.mxu1 %vm682_vm1, %v681_v21  ;;  %965 = vperm.xlu0 %2616, %v2934_v3  }
  0x4d   : > { %2622 = vset.pattern.permute.xlu2 %v4795_v22 }
  0x4e   : > { %961 = vperm.xlu2 %2622, %v2944_v5  }
  0x53   : > { %883 = vperm.xlu1 %2614, %v2944_v5  }
  0x54   : > { %2618 = vset.pattern.permute.xlu0 %v4803_v16 }
  0x55   : > { %933 = vperm.xlu0 %2618, %v2962_v15  }
  0x56   : > { %2624 = vset.pattern.permute.xlu2 %v4801_v18 }
  0x5b   : > { %2619 = vset.pattern.permute.xlu1 %v4803_v16  ;;  %v750_v16 = vlaneseq }
  0x5c   : > { %937 = vperm.xlu1 %2619, %v2944_v5  }
  0x5d   : > { %2620 = vset.pattern.permute.xlu0 %v4799_v23 }
  0x5e   : > { %1073 = vperm.xlu0 %2620, %v2934_v3  }
  0x64   : > { %2621 = vset.pattern.permute.xlu1 %v4795_v22 }
  0x65   : > { %957 = vperm.xlu1 %2621, %v2962_v15  }
  0x66   : > { %2625 = vset.pattern.permute.xlu0 %v4801_v18 }
  0x6d   : > { %2623 = vset.pattern.permute.xlu1 %v4791_v53 }
  0x84   : > { %v3040_v44 = vpop.permute.xlu2 %785 }
  0x8d   : > { %v3052_v48 = vpop.permute.xlu2 %833 }
  0x96   : > { %v3064_v51 = vpop.permute.xlu2 %941 }
  0x9b   : > { %v662_v24 = vpop.permute.xlu0 %661  ;;  %v672_v41 = vpop.permute.xlu1 %671 }
  0x9f   : > { %v3075_v54 = vpop.permute.xlu2 %1019 }
  0xa0   : > { %4905 = vst [vmem:[#allocation12_spill] sm:$0xff] %v3075_v54 }
  0xa3   : > { %v667_v35 = vpop.permute.xlu0 %666  ;;  %v3044_v46 = vpop.permute.xlu1 %780 }
  0xa8   : > { %v3093_v57 = vpop.permute.xlu2 %961 }
  0xab   : > { %v3089_v56 = vpop.permute.xlu0 %775 }
  0xac   : > { %v3056_v50 = vpop.permute.xlu1 %829 }
  0xb4   : > { %v3101_v59 = vpop.permute.xlu0 %825 }
  0xb5   : > { %v3072_v52 = vpop.permute.xlu1 %879 }
  0xb8   : > { %v705_v25 = vpop.f32.mrf.mxu0 }
  0xb9   : > { %v706_v26 = vadd.f32 %v705_v25, %v662_v24  ;;  %v723_v27 = vpop.f32.mrf.mxu1 }
  0xba   : > { %v724_v28 = vadd.f32 %v723_v27, %v662_v24 }
  0xbb   : > { %v2996_v29 = vmax.f32 %v706_v26, 0.0 }
  0xbc   : > { %v2998_v30 = vmax.f32 %v724_v28, 0.0  ;;  %v1198_v28 = vld [vmem:[%s4908_s5 + $0x10] sm:$0xff] }
  0xbd   : > { %902 = vrot.lane.b32.xlu2 %v2996_v29, %s4814_s0  ;;  %738 = vrot.lane.b32.xlu1 %v2996_v29, %s4834_s25  ;;  %v3083_v55 = vpop.permute.xlu1 %887 }
  0xbe   : > { %744 = vrot.lane.b32.xlu0 %v2998_v30, %s4834_s25  ;;  %v3116_v0 = vpop.permute.xlu0 %965 }
  0xc0   : > { %v707_v31 = vpop.f32.mrf.mxu0 }
  0xc1   : > { %v725_v32 = vpop.f32.mrf.mxu1  ;;  %v708_v36 = vadd.f32 %v707_v31, %v667_v35 }
  0xc2   : > { %v726_v40 = vadd.f32 %v725_v32, %v667_v35 }
  0xc3   : > { %v3018_v39 = vmax.f32 %v708_v36, 0.0 }
  0xc4   : > { %v3032_v42 = vmax.f32 %v726_v40, 0.0 }
  0xc5   : > { %980 = vrot.lane.b32.xlu2 %v2996_v29, %s4810_s26  ;;  %848 = vrot.lane.b32.xlu1 %v2996_v29, %s4836_s23  ;;  %v3095_v58 = vpop.permute.xlu1 %883 }
  0xc6   : > { %794 = vrot.lane.b32.xlu0 %v2996_v29, %s4812_s1 }
  0xc7   : > { %v3127_v6 = vpop.permute.xlu0 %933 }
  0xc8   : > { %v710_v33 = vpop.f32.mrf.mxu0 }
  0xc9   : > { %v728_v34 = vpop.f32.mrf.mxu1  ;;  %v711_v43 = vadd.f32 %v710_v33, %v672_v41 }
  0xca   : > { %v729_v47 = vadd.f32 %v728_v34, %v672_v41 }
  0xcb   : > { %v3042_v45 = vmax.f32 %v711_v43, 0.0  ;;  %v1196_v43 = vld [vmem:[%s4908_s5] sm:$0xff]  ;;  %s2707_s5 = scalar_lea.hbm %s4774_s20, 16 }
  0xcc   : > { %v3054_v49 = vmax.f32 %v729_v47, 0.0 }
  0xcd   : > { %1040 = vrot.lane.b32.xlu2 %v2998_v30, %s4838_s24  ;;  %854 = vrot.lane.b32.xlu1 %v2998_v30, %s4836_s23 }
  0xce   : > { %800 = vrot.lane.b32.xlu0 %v2998_v30, %s4812_s1  ;;  %v3106_v61 = vpop.permute.xlu1 %937 }
  0xcf   : > { %4906 = vst [vmem:[#allocation13_spill] sm:$0xff] %v3106_v61 }
  0xd0   : > { %v712_v37 = vpop.f32.mrf.mxu0  ;;  %v3140_v9 = vpop.permute.xlu0 %1073 }
  0xd1   : > { %v730_v38 = vpop.f32.mrf.mxu1  ;;  %4907 = vst [vmem:[#allocation14_spill] sm:$0xff] %v3140_v9 }
  0xd5   : > { %740 = vrot.lane.b32.xlu2 %v3018_v39, %s4834_s25  ;;  %908 = vrot.lane.b32.xlu1 %v2998_v30, %s4814_s0 }
  0xd6   : > { %1034 = vrot.lane.b32.xlu0 %v2996_v29, %s4838_s24 }
  0xd7   : > { %v3121_v1 = vpop.permute.xlu1 %957 }
  0xdd   : > { %850 = vrot.lane.b32.xlu2 %v3018_v39, %s4836_s23  ;;  %986 = vrot.lane.b32.xlu1 %v2998_v30, %s4810_s26 }
  0xde   : > { %904 = vrot.lane.b32.xlu0 %v3018_v39, %s4814_s0 }
  0xe5   : > { %856 = vrot.lane.b32.xlu2 %v3032_v42, %s4836_s23  ;;  %746 = vrot.lane.b32.xlu1 %v3032_v42, %s4834_s25 }
  0xe6   : > { %982 = vrot.lane.b32.xlu0 %v3018_v39, %s4810_s26 }
  0xed   : > { %910 = vrot.lane.b32.xlu2 %v3032_v42, %s4814_s0  ;;  %796 = vrot.lane.b32.xlu1 %v3018_v39, %s4812_s1 }
  0xee   : > { %852 = vrot.lane.b32.xlu0 %v3042_v45, %s4836_s23 }
  0xf5   : > { %988 = vrot.lane.b32.xlu2 %v3032_v42, %s4810_s26  ;;  %802 = vrot.lane.b32.xlu1 %v3032_v42, %s4812_s1 }
  0xf6   : > { %858 = vrot.lane.b32.xlu0 %v3054_v49, %s4836_s23 }
  0xfd   : > { %742 = vrot.lane.b32.xlu2 %v3042_v45, %s4834_s25  ;;  %1036 = vrot.lane.b32.xlu1 %v3018_v39, %s4838_s24 }
  0xfe   : > { %912 = vrot.lane.b32.xlu0 %v3054_v49, %s4814_s0 }
 0x105   : > { %748 = vrot.lane.b32.xlu2 %v3054_v49, %s4834_s25  ;;  %990 = vrot.lane.b32.xlu1 %v3054_v49, %s4810_s26 }
 0x106   : > { %984 = vrot.lane.b32.xlu0 %v3042_v45, %s4810_s26  ;;  %s4919_s26 = sld [smem:[#allocation39_spill]] }
 0x10c   : > { %v629_v9 = vld [vmem:[%s4919_s26] ss:$8 sm:$0x3] }
 0x10d   : > { %798 = vrot.lane.b32.xlu2 %v3042_v45, %s4812_s1  ;;  %1044 = vrot.lane.b32.xlu1 %v3054_v49, %s4838_s24 }
 0x10e   : > { %1042 = vrot.lane.b32.xlu0 %v3032_v42, %s4838_s24 }
 0x115   : > { %804 = vrot.lane.b32.xlu2 %v3054_v49, %s4812_s1  ;;  %1098 = vrot.lane.b32.xlu1 %v3054_v49, %s4789_s4  ;;  %s5029_s1 = smov 17  }
 0x116   : > { %1015 = vperm.xlu0 %2625, %v2944_v5  }
 0x117   : > { %v3104_v60 = vpop.permute.xlu2 %902 }
 0x11d   : > { %906 = vrot.lane.b32.xlu2 %v3042_v45, %s4814_s0  ;;  %1146 = vrot.lane.b32.xlu1 %v3042_v45, %s4787_s29  ;;  %s4982_s0 = smov 111  }
 0x11e   : > { %2626 = vset.pattern.permute.xlu0 %v4793_v62 }
 0x11f   : > { %1181 = vperm.xlu0 %2626, %v2934_v3   ;;  %v3114_v63 = vpop.permute.xlu2 %980 }
 0x125   : > { %1038 = vrot.lane.b32.xlu2 %v3042_v45, %s4838_s24  ;;  %1127 = vperm.xlu1 %2623, %v2934_v3  }
 0x127   : > { %1148 = vrot.lane.b32.xlu0 %v2998_v30, %s4787_s29  ;;  %v3125_v4 = vpop.permute.xlu2 %1040 }
 0x128   : > { %2630 = vset.pattern.permute.xlu0 %v4791_v53 }
 0x12d   : > { %1092 = vrot.lane.b32.xlu2 %v3042_v45, %s4789_s4  ;;  %1088 = vrot.lane.b32.xlu1 %v2996_v29, %s4789_s4 }
 0x12e   : > { %2627 = vset.pattern.permute.xlu1 %v4799_v23 }
 0x12f   : > { %v3135_v3 = vpop.permute.xlu2 %740  ;;  %v3137_v8 = vpop.permute.xlu1 %738  ;;  %1123 = vperm.xlu0 %2630, %v2944_v5  }
 0x130   : > { %v3151_v12 = vpop.permute.xlu0 %744 }
 0x135   : > { %1152 = vrot.lane.b32.xlu2 %v3054_v49, %s4787_s29  ;;  %1094 = vrot.lane.b32.xlu1 %v2998_v30, %s4789_s4 }
 0x137   : > { %v3146_v10 = vpop.permute.xlu2 %850  ;;  %v3148_v11 = vpop.permute.xlu1 %848  ;;  %2635 = vset.pattern.permute.xlu0 %v4797_v2 }
 0x138   : > { %1206 = vperm.xlu0 %2635, %v1197_v19   ;;  %v3166_v20 = vpop.permute.xlu0 %794 }
 0x13d   : > { %1011 = vperm.xlu2 %2624, %v2962_v15   ;;  %1065 = vperm.xlu1 %2627, %v2962_v15  }
 0x13f   : > { %v3155_v13 = vpop.permute.xlu2 %856  ;;  %v3157_v14 = vpop.permute.xlu1 %854 }
 0x140   : > { %2637 = vset.pattern.permute.xlu0 %v4807_v7  ;;  %v801_v27 = vpop.permute.xlu0 %800 }
 0x145   : > { %1090 = vrot.lane.b32.xlu2 %v3018_v39, %s4789_s4  ;;  %1142 = vrot.lane.b32.xlu1 %v2996_v29, %s4787_s29 }
 0x146   : > { %2628 = vset.pattern.permute.xlu2 %v4799_v23  ;;  %2631 = vset.pattern.permute.xlu1 %v4797_v2 }
 0x147   : > { %v3170_v21 = vpop.permute.xlu2 %910  ;;  %v3172_v24 = vpop.permute.xlu1 %908 }
 0x148   : > { %v3191_v33 = vpop.permute.xlu0 %1034 }
 0x14d   : > { %1096 = vrot.lane.b32.xlu2 %v3032_v42, %s4789_s4  ;;  %1150 = vrot.lane.b32.xlu1 %v3032_v42, %s4787_s29  ;;  %s4969_s4 = smov 1  }
 0x14f   : > { %v3179_v25 = vpop.permute.xlu2 %988  ;;  %v3181_v26 = vpop.permute.xlu1 %986 }
 0x150   : > { %4909 = vst [vmem:[#allocation15_spill] sm:$0xff] %v3179_v25  ;;  %v3202_v36 = vpop.permute.xlu0 %904  ;;  %v3279_v25 = vperm.slane %v629_v9, 1 }
 0x155   : > { %1069 = vperm.xlu2 %2628, %v2944_v5   ;;  %1211 = vperm.xlu1 %2631, %v1198_v28  }
 0x157   : > { %v3187_v31 = vpop.permute.xlu2 %742  ;;  %v3189_v32 = vpop.permute.xlu1 %746 }
 0x158   : > { %v3211_v40 = vpop.permute.xlu0 %982 }
 0x159   : > { %4910 = vst [vmem:[#allocation16_spill] sm:$0xff] %v3211_v40  ;;  %v3277_v40 = vperm.slane %v629_v9, 0  ;;  %v3296_v9 = vmul.f32 %v3093_v57, %v3018_v39 }
 0x15b   : > { %4924 = vst [vmem:[#allocation28_spill] sm:$0xff] %v3296_v9 }
 0x15d   : > { %1144 = vrot.lane.b32.xlu2 %v3018_v39, %s4787_s29  ;;  %2633 = vset.pattern.permute.xlu1 %v4793_v62  ;;  %s4970_s29 = smov 16  }
 0x15e   : > { %1177 = vperm.xlu1 %2633, %v2944_v5   ;;  %2629 = vset.pattern.permute.xlu2 %v4791_v53 }
 0x15f   : > { %v3198_v34 = vpop.permute.xlu2 %748  ;;  %v3200_v35 = vpop.permute.xlu1 %796 }
 0x160   : > { %v3226_v28 = vpop.permute.xlu0 %852 }
 0x165   : > { %1119 = vperm.xlu2 %2629, %v2962_v15  }
 0x166   : > { %2636 = vset.pattern.permute.xlu1 %v4797_v2 }
 0x167   : > { %v3206_v37 = vpop.permute.xlu2 %798  ;;  %v3208_v38 = vpop.permute.xlu1 %802 }
 0x168   : > { %v3235_v22 = vpop.permute.xlu0 %858 }
 0x16d   : > { %2632 = vset.pattern.permute.xlu2 %v4793_v62 }
 0x16e   : > { %1173 = vperm.xlu2 %2632, %v2962_v15   ;;  %v1279_v15 = vld [vmem:[%s4763_s9] sm:$0xff] }
 0x16f   : > { %v3214_v5 = vpop.permute.xlu2 %804  ;;  %v3216_v41 = vpop.permute.xlu1 %1036 }
 0x170   : > { %4911 = vst [vmem:[#allocation17_spill] sm:$0xff] %v3216_v41  ;;  %v3244_v18 = vpop.permute.xlu0 %912  ;;  %v3256_v41 = vand.u32 127, %v750_v16 }
 0x172   : > { %vm806_vm2 = vcmp.lt.s32.totalorder %v3256_v41, 16  ;;  %vm752_vm3 = vcmp.lt.s32.totalorder %v3256_v41, 17  ;;  %vm860_vm4 = vcmp.lt.s32.totalorder %v3256_v41, 15  ;;  %vm914_vm5 = vcmp.lt.s32.totalorder %v3256_v41, 1 }
 0x173   : > { %v807_v61 = vsel %vm806_vm2, %v3166_v20, %v801_v27  ;;  %vm1046_vm6 = vcmp.lt.s32.totalorder %v3256_v41, 113  ;;  %vm992_vm7 = vcmp.lt.s32.totalorder %v3256_v41, 127  ;;  %vm1100_vm8 = vcmp.lt.s32.totalorder %v3256_v41, 112 }
 0x174   : > { %vm1154_vm9 = vcmp.lt.s32.totalorder %v3256_v41, 111 }
 0x176   : > { %2634 = vset.pattern.permute.xlu2 %v4797_v2 }
 0x177   : > { %1201 = vperm.xlu2 %2634, %v1196_v43   ;;  %v3222_v47 = vpop.permute.xlu2 %906  ;;  %v3224_v19 = vpop.permute.xlu1 %990  ;;  %v1281_v43 = vld [vmem:[%s4763_s9 + $0x10] sm:$0xff] }
 0x178   : > { %v3265_v54 = vpop.permute.xlu0 %984 }
 0x179   : > { %4920 = vst [vmem:[#allocation25_spill] sm:$0xff] %v3265_v54 }
 0x17f   : > { %1284 = vperm.xlu2 %2634, %v1279_v15   ;;  %v3231_v53 = vpop.permute.xlu2 %1038  ;;  %v3233_v62 = vpop.permute.xlu1 %1044  ;;  %v3249_v15 = vld [vmem:[%s4764_s10 + $0x10] sm:$0xff] }
 0x180   : > { %4912 = vst [vmem:[#allocation18_spill] sm:$0xff] %v3231_v53  ;;  %v810_v53 = vsel %vm806_vm2, %v801_v27, %v3166_v20  ;;  %v756_v20 = vsel %vm752_vm3, %v3151_v12, %v3137_v8  ;;  %v3309_v27 = vmul.f32 %v3093_v57, %v3032_v42  ;;  %v861_v42 = vsel %vm860_vm4, %v3148_v11, %v3157_v14 }
 0x181   : > { %4913 = vst [vmem:[#allocation19_spill] sm:$0xff] %v3233_v62  ;;  %v3334_v57 = vmul.f32 %v3116_v0, %v3042_v45 }
 0x182   : > { %4916 = vst [vmem:[#allocation22_spill] sm:$0xff] %v3249_v15 }
 0x183   : > { %4925 = vst [vmem:[#allocation29_spill] sm:$0xff] %v3309_v27 }
 0x187   : > { %1294 = vperm.xlu2 %2634, %v1281_v43   ;;  %v3240_v2 = vpop.permute.xlu2 %1092  ;;  %v3242_v23 = vpop.permute.xlu1 %1098  ;;  %v2505_v43 = vld [vmem:[%s4919_s26 + $0x1] ss:$8 sm:$0x3] }
 0x188   : > { %4914 = vst [vmem:[#allocation20_spill] sm:$0xff] %v3240_v2  ;;  %v3268_v2 = vperm.slane %v2505_v43, 0 }
 0x189   : > { %4915 = vst [vmem:[#allocation21_spill] sm:$0xff] %v3242_v23  ;;  %v4923_v23 = vmov 1  }
 0x18f   : > { %1398 = vperm.xlu2 %2634, %v3249_v15   ;;  %v3252_v17 = vpop.permute.xlu2 %1152  ;;  %v3254_v7 = vpop.permute.xlu1 %1146 }
 0x190   : > { %4917 = vst [vmem:[#allocation23_spill] sm:$0xff] %v3252_v17  ;;  %v3270_v17 = vperm.slane %v2505_v43, 1  ;;  %v2506_v43 = vld [vmem:[%s4919_s26 + $0x2] ss:$8 sm:$0x3] }
 0x191   : > { %4918 = vst [vmem:[#allocation24_spill] sm:$0xff] %v3254_v7  ;;  %v3314_v9 = vperm.slane %v2506_v43, 0 }
 0x192   : > { %v819_v39 = vmul.f32 %v3270_v17, %v807_v61  ;;  %v915_v61 = vsel %vm914_vm5, %v3104_v60, %v3172_v24 }
 0x197   : > { %v3272_v16 = vpop.permute.xlu2 %1011  ;;  %v3274_v7 = vpop.permute.xlu1 %1127  ;;  %2639 = vset.pattern.permute.xlu2 %v4923_v23  ;;  %v2507_v23 = vld [vmem:[%s4919_s26 + $0x3] ss:$8 sm:$0x3] }
 0x198   : > { %4921 = vst [vmem:[#allocation26_spill] sm:$0xff] %v3272_v16  ;;  %1440 = vperm.xlu2 %2639, %v3249_v15   ;;  %v753_v16 = vsel %vm752_vm3, %v3137_v8, %v3151_v12  ;;  %v818_v15 = vmul.f32 %v3268_v2, %v810_v53  ;;  %v3318_v62 = vperm.slane %v2507_v23, 0  ;;  %v3320_v54 = vperm.slane %v2507_v23, 1 }
 0x199   : > { %4922 = vst [vmem:[#allocation27_spill] sm:$0xff] %v3274_v7  ;;  %v3316_v7 = vperm.slane %v2506_v43, 1  ;;  %v764_v8 = vmul.f32 %v3277_v40, %v756_v20  ;;  %v765_v12 = vmul.f32 %v3279_v25, %v753_v16  ;;  %v864_v53 = vsel %vm860_vm4, %v3157_v14, %v3148_v11 }
 0x19a   : > { %v3338_v23 = vmul.f32 %v3116_v0, %v3054_v49  ;;  %v918_v16 = vsel %vm914_vm5, %v3172_v24, %v3104_v60  ;;  %v3350_v11 = vmul.f32 %v3121_v1, %v2996_v29  ;;  %v836_v45 = vmul.f32 %v3101_v59, %v818_v15  ;;  %v2509_v49 = vld [vmem:[%s4919_s26 + $0x6] ss:$8 sm:$0x3]  ;;  %v3372_v15 = vpop.permute.xlu0 %1042 }
 0x19b   : > { %v837_v14 = vmul.f32 %v3101_v59, %v819_v39  ;;  %v862_v29 = vsel %vm860_vm4, %v3146_v10, %v3155_v13  ;;  %v865_v59 = vsel %vm860_vm4, %v3155_v13, %v3146_v10  ;;  %v872_v60 = vmul.f32 %v3314_v9, %v864_v53 }
 0x19c   : > { %4926 = vst [vmem:[#allocation30_spill] sm:$0xff] %v3338_v23  ;;  %v873_v24 = vmul.f32 %v3316_v7, %v861_v42  ;;  %v4929_v20 = vmov 2   ;;  %v788_v39 = vmul.f32 %v3089_v56, %v764_v8  ;;  %v926_v27 = vmul.f32 %v3318_v62, %v918_v16 }
 0x19d   : > { %v3381_v23 = vmul.f32 %v3121_v1, %v2998_v30  ;;  %v3383_v10 = vperm.slane %v2509_v49, 0  ;;  %v3385_v13 = vperm.slane %v2509_v49, 1  ;;  %v874_v42 = vmul.f32 %v3314_v9, %v865_v59 }
 0x19e   : > { %v875_v8 = vmul.f32 %v3316_v7, %v862_v29  ;;  %v842_v53 = vadd.f32 %v836_v45, %v788_v39  ;;  %v891_v30 = vmul.f32 %v3072_v52, %v873_v24  ;;  %v1047_v1 = vsel %vm1046_vm6, %v3191_v33, %v3125_v4 }
 0x19f   : > { %v3358_v0 = vpop.permute.xlu2 %1090  ;;  %v3360_v43 = vpop.permute.xlu1 %1088  ;;  %4930 = vst [vmem:[#allocation33_spill] sm:$0xff] %v3385_v13  ;;  %v812_v16 = vsel %vm806_vm2, %v3214_v5, %v3206_v37  ;;  %v1050_v45 = vsel %vm1046_vm6, %v3125_v4, %v3191_v33  ;;  %v755_v59 = vsel %vm752_vm3, %v3187_v31, %v3198_v34  ;;  %v758_v4 = vsel %vm752_vm3, %v3198_v34, %v3187_v31 }
 0x1a0   : > { %4927 = vst [vmem:[#allocation31_spill] sm:$0xff] %v3358_v0  ;;  %2641 = vset.pattern.permute.xlu2 %v4929_v20  ;;  %v927_v0 = vmul.f32 %v3320_v54, %v915_v61  ;;  %v890_v61 = vmul.f32 %v3072_v52, %v872_v60  ;;  %v809_v52 = vsel %vm806_vm2, %v3206_v37, %v3214_v5 }
 0x1a1   : > { %4928 = vst [vmem:[#allocation32_spill] sm:$0xff] %v3360_v43  ;;  %v789_v43 = vmul.f32 %v3089_v56, %v765_v12  ;;  %v2508_v12 = vld [vmem:[%s4919_s26 + $0x5] ss:$8 sm:$0x3]  ;;  %v822_v37 = vmul.f32 %v3268_v2, %v812_v16  ;;  %v3434_v60 = vmul.f32 %v3095_v58, %v875_v8  ;;  %v3437_v24 = vmul.f32 %v3383_v10, %v1047_v1 }
 0x1a2   : > { %v945_v49 = vmul.f32 %v3127_v6, %v927_v0  ;;  %v3415_v29 = vperm.slane %v2508_v12, 1  ;;  %v896_v33 = vadd.f32 %v890_v61, %v842_v53  ;;  %v3440_v39 = vmul.f32 %v3385_v13, %v1050_v45 }
 0x1a3   : > { %v843_v56 = vadd.f32 %v837_v14, %v789_v43  ;;  %v944_v14 = vmul.f32 %v3127_v6, %v926_v27  ;;  %v3413_v43 = vperm.slane %v2508_v12, 0  ;;  %v3426_v6 = vmul.f32 %v3095_v58, %v874_v42 }
 0x1a4   : > { %v823_v31 = vmul.f32 %v3270_v17, %v809_v52  ;;  %v768_v53 = vmul.f32 %v3277_v40, %v758_v4  ;;  %v993_v58 = vsel %vm992_vm7, %v3114_v63, %v3181_v26  ;;  %v866_v8 = vsel %vm860_vm4, %v3235_v22, %v3226_v28 }
 0x1a5   : > { %v897_v27 = vadd.f32 %v891_v30, %v843_v56  ;;  %v950_v34 = vadd.f32 %v944_v14, %v896_v33  ;;  %v769_v56 = vmul.f32 %v3279_v25, %v755_v59  ;;  %v808_v12 = vsel %vm806_vm2, %v3200_v35, %v3208_v38  ;;  %v3461_v30 = vpop.permute.xlu0 %1015 }
 0x1a6   : > { %v811_v61 = vsel %vm806_vm2, %v3208_v38, %v3200_v35  ;;  %v863_v1 = vsel %vm860_vm4, %v3226_v28, %v3235_v22  ;;  %v840_v16 = vmul.f32 %v3052_v48, %v822_v37  ;;  %v917_v45 = vsel %vm914_vm5, %v3222_v47, %v3244_v18 }
 0x1a7   : > { %v3429_v5 = vpop.permute.xlu2 %1096  ;;  %v3431_v0 = vpop.permute.xlu1 %1094  ;;  %v951_v42 = vadd.f32 %v945_v49, %v897_v27  ;;  %v920_v14 = vsel %vm914_vm5, %v3244_v18, %v3222_v47  ;;  %v919_v35 = vsel %vm914_vm5, %v3170_v21, %v3202_v36  ;;  %v754_v22 = vsel %vm752_vm3, %v3135_v3, %v3189_v32 }
 0x1a8   : > { %v757_v38 = vsel %vm752_vm3, %v3189_v32, %v3135_v3  ;;  %v841_v28 = vmul.f32 %v3052_v48, %v823_v31  ;;  %v792_v49 = vmul.f32 %v3040_v44, %v768_v53  ;;  %v793_v18 = vmul.f32 %v3040_v44, %v769_v56 }
 0x1a9   : > { %v876_v47 = vmul.f32 %v3314_v9, %v866_v8  ;;  %v820_v52 = vmul.f32 %v3268_v2, %v811_v61  ;;  %v877_v59 = vmul.f32 %v3316_v7, %v863_v1  ;;  %v821_v4 = vmul.f32 %v3270_v17, %v808_v12 }
 0x1aa   : > { %v930_v33 = vmul.f32 %v3318_v62, %v920_v14  ;;  %v931_v27 = vmul.f32 %v3320_v54, %v917_v45  ;;  %v766_v3 = vmul.f32 %v3277_v40, %v757_v38  ;;  %v767_v48 = vmul.f32 %v3279_v25, %v754_v22  ;;  %v4931_v14 = vld [vmem:[#allocation25_spill] sm:$0xff] }
 0x1ab   : > { %v846_v32 = vadd.f32 %v840_v16, %v792_v49  ;;  %v3500_v37 = vadd.f32 %v3350_v11, %v950_v34  ;;  %v916_v53 = vsel %vm914_vm5, %v3202_v36, %v3170_v21  ;;  %v996_v56 = vsel %vm992_vm7, %v3181_v26, %v3114_v63 }
 0x1ac   : > { %v847_v8 = vadd.f32 %v841_v28, %v793_v18  ;;  %v3515_v12 = vadd.f32 %v3381_v23, %v951_v42  ;;  %v928_v11 = vmul.f32 %v3318_v62, %v919_v35  ;;  %v3519_v34 = vmul.f32 %v3413_v43, %v993_v58  ;;  %v4933_v35 = vld [vmem:[#allocation18_spill] sm:$0xff]  ;;  %v4934_v28 = vld [vmem:[#allocation13_spill] sm:$0xff] }
 0x1ad   : > { %v894_v61 = vmul.f32 %v3083_v55, %v876_v47  ;;  %v838_v1 = vmul.f32 %v3056_v50, %v820_v52  ;;  %v895_v21 = vmul.f32 %v3083_v55, %v877_v59  ;;  %v839_v36 = vmul.f32 %v3056_v50, %v821_v4  ;;  %v3544_v38 = vpop.permute.xlu0 %1181 }
 0x1ae   : > { %v948_v16 = vmul.f32 %v3064_v51, %v930_v33  ;;  %v949_v63 = vmul.f32 %v3064_v51, %v931_v27  ;;  %v3528_v26 = vmul.f32 %v3415_v29, %v996_v56  ;;  %v790_v23 = vmul.f32 %v3044_v46, %v766_v3  ;;  %v4932_v51 = vld [vmem:[#allocation19_spill] sm:$0xff]  ;;  %v4936_v27 = vld [vmem:[#allocation16_spill] sm:$0xff] }
 0x1af   : > { %v3502_v44 = vpop.permute.xlu2 %1069  ;;  %v3504_v31 = vpop.permute.xlu1 %1065  ;;  %v791_v42 = vmul.f32 %v3044_v46, %v767_v48  ;;  %v900_v58 = vadd.f32 %v894_v61, %v846_v32  ;;  %v901_v45 = vadd.f32 %v895_v21, %v847_v8  ;;  %v995_v55 = vsel %vm992_vm7, %v4931_v14, %v3224_v19  ;;  %v4935_v33 = vld [vmem:[#allocation15_spill] sm:$0xff] }
 0x1b0   : > { %v998_v50 = vsel %vm992_vm7, %v3224_v19, %v4931_v14  ;;  %v1049_v22 = vsel %vm1046_vm6, %v4933_v35, %v4932_v51  ;;  %v929_v46 = vmul.f32 %v3320_v54, %v916_v53  ;;  %v946_v49 = vmul.f32 %v4934_v28, %v928_v11  ;;  %v2510_v19 = vld [vmem:[%s4919_s26 + $0x7] ss:$8 sm:$0x3]  ;;  %v2511_v56 = vld [vmem:[%s4919_s26 + $0x10] ss:$8 sm:$0x3] }
 0x1b1   : > { %v844_v18 = vadd.f32 %v838_v1, %v790_v23  ;;  %v1052_v47 = vsel %vm1046_vm6, %v4932_v51, %v4933_v35  ;;  %v845_v52 = vadd.f32 %v839_v36, %v791_v42  ;;  %v954_v59 = vadd.f32 %v948_v16, %v900_v58  ;;  %v4940_v23 = vld [vmem:[#allocation20_spill] sm:$0xff]  ;;  %v4941_v14 = vld [vmem:[#allocation30_spill] sm:$0xff] }
 0x1b2   : > { %v955_v4 = vadd.f32 %v949_v63, %v901_v45  ;;  %v994_v3 = vsel %vm992_vm7, %v4936_v27, %v4935_v33  ;;  %v1008_v48 = vmul.f32 %v3413_v43, %v995_v55  ;;  %v1009_v32 = vmul.f32 %v3415_v29, %v998_v50  ;;  %v4939_v63 = vld [vmem:[#allocation21_spill] sm:$0xff] }
 0x1b3   : > { %v1062_v53 = vmul.f32 %v3383_v10, %v1049_v22  ;;  %v997_v61 = vsel %vm992_vm7, %v4935_v33, %v4936_v27  ;;  %v1063_v1 = vmul.f32 %v3385_v13, %v1052_v47  ;;  %v3575_v21 = vperm.slane %v2510_v19, 0 }
 0x1b4   : > { %v3577_v36 = vperm.slane %v2510_v19, 1  ;;  %v898_v16 = vadd.f32 %v3426_v6, %v844_v18  ;;  %v1103_v42 = vsel %vm1100_vm8, %v4940_v23, %v4939_v63  ;;  %v1106_v58 = vsel %vm1100_vm8, %v4939_v63, %v4940_v23  ;;  %v4943_v6 = vld [vmem:[#allocation12_spill] sm:$0xff]  ;;  %v4944_v18 = vld [vmem:[#allocation14_spill] sm:$0xff]  ;;  %v4948_v63 = vld [vmem:[#allocation27_spill] sm:$0xff] }
 0x1b5   : > { %4937 = vst [vmem:[#allocation25_spill] sm:$0xff] %v3575_v21  ;;  %v978_v45 = vadd.f32 %v3334_v57, %v954_v59  ;;  %v979_v55 = vadd.f32 %v4941_v14, %v955_v4  ;;  %v899_v50 = vadd.f32 %v3434_v60, %v845_v52  ;;  %v3592_v51 = vperm.slane %v2511_v56, 0  ;;  %v4946_v59 = vld [vmem:[#allocation23_spill] sm:$0xff]  ;;  %v4947_v4 = vld [vmem:[#allocation24_spill] sm:$0xff]  ;;  %v1231_v14 = vld [vmem:[%s4949_s7] sm:$0xf] }
 0x1b6   : > { %4938 = vst [vmem:[#allocation19_spill] sm:$0xff] %v3577_v36  ;;  %v1026_v35 = vmul.f32 %v4943_v6, %v1008_v48  ;;  %v1027_v22 = vmul.f32 %v4943_v6, %v1009_v32  ;;  %v1080_v47 = vmul.f32 %v4944_v18, %v1062_v53  ;;  %v3597_v19 = vperm.slane %v2511_v56, 1  ;;  %1234 = vperm.xlu1 %2636, %v1231_v14  }
 0x1b7   : > { %v3566_v8 = vpop.permute.xlu2 %1144  ;;  %v3568_v11 = vpop.permute.xlu1 %1142  ;;  %4942 = vst [vmem:[#allocation18_spill] sm:$0xff] %v3592_v51  ;;  %v1081_v33 = vmul.f32 %v4944_v18, %v1063_v1  ;;  %v1116_v27 = vmul.f32 %v3575_v21, %v1103_v42  ;;  %v1117_v57 = vmul.f32 %v3577_v36, %v1106_v58  ;;  %v1157_v60 = vsel %vm1154_vm9, %v4947_v4, %v4946_v59 }
 0x1b8   : > { %4945 = vst [vmem:[#allocation13_spill] sm:$0xff] %v3597_v19  ;;  %v947_v52 = vmul.f32 %v4934_v28, %v929_v46  ;;  %v1006_v48 = vmul.f32 %v3413_v43, %v994_v3  ;;  %v952_v32 = vadd.f32 %v946_v49, %v898_v16  ;;  %v1160_v53 = vsel %vm1154_vm9, %v4946_v59, %v4947_v4  ;;  %v1149_v58 = vpop.permute.xlu0 %1148  ;;  %v4950_v46 = vld [vmem:[#allocation17_spill] sm:$0xff] }
 0x1b9   : > { %v1032_v56 = vadd.f32 %v1026_v35, %v978_v45  ;;  %v1033_v1 = vadd.f32 %v1027_v22, %v979_v55  ;;  %v1134_v23 = vmul.f32 %v4948_v63, %v1116_v27  ;;  %v1135_v42 = vmul.f32 %v4948_v63, %v1117_v57  ;;  %v4951_v27 = vld [vmem:[#allocation28_spill] sm:$0xff] }
 0x1ba   : > { %v1048_v28 = vsel %vm1046_vm6, %v4950_v46, %v3372_v15  ;;  %v1007_v49 = vmul.f32 %v3415_v29, %v997_v61  ;;  %v953_v3 = vadd.f32 %v947_v52, %v899_v50  ;;  %v1170_v16 = vmul.f32 %v3592_v51, %v1157_v60  ;;  %v4952_v50 = vld [vmem:[#allocation26_spill] sm:$0xff] }
 0x1bb   : > { %v1051_v6 = vsel %vm1046_vm6, %v3372_v15, %v4950_v46  ;;  %v1171_v35 = vmul.f32 %v3597_v19, %v1160_v53  ;;  %v1086_v22 = vadd.f32 %v1080_v47, %v1032_v56  ;;  %v1087_v18 = vadd.f32 %v1081_v33, %v1033_v1  ;;  %v4953_v15 = vld [vmem:[#allocation31_spill] sm:$0xff]  ;;  %v4955_v56 = vld [vmem:[#allocation32_spill] sm:$0xff] }
 0x1bc   : > { %v976_v57 = vadd.f32 %v4951_v27, %v952_v32  ;;  %v1024_v59 = vmul.f32 %v3461_v30, %v1006_v48  ;;  %v1025_v61 = vmul.f32 %v3461_v30, %v1007_v49  ;;  %v1022_v4 = vmul.f32 %v4952_v50, %v3519_v34  ;;  %v4954_v48 = vld [vmem:[#allocation29_spill] sm:$0xff] }
 0x1bd   : > { %v1023_v60 = vmul.f32 %v4952_v50, %v3528_v26  ;;  %v1140_v52 = vadd.f32 %v1134_v23, %v1086_v22  ;;  %v1141_v63 = vadd.f32 %v1135_v42, %v1087_v18  ;;  %v1102_v47 = vsel %vm1100_vm8, %v4953_v15, %v3429_v5  ;;  %v1280_v42 = vld [vmem:[%s4763_s9 + $0x8] sm:$0xff] }
 0x1be   : > { %v1060_v33 = vmul.f32 %v3383_v10, %v1048_v28  ;;  %v1061_v32 = vmul.f32 %v3385_v13, %v1051_v6  ;;  %v977_v53 = vadd.f32 %v4954_v48, %v953_v3  ;;  %v1188_v30 = vmul.f32 %v3544_v38, %v1170_v16  ;;  %1289 = vperm.xlu1 %2636, %v1280_v42  }
 0x1bf   : > { %v1120_v45 = vpop.permute.xlu2 %1119  ;;  %v1151_v55 = vpop.permute.xlu1 %1150  ;;  %v1189_v34 = vmul.f32 %v3544_v38, %v1171_v35  ;;  %v1105_v26 = vsel %vm1100_vm8, %v3429_v5, %v4953_v15  ;;  %v1101_v1 = vsel %vm1100_vm8, %v4955_v56, %v3431_v0  ;;  %v1104_v23 = vsel %vm1100_vm8, %v3431_v0, %v4955_v56 }
 0x1c0   : > { %v1030_v38 = vadd.f32 %v1024_v59, %v976_v57  ;;  %v1031_v14 = vadd.f32 %v1025_v61, %v977_v53  ;;  %v1028_v46 = vadd.f32 %v1022_v4, %v3500_v37  ;;  %v1114_v5 = vmul.f32 %v3575_v21, %v1102_v47  ;;  %v1124_v49 = vpop.permute.xlu0 %1123 }
 0x1c1   : > { %v1029_v28 = vadd.f32 %v1023_v60, %v3515_v12  ;;  %v1078_v3 = vmul.f32 %v3502_v44, %v1060_v33  ;;  %v1194_v16 = vadd.f32 %v1188_v30, %v1140_v52  ;;  %v1195_v6 = vadd.f32 %v1189_v34, %v1141_v63  ;;  %v3680_v52 = vld [vmem:[%s4764_s10 + $0x8] sm:$0xff] }
 0x1c2   : > { %v1112_v35 = vmul.f32 %v3575_v21, %v1101_v1  ;;  %v1113_v0 = vmul.f32 %v3577_v36, %v1104_v23  ;;  %v1115_v22 = vmul.f32 %v3577_v36, %v1105_v26  ;;  %v1155_v18 = vsel %vm1154_vm9, %v3568_v11, %v1149_v58  ;;  %1484 = vperm.xlu2 %2641, %v3680_v52  }
 0x1c3   : > { %v1079_v27 = vmul.f32 %v3502_v44, %v1061_v32  ;;  %v1158_v12 = vsel %vm1154_vm9, %v1149_v58, %v3568_v11  ;;  %v1132_v50 = vmul.f32 %v1124_v49, %v1114_v5  ;;  %v1076_v4 = vmul.f32 %v3504_v31, %v3437_v24 }
 0x1c4   : > { %v1077_v60 = vmul.f32 %v3504_v31, %v3440_v39  ;;  %v1084_v44 = vadd.f32 %v1078_v3, %v1030_v38  ;;  %v1166_v63 = vmul.f32 %v3592_v51, %v1155_v18  ;;  %v1167_v15 = vmul.f32 %v3597_v19, %v1158_v12 }
 0x1c5   : > { %v1130_v47 = vmul.f32 %v1120_v45, %v1112_v35  ;;  %v1131_v24 = vmul.f32 %v1120_v45, %v1113_v0  ;;  %v1156_v39 = vsel %vm1154_vm9, %v3566_v8, %v1151_v55  ;;  %v1085_v31 = vadd.f32 %v1079_v27, %v1031_v14 }
 0x1c6   : > { %v1159_v33 = vsel %vm1154_vm9, %v1151_v55, %v3566_v8  ;;  %v1082_v53 = vadd.f32 %v1076_v4, %v1028_v46  ;;  %v1083_v30 = vadd.f32 %v1077_v60, %v1029_v28  ;;  %v1133_v56 = vmul.f32 %v1124_v49, %v1115_v22  ;;  %1393 = vperm.xlu1 %2636, %v3680_v52  }
 0x1c7   : > { %v1212_v37 = vpop.permute.xlu1 %1211  ;;  %v1168_v1 = vmul.f32 %v3592_v51, %v1156_v39  ;;  %v1169_v14 = vmul.f32 %v3597_v19, %v1159_v33  ;;  %v1138_v55 = vadd.f32 %v1132_v50, %v1084_v44  ;;  %v4956_v35 = vmov 3  }
 0x1c8   : > { %v1174_v57 = vpop.permute.xlu2 %1173  ;;  %v1218_v59 = vadd.f32 %v1212_v37, %v1194_v16  ;;  %v1219_v61 = vadd.f32 %v1212_v37, %v1195_v6  ;;  %v1136_v42 = vadd.f32 %v1130_v47, %v1082_v53  ;;  %v1137_v38 = vadd.f32 %v1131_v24, %v1083_v30  ;;  %v1207_v6 = vpop.permute.xlu0 %1206 }
 0x1c9   : > { %v1184_v34 = vmul.f32 %v1174_v57, %v1166_v63  ;;  %v1185_v26 = vmul.f32 %v1174_v57, %v1167_v15  ;;  %v1139_v5 = vadd.f32 %v1133_v56, %v1085_v31  ;;  %v4957_v4 = vmov 1   ;;  %v1226_v63 = vld [vmem:[%s4958_s6] sm:$0x3]  ;;  %v4960_v15 = vld [vmem:[#allocation22_spill] sm:$0xff] }
 0x1ca   : > { %v1224_v11 = vmax.f32 %v1218_v59, 0.0  ;;  %v1225_v58 = vmax.f32 %v1219_v61, 0.0  ;;  %2645 = vset.pattern.permute.xlu2 %v4956_v35  ;;  %v4961_v47 = vmov 6   ;;  %v4962_v24 = vmov 4  }
 0x1cb   : > { %v1190_v3 = vadd.f32 %v1184_v34, %v1136_v42  ;;  %v1191_v16 = vadd.f32 %v1185_v26, %v1137_v38  ;;  %v4963_v39 = vmov 8   ;;  %v4964_v31 = vmov 7  }
 0x1cc   : > { %v1229_v32 = vpack.c.bf16 %v1224_v11, %v1224_v11  ;;  %v1230_v48 = vpack.c.bf16 %v1225_v58, %v1225_v58  ;;  %v3708_v11 = vld [vmem:[%s4764_s10] sm:$0xff]  ;;  %v4959_v58 = vmov 5   ;;  %v4965_v33 = vmov 0  }
 0x1cd   : > { %1432 = vperm.xlu0 %2637, %v3708_v11   ;;  %1528 = vperm.xlu2 %2645, %v3708_v11  }
 0x1ce   : > { %v1243_v45 = vsel %vm1241_vm10, %v1229_v32, 0  ;;  %v1246_v23 = vsel %vm1241_vm10, %v1230_v48, 0  ;;  %2638 = vset.pattern.permute.xlu1 %v4957_v4 }
 0x1cf   : > { %1254 = vmatpush.bf16.msra.mxu2 %v1243_v45  ;;  %1267 = vmatpush.bf16.msra.mxu3 %v1246_v23  ;;  %v2549_v23 = vld [vmem:[%s4968_s8] sm:$0xff] }
 0x1d0   : > { %v1178_v8 = vpop.permute.xlu1 %1177  ;;  %1436 = vperm.xlu1 %2638, %v3680_v52  }
 0x1d1   : > { %v1186_v46 = vmul.f32 %v1178_v8, %v1168_v1  ;;  %v1187_v28 = vmul.f32 %v1178_v8, %v1169_v14  ;;  %v1202_v49 = vpop.permute.xlu2 %1201  ;;  %v1276_v14 = vld [vmem:[%s4968_s8 + $0x8] sm:$0xf] }
 0x1d2   : > { %v1214_v0 = vadd.f32 %v1202_v49, %v1190_v3  ;;  %v1215_v22 = vadd.f32 %v1202_v49, %v1191_v16  ;;  %v1302_v8 = vunpack.c.l.b16 %v1276_v14 }
 0x1d3   : > { %v1192_v18 = vadd.f32 %v1186_v46, %v1138_v55  ;;  %v1193_v37 = vadd.f32 %v1187_v28, %v1139_v5 }
 0x1d4   : > { %v1220_v61 = vmax.f32 %v1214_v0, 0.0  ;;  %v1221_v50 = vmax.f32 %v1215_v22, 0.0  ;;  %v1304_v55 = vpack.c.b16 %v1302_v8, %v1302_v8 }
 0x1d5   : > { %v1216_v27 = vadd.f32 %v1207_v6, %v1192_v18  ;;  %v1217_v12 = vadd.f32 %v1207_v6, %v1193_v37  ;;  %2642 = vset.pattern.permute.xlu0 %v4929_v20  ;;  %2647 = vset.pattern.permute.xlu2 %v4961_v47 }
 0x1d6   : > { %1488 = vperm.xlu0 %2642, %v4960_v15   ;;  %1656 = vperm.xlu2 %2647, %v4960_v15  }
 0x1d7   : > { %v1222_v57 = vmax.f32 %v1216_v27, 0.0  ;;  %v1223_v59 = vmax.f32 %v1217_v12, 0.0 }
 0x1d8   : > { %2640 = vset.pattern.permute.xlu1 %v4929_v20 }
 0x1d9   : > { %v1227_v60 = vpack.c.bf16 %v1222_v57, %v1220_v61  ;;  %v1228_v44 = vpack.c.bf16 %v1223_v59, %v1221_v50  ;;  %1480 = vperm.xlu1 %2640, %v3708_v11   ;;  %v1285_v5 = vpop.permute.xlu2 %1284 }
 0x1db   : > { %1255 = vmatpush.bf16.msra.mxu2 %v1227_v60  ;;  %1268 = vmatpush.bf16.msra.mxu3 %v1228_v44 }
 0x1de   : > { %2520 = vmatmul.msk.bf16.vlgmr.msra.gmra.mxu2 %vm1237_vm11, %v1226_v63  ;;  %2521 = vmatmul.msk.bf16.vlgmr.msra.gmra.mxu3 %vm1237_vm11, %v1226_v63 }
 0x1df   : > { %2643 = vset.pattern.permute.xlu0 %v4956_v35  ;;  %2651 = vset.pattern.permute.xlu2 %v4959_v58 }
 0x1e0   : > { %1536 = vperm.xlu0 %2643, %v4960_v15   ;;  %1604 = vperm.xlu2 %2651, %v3680_v52  }
 0x1e1   : > { %2644 = vset.pattern.permute.xlu1 %v4959_v58  ;;  %v1295_v61 = vpop.permute.xlu2 %1294 }
 0x1e2   : > { %1608 = vperm.xlu1 %2644, %v4960_v15  }
 0x1e8   : > { %1532 = vperm.xlu0 %2643, %v3680_v52   ;;  %2652 = vset.pattern.permute.xlu2 %v4963_v39 }
 0x1e9   : > { %1752 = vperm.xlu2 %2652, %v4960_v15   ;;  %v3786_v63 = vpop.permute.xlu2 %1398 }
 0x1ea   : > { %2648 = vset.pattern.permute.xlu1 %v4962_v24  ;;  %4971 = vst [vmem:[#allocation21_spill] sm:$0xff] %v3786_v63 }
 0x1eb   : > { %1556 = vperm.xlu1 %2648, %v3680_v52  }
 0x1f0   : > { %2646 = vset.pattern.permute.xlu0 %v4962_v24 }
 0x1f1   : > { %1560 = vperm.xlu0 %2646, %v4960_v15   ;;  %2657 = vset.pattern.permute.xlu2 %v4964_v31 }
 0x1f3   : > { %2650 = vset.pattern.permute.xlu1 %v4959_v58 }
 0x1f4   : > { %1600 = vperm.xlu1 %2650, %v3708_v11  }
 0x1f9   : > { %1552 = vperm.xlu0 %2646, %v3708_v11  }
 0x1fc   : > { %2655 = vset.pattern.permute.xlu1 %v4961_v47 }
 0x201   : > { %2649 = vset.pattern.permute.xlu0 %v4964_v31 }
 0x202   : > { %1704 = vperm.xlu0 %2649, %v4960_v15   ;;  %v3794_v15 = vpop.permute.xlu2 %1440 }
 0x203   : > { %4972 = vst [vmem:[#allocation20_spill] sm:$0xff] %v3794_v15 }
 0x20a   : > { %2653 = vset.pattern.permute.xlu0 %v4961_v47 }
 0x20b   : > { %1648 = vperm.xlu0 %2653, %v3708_v11  }
 0x213   : > { %2654 = vset.pattern.permute.xlu0 %v4965_v33 }
 0x228   : > { %v1235_v32 = vpop.permute.xlu1 %1234 }
 0x230   : > { %v1290_v16 = vpop.permute.xlu1 %1289 }
 0x261   : > { %v1270_v48 = vpop.f32.mrf.mxu3  ;;  %v1257_v53 = vpop.f32.mrf.mxu2 }
 0x262   : > { %v3740_v30 = vadd.f32 %v1270_v48, %v1235_v32  ;;  %v3742_v34 = vadd.f32 %v1257_v53, %v1235_v32  ;;  %v3802_v32 = vpop.permute.xlu0 %1432  ;;  %v3808_v48 = vpop.permute.xlu2 %1484 }
 0x264   : > { %4966 = vst [vmem:[#allocation15_spill] sm:$0xff] %v3740_v30  ;;  %v1277_v26 = vpack.c.bf16 %v3742_v34, %v3742_v34  ;;  %v1278_v56 = vpack.c.bf16 %v3740_v30, %v3740_v30  ;;  %v1802_v30 = vld [vmem:[%s4767_s13] sm:$0xf] }
 0x265   : > { %4967 = vst [vmem:[#allocation16_spill] sm:$0xff] %v3742_v34 }
 0x266   : > { %v1312_v1 = vsel %vm689_vm0, %v1277_v26, 0  ;;  %v1315_v45 = vsel %vm689_vm0, %v1278_v56, 0 }
 0x267   : > { %1324 = vmatpush.bf16.msrb.mxu2 %v1312_v1  ;;  %1342 = vmatpush.bf16.msrb.mxu3 %v1315_v45 }
 0x269   : > { %v1259_v42 = vpop.f32.mrf.mxu2  ;;  %v1272_v38 = vpop.f32.mrf.mxu3 }
 0x26a   : > { %2526 = vmatmul.msk.bf16.vlgmr.msrb.gmra.mxu2 %vm682_vm1, %v2549_v23  ;;  %2528 = vmatmul.msk.bf16.vlgmr.msrb.gmra.mxu3 %vm682_vm1, %v2549_v23  ;;  %v3812_v53 = vpop.permute.xlu0 %1488  ;;  %v3820_v26 = vpop.permute.xlu2 %1528 }
 0x26b   : > { %4975 = vst [vmem:[#allocation30_spill] sm:$0xff] %v3812_v53  ;;  %v3832_v23 = vpop.permute.xlu1 %1393 }
 0x272   : > { %v3828_v45 = vpop.permute.xlu0 %1536  ;;  %v3834_v38 = vpop.permute.xlu2 %1656 }
 0x273   : > { %4977 = vst [vmem:[#allocation14_spill] sm:$0xff] %v3828_v45  ;;  %v3844_v8 = vpop.permute.xlu1 %1436 }
 0x274   : > { %4978 = vst [vmem:[#allocation23_spill] sm:$0xff] %v3834_v38 }
 0x27a   : > { %2527 = vmatmul.msk.bf16.gmra.mxu2 %vm682_vm1, %v1304_v55  ;;  %2529 = vmatmul.msk.bf16.gmra.mxu3 %vm682_vm1, %v1304_v55  ;;  %v3846_v55 = vpop.permute.xlu0 %1532 }
 0x2ed   : > { %v1326_v46 = vpop.f32.mrf.mxu2  ;;  %v1344_v28 = vpop.f32.mrf.mxu3 }
 0x2ee   : > { %v1327_v49 = vadd.f32 %v1326_v46, %v1285_v5  ;;  %v1345_v6 = vadd.f32 %v1344_v28, %v1285_v5  ;;  %v3848_v5 = vpop.permute.xlu2 %1604  ;;  %v3855_v46 = vpop.permute.xlu1 %1480 }
 0x2ef   : > { %v3857_v28 = vpop.permute.xlu0 %1560 }
 0x2f0   : > { %v3760_v3 = vmax.f32 %v1327_v49, 0.0  ;;  %v3768_v37 = vmax.f32 %v1345_v6, 0.0  ;;  %4980 = vst [vmem:[#allocation27_spill] sm:$0xff] %v3857_v28 }
 0x2f2   : > { %1623 = vrot.lane.b32.xlu2 %v3760_v3, %s4838_s24  ;;  %1455 = vrot.lane.b32.xlu1 %v3760_v3, %s4836_s23 }
 0x2f3   : > { %1359 = vrot.lane.b32.xlu0 %v3760_v3, %s4834_s25 }
 0x2f5   : > { %v1328_v0 = vpop.f32.mrf.mxu2  ;;  %v1346_v22 = vpop.f32.mrf.mxu3 }
 0x2f6   : > { %v1329_v18 = vadd.f32 %v1328_v0, %v1290_v16  ;;  %v1347_v12 = vadd.f32 %v1346_v22, %v1290_v16  ;;  %v3863_v49 = vpop.permute.xlu2 %1752  ;;  %v3867_v16 = vpop.permute.xlu1 %1608 }
 0x2f7   : > { %4981 = vst [vmem:[#allocation17_spill] sm:$0xff] %v3863_v49  ;;  %v3869_v6 = vpop.permute.xlu0 %1552 }
 0x2f8   : > { %v3770_v27 = vmax.f32 %v1329_v18, 0.0  ;;  %v3778_v50 = vmax.f32 %v1347_v12, 0.0  ;;  %4983 = vst [vmem:[#allocation28_spill] sm:$0xff] %v3867_v16 }
 0x2fa   : > { %1457 = vrot.lane.b32.xlu2 %v3770_v27, %s4836_s23  ;;  %1461 = vrot.lane.b32.xlu1 %v3768_v37, %s4836_s23 }
 0x2fb   : > { %1365 = vrot.lane.b32.xlu0 %v3768_v37, %s4834_s25 }
 0x2fd   : > { %v1331_v57 = vpop.f32.mrf.mxu2  ;;  %v1349_v59 = vpop.f32.mrf.mxu3 }
 0x2fe   : > { %v1332_v56 = vadd.f32 %v1331_v57, %v1295_v61  ;;  %v1350_v42 = vadd.f32 %v1349_v59, %v1295_v61  ;;  %v3877_v18 = vpop.permute.xlu1 %1556 }
 0x2ff   : > { %v3875_v22 = vpop.permute.xlu0 %1704 }
 0x300   : > { %v3822_v1 = vmax.f32 %v1332_v56, 0.0  ;;  %v3836_v14 = vmax.f32 %v1350_v42, 0.0  ;;  %4984 = vst [vmem:[#allocation26_spill] sm:$0xff] %v3875_v22 }
 0x302   : > { %1463 = vrot.lane.b32.xlu2 %v3778_v50, %s4836_s23  ;;  %1503 = vrot.lane.b32.xlu1 %v3760_v3, %s4969_s4  ;;  %4976 = vst [vmem:[#allocation12_spill] sm:$0xff] %v3822_v1 }
 0x303   : > { %1407 = vrot.lane.b32.xlu0 %v3760_v3, %s4970_s29  ;;  %4979 = vst [vmem:[#allocation24_spill] sm:$0xff] %v3836_v14 }
 0x305   : > { %v1333_v60 = vpop.f32.mrf.mxu2  ;;  %v1351_v44 = vpop.f32.mrf.mxu3 }
 0x306   : > { %v3888_v57 = vpop.permute.xlu1 %1600  ;;  %v1769_v60 = vld [vmem:[%s4765_s11 + $0x10] sm:$0xff] }
 0x307   : > { %v1649_v59 = vpop.permute.xlu0 %1648 }
 0x30a   : > { %1505 = vrot.lane.b32.xlu2 %v3770_v27, %s4969_s4  ;;  %1509 = vrot.lane.b32.xlu1 %v3768_v37, %s4969_s4 }
 0x30b   : > { %1413 = vrot.lane.b32.xlu0 %v3768_v37, %s4970_s29 }
 0x312   : > { %1511 = vrot.lane.b32.xlu2 %v3778_v50, %s4969_s4  ;;  %1575 = vrot.lane.b32.xlu1 %v3760_v3, %s4973_s27 }
 0x313   : > { %1581 = vrot.lane.b32.xlu0 %v3768_v37, %s4973_s27 }
 0x31a   : > { %1577 = vrot.lane.b32.xlu2 %v3770_v27, %s4973_s27  ;;  %1629 = vrot.lane.b32.xlu1 %v3768_v37, %s4838_s24 }
 0x31b   : > { %1677 = vrot.lane.b32.xlu0 %v3768_v37, %s4974_s30 }
 0x322   : > { %1631 = vrot.lane.b32.xlu2 %v3778_v50, %s4838_s24  ;;  %1671 = vrot.lane.b32.xlu1 %v3760_v3, %s4974_s30 }
 0x323   : > { %1625 = vrot.lane.b32.xlu0 %v3770_v27, %s4838_s24  ;;  %s5028_s24 = smov 15  }
 0x32a   : > { %1673 = vrot.lane.b32.xlu2 %v3770_v27, %s4974_s30  ;;  %1361 = vrot.lane.b32.xlu1 %v3770_v27, %s4834_s25 }
 0x32b   : > { %1459 = vrot.lane.b32.xlu0 %v3822_v1, %s4836_s23 }
 0x332   : > { %1363 = vrot.lane.b32.xlu2 %v3822_v1, %s4834_s25  ;;  %1367 = vrot.lane.b32.xlu1 %v3778_v50, %s4834_s25 }
 0x333   : > { %1465 = vrot.lane.b32.xlu0 %v3836_v14, %s4836_s23 }
 0x33a   : > { %1369 = vrot.lane.b32.xlu2 %v3836_v14, %s4834_s25  ;;  %1409 = vrot.lane.b32.xlu1 %v3770_v27, %s4970_s29  ;;  %s4985_s25 = smov 113  }
 0x33b   : > { %1388 = vperm.xlu0 %2654, %v3708_v11  }
 0x342   : > { %1411 = vrot.lane.b32.xlu2 %v3822_v1, %s4970_s29  ;;  %1415 = vrot.lane.b32.xlu1 %v3778_v50, %s4970_s29 }
 0x343   : > { %1727 = vrot.lane.b32.xlu0 %v3778_v50, %s4982_s0 }
 0x34a   : > { %1417 = vrot.lane.b32.xlu2 %v3836_v14, %s4970_s29  ;;  %1583 = vrot.lane.b32.xlu1 %v3778_v50, %s4973_s27 }
 0x34b   : > { %1782 = vperm.xlu0 %2654, %v1769_v60  }
 0x34c   : > { %v1624_v0 = vpop.permute.xlu2 %1623 }
 0x352   : > { %1719 = vrot.lane.b32.xlu2 %v3760_v3, %s4982_s0  ;;  %1679 = vrot.lane.b32.xlu1 %v3778_v50, %s4974_s30 }
 0x353   : > { %1805 = vperm.xlu0 %2654, %v1802_v30  }
 0x354   : > { %v3883_v12 = vpop.permute.xlu2 %1457 }
 0x35a   : > { %1725 = vrot.lane.b32.xlu2 %v3768_v37, %s4982_s0  ;;  %1652 = vperm.xlu1 %2655, %v3680_v52  }
 0x35b   : > { %2664 = vset.pattern.permute.xlu0 %v4957_v4 }
 0x35c   : > { %v3890_v61 = vpop.permute.xlu2 %1463 }
 0x362   : > { %1700 = vperm.xlu2 %2657, %v3680_v52   ;;  %1721 = vrot.lane.b32.xlu1 %v3770_v27, %s4982_s0 }
 0x363   : > { %2656 = vset.pattern.permute.xlu1 %v4964_v31 }
 0x364   : > { %v1506_v44 = vpop.permute.xlu2 %1505  ;;  %v3899_v56 = vpop.permute.xlu1 %1455 }
 0x365   : > { %v1360_v42 = vpop.permute.xlu0 %1359 }
 0x36a   : > { %1513 = vrot.lane.b32.xlu2 %v3836_v14, %s4969_s4  ;;  %1696 = vperm.xlu1 %2656, %v3708_v11  }
 0x36b   : > { %2659 = vset.pattern.permute.xlu2 %v4963_v39 }
 0x36c   : > { %v1512_v34 = vpop.permute.xlu2 %1511  ;;  %v1462_v47 = vpop.permute.xlu1 %1461 }
 0x36d   : > { %v3910_v60 = vsel %vm914_vm5, %v1506_v44, %v1512_v34  ;;  %v3914_v31 = vsel %vm914_vm5, %v1512_v34, %v1506_v44  ;;  %v1366_v24 = vpop.permute.xlu0 %1365 }
 0x36e   : > { %v3918_v58 = vsel %vm752_vm3, %v1360_v42, %v1366_v24  ;;  %v3922_v30 = vsel %vm752_vm3, %v1366_v24, %v1360_v42 }
 0x372   : > { %1585 = vrot.lane.b32.xlu2 %v3836_v14, %s4973_s27  ;;  %1507 = vrot.lane.b32.xlu1 %v3822_v1, %s4969_s4 }
 0x373   : > { %2658 = vset.pattern.permute.xlu1 %v4963_v39 }
 0x374   : > { %v3930_v34 = vpop.permute.xlu2 %1577  ;;  %v1504_v44 = vpop.permute.xlu1 %1503 }
 0x375   : > { %v1408_v49 = vpop.permute.xlu0 %1407 }
 0x37a   : > { %1633 = vrot.lane.b32.xlu2 %v3836_v14, %s4985_s25  ;;  %1579 = vrot.lane.b32.xlu1 %v3822_v1, %s4973_s27 }
 0x37c   : > { %v3936_v24 = vpop.permute.xlu2 %1631  ;;  %v1510_v42 = vpop.permute.xlu1 %1509 }
 0x37d   : > { %4986 = vst [vmem:[#allocation31_spill] sm:$0xff] %v3936_v24  ;;  %v1414_v19 = vpop.permute.xlu0 %1413 }
 0x382   : > { %1681 = vrot.lane.b32.xlu2 %v3836_v14, %s4974_s30  ;;  %1627 = vrot.lane.b32.xlu1 %v3822_v1, %s4985_s25 }
 0x384   : > { %v3942_v39 = vpop.permute.xlu2 %1673  ;;  %v3944_v51 = vpop.permute.xlu1 %1575 }
 0x385   : > { %v3946_v22 = vpop.permute.xlu0 %1581 }
 0x38a   : > { %1723 = vrot.lane.b32.xlu2 %v3822_v1, %s4982_s0  ;;  %1675 = vrot.lane.b32.xlu1 %v3822_v1, %s4974_s30 }
 0x38c   : > { %v1364_v38 = vpop.permute.xlu2 %1363  ;;  %v1630_v16 = vpop.permute.xlu1 %1629 }
 0x38d   : > { %v1635_v28 = vsel %vm1046_vm6, %v1624_v0, %v1630_v16  ;;  %v1638_v45 = vsel %vm1046_vm6, %v1630_v16, %v1624_v0  ;;  %v3956_v53 = vpop.permute.xlu0 %1677  ;;  %v1767_v0 = vld [vmem:[%s4765_s11] sm:$0xff] }
 0x38e   : > { %4987 = vst [vmem:[#allocation29_spill] sm:$0xff] %v3956_v53  ;;  %v1641_v63 = vmul.f32 %v1635_v28, %v3383_v10  ;;  %v1642_v15 = vmul.f32 %v1638_v45, %v3385_v13 }
 0x390   : > { %v3960_v36 = vmul.f32 %v1649_v59, %v1641_v63  ;;  %v3962_v21 = vmul.f32 %v1649_v59, %v1642_v15 }
 0x392   : > { %1748 = vperm.xlu2 %2659, %v3680_v52   ;;  %1729 = vrot.lane.b32.xlu1 %v3836_v14, %s4982_s0  ;;  %v1768_v52 = vld [vmem:[%s4765_s11 + $0x8] sm:$0xff] }
 0x394   : > { %v1370_v1 = vpop.permute.xlu2 %1369  ;;  %v3967_v24 = vpop.permute.xlu1 %1671 }
 0x395   : > { %4988 = vst [vmem:[#allocation32_spill] sm:$0xff] %v3967_v24  ;;  %v3971_v16 = vsel %vm752_vm3, %v1364_v38, %v1370_v1  ;;  %v3975_v28 = vsel %vm752_vm3, %v1370_v1, %v1364_v38  ;;  %v3977_v63 = vpop.permute.xlu0 %1625  ;;  %v1851_v1 = vld [vmem:[%s4769_s15 + $0x8] sm:$0xff] }
 0x396   : > { %4989 = vst [vmem:[#allocation22_spill] sm:$0xff] %v3971_v16  ;;  %v1422_v16 = vsel %vm806_vm2, %v1414_v19, %v1408_v49 }
 0x397   : > { %4990 = vst [vmem:[#allocation34_spill] sm:$0xff] %v3975_v28  ;;  %v1377_v28 = vmul.f32 %v3922_v30, %v3277_v40 }
 0x39a   : > { %2661 = vset.pattern.permute.xlu2 %v4965_v33  ;;  %1744 = vperm.xlu1 %2658, %v3708_v11  }
 0x39b   : > { %1777 = vperm.xlu2 %2661, %v1768_v52  }
 0x39c   : > { %v1362_v15 = vpop.permute.xlu1 %1361  ;;  %v3993_v38 = vpop.permute.xlu2 %1411 }
 0x39d   : > { %v3984_v45 = vpop.permute.xlu0 %1459  ;;  %4992 = vst [vmem:[#allocation36_spill] sm:$0xff] %v3993_v38  ;;  %v1378_v38 = vmul.f32 %v3918_v58, %v3279_v25  ;;  %v1587_v58 = vsel %vm992_vm7, %v3944_v51, %v3946_v22 }
 0x39e   : > { %4991 = vst [vmem:[#allocation35_spill] sm:$0xff] %v3984_v45  ;;  %v1419_v45 = vsel %vm806_vm2, %v1408_v49, %v1414_v19  ;;  %v1515_v19 = vsel %vm914_vm5, %v1504_v44, %v1510_v42  ;;  %v1518_v49 = vsel %vm914_vm5, %v1510_v42, %v1504_v44 }
 0x39f   : > { %v1521_v44 = vmul.f32 %v1518_v49, %v3318_v62  ;;  %v1522_v42 = vmul.f32 %v1515_v19, %v3320_v54  ;;  %v1590_v19 = vsel %vm992_vm7, %v3946_v22, %v3944_v51  ;;  %v1471_v51 = vsel %vm860_vm4, %v3890_v61, %v3883_v12 }
 0x3a1   : > { %v1540_v22 = vmul.f32 %v3820_v26, %v1522_v42 }
 0x3a2   : > { %2660 = vset.pattern.permute.xlu1 %v4965_v33  ;;  %v1425_v33 = vmul.f32 %v1422_v16, %v3268_v2 }
 0x3a3   : > { %1772 = vperm.xlu1 %2660, %v1767_v0   ;;  %1860 = vperm.xlu2 %2661, %v1851_v1   ;;  %v1467_v0 = vsel %vm860_vm4, %v3899_v56, %v1462_v47  ;;  %v1470_v1 = vsel %vm860_vm4, %v1462_v47, %v3899_v56 }
 0x3a4   : > { %v1368_v59 = vpop.permute.xlu1 %1367  ;;  %v1473_v47 = vmul.f32 %v1470_v1, %v3314_v9  ;;  %v1474_v56 = vmul.f32 %v1467_v0, %v3316_v7  ;;  %v4034_v16 = vpop.permute.xlu2 %1417  ;;  %v1443_v1 = vmul.f32 %v3802_v32, %v1425_v33 }
 0x3a5   : > { %v1372_v11 = vsel %vm752_vm3, %v1362_v15, %v1368_v59  ;;  %v1375_v52 = vsel %vm752_vm3, %v1368_v59, %v1362_v15  ;;  %v3999_v14 = vpop.permute.xlu0 %1465  ;;  %v1850_v15 = vld [vmem:[%s4769_s15] sm:$0xff]  ;;  %v4017_v59 = vld [vmem:[%s4770_s16 + $0x8] sm:$0xff] }
 0x3a6   : > { %4993 = vst [vmem:[#allocation37_spill] sm:$0xff] %v3999_v14  ;;  %v1426_v14 = vmul.f32 %v1419_v45, %v3270_v17  ;;  %v1491_v13 = vmul.f32 %v3855_v46, %v1473_v47  ;;  %v1492_v30 = vmul.f32 %v3855_v46, %v1474_v56  ;;  %v1468_v46 = vsel %vm860_vm4, %v3883_v12, %v3890_v61 }
 0x3a7   : > { %v1564_v47 = vmul.f32 %v3869_v6, %v3768_v37  ;;  %v1594_v56 = vmul.f32 %v1590_v19, %v3415_v29  ;;  %v1380_v12 = vmul.f32 %v1372_v11, %v3279_v25  ;;  %v1476_v37 = vmul.f32 %v1468_v46, %v3316_v7 }
 0x3a8   : > { %v1444_v0 = vmul.f32 %v3802_v32, %v1426_v14  ;;  %v4051_v32 = vld [vmem:[%s4770_s16] sm:$0xff]  ;;  %v1563_v14 = vmul.f32 %v3869_v6, %v3760_v3  ;;  %v1593_v3 = vmul.f32 %v1587_v58, %v3413_v43  ;;  %v1524_v11 = vmul.f32 %v3910_v60, %v3320_v54 }
 0x3ab   : > { %1855 = vperm.xlu1 %2660, %v1850_v15   ;;  %1964 = vperm.xlu2 %2661, %v4017_v59  }
 0x3ac   : > { %v1410_v24 = vpop.permute.xlu1 %1409  ;;  %v4088_v58 = vpop.permute.xlu2 %1719 }
 0x3ad   : > { %v1389_v45 = vpop.permute.xlu0 %1388 }
 0x3ae   : > { %v1401_v15 = vmul.f32 %v1389_v45, %v1377_v28  ;;  %v1402_v53 = vmul.f32 %v1389_v45, %v1378_v38  ;;  %v1379_v45 = vmul.f32 %v1375_v52, %v3277_v40  ;;  %v1523_v52 = vmul.f32 %v3914_v31, %v3318_v62 }
 0x3b0   : > { %v1449_v49 = vadd.f32 %v1443_v1, %v1401_v15  ;;  %v1450_v33 = vadd.f32 %v1444_v0, %v1402_v53  ;;  %v1539_v53 = vmul.f32 %v3820_v26, %v1521_v44  ;;  %v1611_v15 = vmul.f32 %v3888_v57, %v1593_v3 }
 0x3b2   : > { %v1497_v28 = vadd.f32 %v1491_v13, %v1449_v49  ;;  %v1498_v38 = vadd.f32 %v1492_v30, %v1450_v33  ;;  %v1475_v13 = vmul.f32 %v1471_v51, %v3314_v9  ;;  %v1612_v30 = vmul.f32 %v3888_v57, %v1594_v56 }
 0x3b3   : > { %1959 = vperm.xlu1 %2660, %v4051_v32   ;;  %2663 = vset.pattern.permute.xlu2 %v4957_v4  ;;  %v1404_v33 = vmul.f32 %v3832_v23, %v1380_v12 }
 0x3b4   : > { %v1545_v61 = vadd.f32 %v1539_v53, %v1497_v28  ;;  %v1546_v44 = vadd.f32 %v1540_v22, %v1498_v38  ;;  %v1416_v26 = vpop.permute.xlu1 %1415  ;;  %2007 = vperm.xlu2 %2663, %v4017_v59   ;;  %v1493_v53 = vmul.f32 %v3808_v48, %v1475_v13  ;;  %v1494_v22 = vmul.f32 %v3808_v48, %v1476_v37 }
 0x3b5   : > { %v1420_v6 = vsel %vm806_vm2, %v1410_v24, %v1416_v26  ;;  %v1423_v42 = vsel %vm806_vm2, %v1416_v26, %v1410_v24  ;;  %v1403_v24 = vmul.f32 %v3832_v23, %v1379_v45  ;;  %v1541_v38 = vmul.f32 %v3846_v55, %v1523_v52  ;;  %v4122_v26 = vpop.permute.xlu2 %1725 }
 0x3b6   : > { %v1427_v1 = vmul.f32 %v1423_v42, %v3268_v2  ;;  %v1428_v0 = vmul.f32 %v1420_v6, %v3270_v17  ;;  %v1569_v19 = vadd.f32 %v1563_v14, %v1545_v61  ;;  %v1570_v49 = vadd.f32 %v1564_v47, %v1546_v44 }
 0x3b7   : > { %v1542_v23 = vmul.f32 %v3846_v55, %v1524_v11  ;;  %v1565_v48 = vmul.f32 %v3877_v18, %v3770_v27 }
 0x3b8   : > { %v1445_v31 = vmul.f32 %v3844_v8, %v1427_v1  ;;  %v1446_v60 = vmul.f32 %v3844_v8, %v1428_v0  ;;  %v1617_v46 = vadd.f32 %v1611_v15, %v1569_v19  ;;  %v1618_v51 = vadd.f32 %v1612_v30, %v1570_v49  ;;  %v4995_v0 = vld [vmem:[#allocation33_spill] sm:$0xff] }
 0x3b9   : > { %v4996_v19 = vld [vmem:[#allocation25_spill] sm:$0xff] }
 0x3ba   : > { %v1451_v28 = vadd.f32 %v1445_v31, %v1403_v24  ;;  %v1452_v57 = vadd.f32 %v1446_v60, %v1404_v33  ;;  %v4098_v14 = vadd.f32 %v3960_v36, %v1617_v46  ;;  %v4101_v47 = vadd.f32 %v3962_v21, %v1618_v51 }
 0x3bb   : > { %2662 = vset.pattern.permute.xlu1 %v4957_v4  ;;  %v1566_v36 = vmul.f32 %v3877_v18, %v3778_v50 }
 0x3bc   : > { %v1499_v8 = vadd.f32 %v1493_v53, %v1451_v28  ;;  %v1500_v3 = vadd.f32 %v1494_v22, %v1452_v57  ;;  %v1584_v56 = vpop.permute.xlu1 %1583  ;;  %2003 = vperm.xlu1 %2662, %v4051_v32   ;;  %2665 = vset.pattern.permute.xlu2 %v4929_v20 }
 0x3bd   : > { %v1588_v21 = vsel %vm992_vm7, %v3930_v34, %v1584_v56  ;;  %v1591_v4 = vsel %vm992_vm7, %v1584_v56, %v3930_v34  ;;  %2051 = vperm.xlu2 %2665, %v4051_v32   ;;  %v1701_v30 = vpop.permute.xlu2 %1700 }
 0x3be   : > { %v1595_v55 = vmul.f32 %v1588_v21, %v3413_v43  ;;  %v1596_v45 = vmul.f32 %v1591_v4, %v3415_v29  ;;  %v1547_v12 = vadd.f32 %v1541_v38, %v1499_v8  ;;  %v1548_v61 = vadd.f32 %v1542_v23, %v1500_v3  ;;  %v4998_v23 = vld [vmem:[#allocation29_spill] sm:$0xff]  ;;  %v4999_v8 = vld [vmem:[#allocation32_spill] sm:$0xff] }
 0x3bf   : > { %v1683_v3 = vsel %vm1100_vm8, %v4999_v8, %v4998_v23  ;;  %v1686_v56 = vsel %vm1100_vm8, %v4998_v23, %v4999_v8 }
 0x3c0   : > { %v1613_v27 = vmul.f32 %v3848_v5, %v1595_v55  ;;  %v1614_v50 = vmul.f32 %v3848_v5, %v1596_v45  ;;  %v1571_v18 = vadd.f32 %v1565_v48, %v1547_v12  ;;  %v1572_v44 = vadd.f32 %v1566_v36, %v1548_v61  ;;  %v4994_v5 = vld [vmem:[#allocation31_spill] sm:$0xff]  ;;  %v5000_v48 = vld [vmem:[#allocation36_spill] sm:$0xff] }
 0x3c1   : > { %v1636_v52 = vsel %vm1046_vm6, %v3977_v63, %v4994_v5  ;;  %v1639_v11 = vsel %vm1046_vm6, %v4994_v5, %v3977_v63  ;;  %v1421_v36 = vsel %vm806_vm2, %v5000_v48, %v4034_v16  ;;  %v1424_v21 = vsel %vm806_vm2, %v4034_v16, %v5000_v48 }
 0x3c2   : > { %v1619_v13 = vadd.f32 %v1613_v27, %v1571_v18  ;;  %v1620_v37 = vadd.f32 %v1614_v50, %v1572_v44  ;;  %v1643_v1 = vmul.f32 %v1636_v52, %v3383_v10  ;;  %v1644_v15 = vmul.f32 %v1639_v11, %v4995_v0  ;;  %v5001_v18 = vld [vmem:[#allocation34_spill] sm:$0xff] }
 0x3c3   : > { %v1689_v4 = vmul.f32 %v1683_v3, %v4996_v19  ;;  %v1429_v45 = vmul.f32 %v1424_v21, %v3268_v2  ;;  %v1430_v12 = vmul.f32 %v1421_v36, %v3270_v17  ;;  %v1381_v44 = vmul.f32 %v5001_v18, %v3277_v40  ;;  %v5008_v21 = vld [vmem:[#allocation14_spill] sm:$0xff]  ;;  %v5011_v18 = vld [vmem:[#allocation24_spill] sm:$0xff] }
 0x3c4   : > { %v1680_v6 = vpop.permute.xlu1 %1679  ;;  %2667 = vset.pattern.permute.xlu1 %v4929_v20 }
 0x3c5   : > { %v1684_v34 = vsel %vm1100_vm8, %v3942_v39, %v1680_v6  ;;  %v1687_v42 = vsel %vm1100_vm8, %v1680_v6, %v3942_v39  ;;  %2668 = vset.pattern.permute.xlu2 %v4956_v35  ;;  %v4997_v39 = vld [vmem:[#allocation19_spill] sm:$0xff]  ;;  %v1514_v38 = vpop.permute.xlu2 %1513  ;;  %v5003_v6 = vld [vmem:[#allocation37_spill] sm:$0xff] }
 0x3c6   : > { %v1691_v49 = vmul.f32 %v1684_v34, %v4996_v19  ;;  %v1692_v24 = vmul.f32 %v1687_v42, %v4997_v39  ;;  %v1690_v55 = vmul.f32 %v1686_v56, %v4997_v39  ;;  %v5004_v34 = vld [vmem:[#allocation35_spill] sm:$0xff] }
 0x3c7   : > { %v1469_v16 = vsel %vm860_vm4, %v5004_v34, %v5003_v6  ;;  %v1472_v42 = vsel %vm860_vm4, %v5003_v6, %v5004_v34 }
 0x3c8   : > { %v1709_v46 = vmul.f32 %v1701_v30, %v1691_v49  ;;  %v1710_v51 = vmul.f32 %v1701_v30, %v1692_v24  ;;  %v5006_v49 = vld [vmem:[#allocation21_spill] sm:$0xff] }
 0x3c9   : > { %v1405_v24 = vmul.f32 %v5006_v49, %v1381_v44 }
 0x3cc   : > { %v1653_v33 = vpop.permute.xlu1 %1652 }
 0x3cd   : > { %v1661_v31 = vmul.f32 %v1653_v33, %v1643_v1  ;;  %v1662_v60 = vmul.f32 %v1653_v33, %v1644_v15  ;;  %v1586_v5 = vpop.permute.xlu2 %1585  ;;  %v5005_v1 = vld [vmem:[#allocation20_spill] sm:$0xff] }
 0x3ce   : > { %v1447_v15 = vmul.f32 %v5005_v1, %v1429_v45  ;;  %v1448_v30 = vmul.f32 %v5005_v1, %v1430_v12 }
 0x3cf   : > { %v1667_v53 = vadd.f32 %v1661_v31, %v1619_v13  ;;  %v1668_v22 = vadd.f32 %v1662_v60, %v1620_v37  ;;  %v5002_v13 = vld [vmem:[#allocation22_spill] sm:$0xff]  ;;  %v1477_v31 = vmul.f32 %v1472_v42, %v3314_v9  ;;  %v1478_v60 = vmul.f32 %v1469_v16, %v3316_v7 }
 0x3d0   : > { %v1382_v37 = vmul.f32 %v5002_v13, %v3279_v25 }
 0x3d1   : > { %v4144_v28 = vadd.f32 %v1709_v46, %v1667_v53  ;;  %v4146_v57 = vadd.f32 %v1710_v51, %v1668_v22  ;;  %v1453_v46 = vadd.f32 %v1447_v15, %v1405_v24  ;;  %v5007_v22 = vld [vmem:[#allocation30_spill] sm:$0xff] }
 0x3d2   : > { %v1406_v33 = vmul.f32 %v5006_v49, %v1382_v37  ;;  %v1495_v23 = vmul.f32 %v5007_v22, %v1477_v31  ;;  %v1496_v8 = vmul.f32 %v5007_v22, %v1478_v60 }
 0x3d4   : > { %v4148_v63 = vpop.permute.xlu1 %1721  ;;  %v1454_v51 = vadd.f32 %v1448_v30, %v1406_v33  ;;  %v1501_v48 = vadd.f32 %v1495_v23, %v1453_v46 }
 0x3d5   : > { %v1634_v45 = vpop.permute.xlu2 %1633 }
 0x3d6   : > { %v1502_v36 = vadd.f32 %v1496_v8, %v1454_v51  ;;  %v5013_v8 = vld [vmem:[#allocation23_spill] sm:$0xff] }
 0x3dc   : > { %v1697_v61 = vpop.permute.xlu1 %1696 }
 0x3dd   : > { %v1707_v27 = vmul.f32 %v1697_v61, %v1689_v4  ;;  %v1708_v50 = vmul.f32 %v1697_v61, %v1690_v55  ;;  %v1682_v34 = vpop.permute.xlu2 %1681 }
 0x3df   : > { %v4183_v52 = vadd.f32 %v1707_v27, %v4098_v14  ;;  %v4186_v11 = vadd.f32 %v1708_v50, %v4101_v47  ;;  %v5009_v27 = vld [vmem:[#allocation12_spill] sm:$0xff]  ;;  %v5010_v50 = vld [vmem:[#allocation27_spill] sm:$0xff] }
 0x3e0   : > { %v1568_v44 = vmul.f32 %v5010_v50, %v5011_v18 }
 0x3e4   : > { %v1508_v53 = vpop.permute.xlu1 %1507 }
 0x3e5   : > { %v1517_v14 = vsel %vm914_vm5, %v1508_v53, %v1514_v38  ;;  %v1520_v47 = vsel %vm914_vm5, %v1514_v38, %v1508_v53  ;;  %v1567_v38 = vmul.f32 %v5010_v50, %v5009_v27  ;;  %v1724_v31 = vpop.permute.xlu2 %1723  ;;  %v5012_v53 = vld [vmem:[#allocation28_spill] sm:$0xff] }
 0x3e6   : > { %v1525_v3 = vmul.f32 %v1520_v47, %v3318_v62  ;;  %v1526_v56 = vmul.f32 %v1517_v14, %v3320_v54 }
 0x3e8   : > { %v1543_v4 = vmul.f32 %v5008_v21, %v1525_v3  ;;  %v1544_v55 = vmul.f32 %v5008_v21, %v1526_v56 }
 0x3ea   : > { %v1549_v12 = vadd.f32 %v1543_v4, %v1501_v48  ;;  %v1550_v61 = vadd.f32 %v1544_v55, %v1502_v36  ;;  %v1728_v48 = vpop.permute.xlu0 %1727  ;;  %v5014_v4 = vld [vmem:[#allocation26_spill] sm:$0xff] }
 0x3ec   : > { %v1580_v13 = vpop.permute.xlu1 %1579  ;;  %v1573_v37 = vadd.f32 %v1567_v38, %v1549_v12  ;;  %v1574_v6 = vadd.f32 %v1568_v44, %v1550_v61  ;;  %v4239_v38 = vld [vmem:[%s4770_s16 + $0x10] sm:$0xff]  ;;  %v5015_v44 = vld [vmem:[#allocation18_spill] sm:$0xff] }
 0x3ed   : > { %v1589_v42 = vsel %vm992_vm7, %v1580_v13, %v1586_v5  ;;  %v1592_v1 = vsel %vm992_vm7, %v1586_v5, %v1580_v13  ;;  %2011 = vperm.xlu0 %2664, %v4239_v38   ;;  %2059 = vperm.xlu1 %2667, %v4239_v38  }
 0x3ee   : > { %v1597_v30 = vmul.f32 %v1589_v42, %v3413_v43  ;;  %v1598_v24 = vmul.f32 %v1592_v1, %v3415_v29  ;;  %v1749_v42 = vpop.permute.xlu2 %1748  ;;  %2107 = vperm.xlu2 %2668, %v4239_v38  }
 0x3f0   : > { %v1615_v14 = vmul.f32 %v5012_v53, %v1597_v30  ;;  %v1616_v47 = vmul.f32 %v5012_v53, %v1598_v24  ;;  %v5017_v30 = vld [vmem:[#allocation17_spill] sm:$0xff] }
 0x3f2   : > { %v1621_v36 = vadd.f32 %v1615_v14, %v1573_v37  ;;  %v1622_v21 = vadd.f32 %v1616_v47, %v1574_v6  ;;  %v5016_v37 = vld [vmem:[#allocation13_spill] sm:$0xff] }
 0x3f4   : > { %v1628_v16 = vpop.permute.xlu1 %1627 }
 0x3f5   : > { %v1637_v15 = vsel %vm1046_vm6, %v1628_v16, %v1634_v45  ;;  %v1640_v49 = vsel %vm1046_vm6, %v1634_v45, %v1628_v16  ;;  %v1734_v16 = vsel %vm1154_vm9, %v4122_v26, %v4088_v58  ;;  %2666 = vset.pattern.permute.xlu0 %v4929_v20 }
 0x3f6   : > { %v1645_v60 = vmul.f32 %v1637_v15, %v3383_v10  ;;  %v1646_v51 = vmul.f32 %v1640_v49, %v4995_v0  ;;  %2055 = vperm.xlu0 %2666, %v4017_v59   ;;  %2099 = vperm.xlu2 %2668, %v4051_v32  }
 0x3f8   : > { %v1663_v3 = vmul.f32 %v5013_v8, %v1645_v60  ;;  %v1664_v56 = vmul.f32 %v5013_v8, %v1646_v51 }
 0x3fa   : > { %v1669_v61 = vadd.f32 %v1663_v3, %v1621_v36  ;;  %v1670_v18 = vadd.f32 %v1664_v56, %v1622_v21 }
 0x3fc   : > { %v1676_v33 = vpop.permute.xlu1 %1675 }
 0x3fd   : > { %v1685_v46 = vsel %vm1100_vm8, %v1676_v33, %v1682_v34  ;;  %v1688_v5 = vsel %vm1100_vm8, %v1682_v34, %v1676_v33  ;;  %v1731_v34 = vsel %vm1154_vm9, %v4088_v58, %v4122_v26  ;;  %v1732_v33 = vsel %vm1154_vm9, %v4148_v63, %v1728_v48 }
 0x3fe   : > { %v1693_v22 = vmul.f32 %v1685_v46, %v4996_v19  ;;  %v1694_v23 = vmul.f32 %v1688_v5, %v4997_v39  ;;  %v1737_v58 = vmul.f32 %v1731_v34, %v5015_v44  ;;  %v1738_v26 = vmul.f32 %v1734_v16, %v5016_v37  ;;  %v1783_v5 = vpop.permute.xlu0 %1782  ;;  %2670 = vset.pattern.permute.xlu0 %v4956_v35  ;;  %v1797_v35 = vld [vmem:[%s4766_s12] sm:$0x3] }
 0x3ff   : > { %v1739_v51 = vmul.f32 %v1732_v33, %v5015_v44  ;;  %v5019_v34 = vmov 4   ;;  %2103 = vperm.xlu0 %2670, %v4017_v59   ;;  %v5023_v33 = vmov 0  }
 0x400   : > { %v1711_v55 = vmul.f32 %v5014_v4, %v1693_v22  ;;  %v1712_v45 = vmul.f32 %v5014_v4, %v1694_v23 }
 0x401   : > { %v1757_v3 = vmul.f32 %v1749_v42, %v1739_v51  ;;  %v5024_v51 = vld [vmem:[#allocation16_spill] sm:$0xff] }
 0x402   : > { %v1717_v1 = vadd.f32 %v1711_v55, %v1669_v61  ;;  %v1718_v15 = vadd.f32 %v1712_v45, %v1670_v18 }
 0x403   : > { %v1763_v61 = vadd.f32 %v1757_v3, %v4144_v28 }
 0x404   : > { %v1730_v12 = vpop.permute.xlu1 %1729 }
 0x405   : > { %v1733_v27 = vsel %vm1154_vm9, %v1724_v31, %v1730_v12  ;;  %v1736_v50 = vsel %vm1154_vm9, %v1730_v12, %v1724_v31  ;;  %v1735_v31 = vsel %vm1154_vm9, %v1728_v48, %v4148_v63  ;;  %v5018_v48 = vmov 5   ;;  %v1778_v12 = vpop.permute.xlu2 %1777 }
 0x406   : > { %v1741_v13 = vmul.f32 %v1733_v27, %v5015_v44  ;;  %v1742_v6 = vmul.f32 %v1736_v50, %v5016_v37  ;;  %v1740_v53 = vmul.f32 %v1735_v31, %v5016_v37  ;;  %2669 = vset.pattern.permute.xlu1 %v5018_v48  ;;  %v1852_v31 = vld [vmem:[%s4769_s15 + $0x10] sm:$0xff] }
 0x407   : > { %2179 = vperm.xlu1 %2669, %v4239_v38   ;;  %2671 = vset.pattern.permute.xlu0 %v5019_v34 }
 0x408   : > { %v1759_v49 = vmul.f32 %v5017_v30, %v1741_v13  ;;  %v1760_v24 = vmul.f32 %v5017_v30, %v1742_v6  ;;  %v1758_v56 = vmul.f32 %v1749_v42, %v1740_v53  ;;  %2131 = vperm.xlu0 %2671, %v4239_v38  }
 0x40a   : > { %v1765_v60 = vadd.f32 %v1759_v49, %v1717_v1  ;;  %v1766_v46 = vadd.f32 %v1760_v24, %v1718_v15  ;;  %v1764_v27 = vadd.f32 %v1758_v56, %v4146_v57  ;;  %v5020_v57 = vmov 6   ;;  %v2550_v56 = vld [vmem:[%s4768_s14] sm:$0xff] }
 0x40b   : > { %2672 = vset.pattern.permute.xlu2 %v5020_v57  ;;  %v5021_v49 = vmov 8   ;;  %v5022_v24 = vmov 7  }
 0x40c   : > { %v1745_v14 = vpop.permute.xlu1 %1744  ;;  %v1789_v47 = vadd.f32 %v1783_v5, %v1765_v60  ;;  %v1790_v22 = vadd.f32 %v1783_v5, %v1766_v46  ;;  %2227 = vperm.xlu2 %2672, %v4239_v38   ;;  %v1806_v60 = vpop.permute.xlu0 %1805 }
 0x40d   : > { %v1755_v23 = vmul.f32 %v1745_v14, %v1737_v58  ;;  %v1756_v8 = vmul.f32 %v1745_v14, %v1738_v26  ;;  %v5026_v14 = vld [vmem:[#allocation15_spill] sm:$0xff] }
 0x40e   : > { %v1795_v36 = vmax.f32 %v1789_v47, 0.0  ;;  %v1796_v63 = vmax.f32 %v1790_v22, 0.0 }
 0x40f   : > { %v1761_v21 = vadd.f32 %v1755_v23, %v4183_v52  ;;  %v1762_v4 = vadd.f32 %v1756_v8, %v4186_v11  ;;  %v1787_v52 = vadd.f32 %v1778_v12, %v1763_v61  ;;  %v1788_v11 = vadd.f32 %v1778_v12, %v1764_v27  ;;  %2673 = vset.pattern.permute.xlu1 %v5019_v34 }
 0x410   : > { %v1800_v55 = vpack.c.bf16 %v1795_v36, %v1795_v36  ;;  %v1801_v45 = vpack.c.bf16 %v1796_v63, %v1796_v63  ;;  %2127 = vperm.xlu1 %2673, %v4017_v59   ;;  %2123 = vperm.xlu0 %2671, %v4051_v32  }
 0x411   : > { %v1793_v16 = vmax.f32 %v1787_v52, 0.0  ;;  %v1794_v42 = vmax.f32 %v1788_v11, 0.0 }
 0x412   : > { %v1812_v20 = vsel %vm1241_vm10, %v1800_v55, 0  ;;  %v1815_v50 = vsel %vm1241_vm10, %v1801_v45, 0 }
 0x413   : > { %1823 = vmatpush.bf16.msrb.mxu0 %v1812_v20  ;;  %1836 = vmatpush.bf16.msrb.mxu1 %v1815_v50 }
 0x414   : > { %2676 = vset.pattern.permute.xlu2 %v5018_v48 }
 0x415   : > { %v1773_v18 = vpop.permute.xlu1 %1772  ;;  %2175 = vperm.xlu2 %2676, %v4017_v59  }
 0x416   : > { %v1785_v13 = vadd.f32 %v1773_v18, %v1761_v21  ;;  %v1786_v6 = vadd.f32 %v1773_v18, %v1762_v4 }
 0x418   : > { %v1791_v28 = vmax.f32 %v1785_v13, 0.0  ;;  %v1792_v1 = vmax.f32 %v1786_v6, 0.0  ;;  %2675 = vset.pattern.permute.xlu1 %v5018_v48  ;;  %2674 = vset.pattern.permute.xlu0 %v5022_v24 }
 0x419   : > { %2171 = vperm.xlu1 %2675, %v4051_v32   ;;  %2275 = vperm.xlu0 %2674, %v4239_v38  }
 0x41a   : > { %v1798_v15 = vpack.c.bf16 %v1793_v16, %v1791_v28  ;;  %v1799_v30 = vpack.c.bf16 %v1794_v42, %v1792_v1  ;;  %v1861_v16 = vpop.permute.xlu2 %1860 }
 0x41c   : > { %1824 = vmatpush.bf16.msrb.mxu0 %v1798_v15  ;;  %1837 = vmatpush.bf16.msrb.mxu1 %v1799_v30 }
 0x41d   : > { %2677 = vset.pattern.permute.xlu2 %v5021_v49  ;;  %v1856_v61 = vpop.permute.xlu1 %1855 }
 0x41e   : > { %2323 = vperm.xlu2 %2677, %v4239_v38  }
 0x41f   : > { %2530 = vmatmul.msk.bf16.vlgmr.msrb.gmra.mxu0 %vm1237_vm11, %v1797_v35  ;;  %2531 = vmatmul.msk.bf16.vlgmr.msrb.gmra.mxu1 %vm1237_vm11, %v1797_v35 }
 0x421   : > { %2680 = vset.pattern.permute.xlu1 %v5020_v57  ;;  %2678 = vset.pattern.permute.xlu0 %v5020_v57 }
 0x422   : > { %2223 = vperm.xlu1 %2680, %v4017_v59   ;;  %2219 = vperm.xlu0 %2678, %v4051_v32   ;;  %v4352_v30 = vpop.permute.xlu2 %1964 }
 0x426   : > { %2682 = vset.pattern.permute.xlu2 %v5022_v24 }
 0x42a   : > { %2681 = vset.pattern.permute.xlu1 %v5022_v24  ;;  %2679 = vset.pattern.permute.xlu0 %v5023_v33 }
 0x42b   : > { %1865 = vperm.xlu0 %2679, %v1852_v31  }
 0x433   : > { %1969 = vperm.xlu0 %2679, %v4239_v38   ;;  %v1847_v38 = vld [vmem:[%s4768_s14 + $0x8] sm:$0xf] }
 0x434   : > { %v1873_v48 = vunpack.c.l.b16 %v1847_v38 }
 0x436   : > { %v1875_v21 = vpack.c.b16 %v1873_v48, %v1873_v48 }
 0x45f   : > { %v4332_v4 = vpop.permute.xlu0 %2011 }
 0x468   : > { %v4334_v55 = vpop.permute.xlu0 %2055 }
 0x471   : > { %v4336_v45 = vpop.permute.xlu0 %2103 }
 0x47a   : > { %v4338_v12 = vpop.permute.xlu0 %2131 }
 0x482   : > { %v2124_v11 = vpop.permute.xlu0 %2123 }
 0x48b   : > { %v4349_v1 = vpop.permute.xlu0 %2275 }
 0x48c   : > { %5030 = vst [vmem:[#allocation25_spill] sm:$0xff] %v4349_v1 }
 0x494   : > { %v4357_v24 = vpop.permute.xlu0 %2219 }
 0x49c   : > { %v1826_v46 = vpop.f32.mrf.mxu0  ;;  %v1839_v58 = vpop.f32.mrf.mxu1 }
 0x49d   : > { %v1827_v26 = vadd.f32 %v1826_v46, %v1806_v60  ;;  %v1840_v5 = vadd.f32 %v1839_v58, %v1806_v60  ;;  %v4359_v46 = vpop.permute.xlu2 %2007 }
 0x49f   : > { %v4310_v53 = vadd.f32 %v1827_v26, %v5024_v51  ;;  %v4313_v47 = vadd.f32 %v1840_v5, %v5026_v14  ;;  %v1866_v5 = vpop.permute.xlu0 %1865 }
 0x4a1   : > { %5025 = vst [vmem:[#allocation31_spill] sm:$0xff] %v4310_v53  ;;  %v1848_v22 = vpack.c.bf16 %v4310_v53, %v4310_v53  ;;  %v1849_v23 = vpack.c.bf16 %v4313_v47, %v4313_v47 }
 0x4a2   : > { %5027 = vst [vmem:[#allocation33_spill] sm:$0xff] %v4313_v47 }
 0x4a3   : > { %v1883_v8 = vsel %vm689_vm0, %v1848_v22, 0  ;;  %v1886_v3 = vsel %vm689_vm0, %v1849_v23, 0 }
 0x4a4   : > { %v1828_v36 = vpop.f32.mrf.mxu0  ;;  %v1841_v63 = vpop.f32.mrf.mxu1  ;;  %1895 = vmatpush.bf16.msra.mxu0 %v1883_v8  ;;  %1913 = vmatpush.bf16.msra.mxu1 %v1886_v3 }
 0x4a5   : > { %v4369_v14 = vpop.permute.xlu2 %2051  ;;  %v4390_v36 = vpop.permute.xlu1 %1959 }
 0x4a7   : > { %2536 = vmatmul.msk.bf16.vlgmr.msra.gmra.mxu0 %vm682_vm1, %v2550_v56  ;;  %2538 = vmatmul.msk.bf16.vlgmr.msra.gmra.mxu1 %vm682_vm1, %v2550_v56 }
 0x4ad   : > { %v4381_v3 = vpop.permute.xlu2 %2107  ;;  %v4399_v38 = vpop.permute.xlu1 %2003 }
 0x4b5   : > { %v4393_v63 = vpop.permute.xlu2 %2099 }
 0x4b7   : > { %2537 = vmatmul.msk.bf16.gmra.mxu0 %vm682_vm1, %v1875_v21  ;;  %2539 = vmatmul.msk.bf16.gmra.mxu1 %vm682_vm1, %v1875_v21  ;;  %v4410_v21 = vpop.permute.xlu1 %2059 }
 0x4bd   : > { %v4402_v48 = vpop.permute.xlu2 %2227 }
 0x4be   : > { %5031 = vst [vmem:[#allocation19_spill] sm:$0xff] %v4402_v48 }
 0x524   : > { %v1897_v27 = vpop.f32.mrf.mxu0  ;;  %v1915_v20 = vpop.f32.mrf.mxu1 }
 0x525   : > { %v1898_v50 = vadd.f32 %v1897_v27, %v1856_v61  ;;  %v1916_v52 = vadd.f32 %v1915_v20, %v1856_v61  ;;  %v4412_v61 = vpop.permute.xlu2 %2175  ;;  %v4420_v27 = vpop.permute.xlu1 %2179 }
 0x526   : > { %5032 = vst [vmem:[#allocation29_spill] sm:$0xff] %v4420_v27 }
 0x527   : > { %v1924_v18 = vmax.f32 %v1898_v50, 0.0  ;;  %v1925_v13 = vmax.f32 %v1916_v52, 0.0  ;;  %v2340_v50 = vld [vmem:[%s4771_s17 + $0x10] sm:$0xff] }
 0x529   : > { %v4340_v6 = vmul.f32 %v2124_v11, %v1924_v18  ;;  %v4342_v34 = vmul.f32 %v2124_v11, %v1925_v13  ;;  %2080 = vrot.lane.b32.xlu0 %v1925_v13, %s4969_s4  ;;  %2032 = vrot.lane.b32.xlu2 %v1925_v13, %s5028_s24 }
 0x52a   : > { %1930 = vrot.lane.b32.xlu1 %v1924_v18, %s5029_s1 }
 0x52c   : > { %v1899_v42 = vpop.f32.mrf.mxu0  ;;  %v1917_v28 = vpop.f32.mrf.mxu1 }
 0x52d   : > { %v1918_v35 = vadd.f32 %v1917_v28, %v1861_v16  ;;  %v1900_v26 = vadd.f32 %v1899_v42, %v1861_v16  ;;  %v4426_v20 = vpop.permute.xlu2 %2323  ;;  %v4433_v52 = vpop.permute.xlu1 %2127 }
 0x52e   : > { %5033 = vst [vmem:[#allocation32_spill] sm:$0xff] %v4426_v20  ;;  %v4454_v28 = vpop.permute.xlu0 %1969 }
 0x52f   : > { %v4361_v58 = vmax.f32 %v1918_v35, 0.0  ;;  %v4367_v51 = vmax.f32 %v1900_v26, 0.0 }
 0x531   : > { %2152 = vrot.lane.b32.xlu0 %v1925_v13, %s4973_s27  ;;  %2074 = vrot.lane.b32.xlu2 %v1924_v18, %s4969_s4 }
 0x532   : > { %1936 = vrot.lane.b32.xlu1 %v1925_v13, %s5029_s1 }
 0x534   : > { %v1902_v57 = vpop.f32.mrf.mxu0  ;;  %v1920_v15 = vpop.f32.mrf.mxu1 }
 0x535   : > { %v1903_v22 = vadd.f32 %v1902_v57, %v1866_v5  ;;  %v1921_v8 = vadd.f32 %v1920_v15, %v1866_v5 }
 0x537   : > { %v4375_v23 = vmax.f32 %v1903_v22, 0.0  ;;  %v4384_v56 = vmax.f32 %v1921_v8, 0.0 }
 0x539   : > { %2248 = vrot.lane.b32.xlu0 %v1925_v13, %s4974_s30  ;;  %2194 = vrot.lane.b32.xlu2 %v1924_v18, %s4985_s25 }
 0x53a   : > { %1978 = vrot.lane.b32.xlu1 %v1924_v18, %s4970_s29 }
 0x53c   : > { %v1904_v31 = vpop.f32.mrf.mxu0  ;;  %v1922_v60 = vpop.f32.mrf.mxu1 }
 0x541   : > { %2034 = vrot.lane.b32.xlu0 %v4361_v58, %s5028_s24  ;;  %2290 = vrot.lane.b32.xlu2 %v1924_v18, %s4982_s0 }
 0x542   : > { %1984 = vrot.lane.b32.xlu1 %v1925_v13, %s4970_s29 }
 0x549   : > { %2196 = vrot.lane.b32.xlu0 %v4367_v51, %s4985_s25  ;;  %2296 = vrot.lane.b32.xlu2 %v1925_v13, %s4982_s0 }
 0x54a   : > { %2026 = vrot.lane.b32.xlu1 %v1924_v18, %s5028_s24 }
 0x551   : > { %1934 = vrot.lane.b32.xlu0 %v4375_v23, %s5029_s1  ;;  %1932 = vrot.lane.b32.xlu2 %v4367_v51, %s5029_s1 }
 0x552   : > { %2146 = vrot.lane.b32.xlu1 %v1924_v18, %s4973_s27 }
 0x559   : > { %1940 = vrot.lane.b32.xlu0 %v4384_v56, %s5029_s1  ;;  %1938 = vrot.lane.b32.xlu2 %v4361_v58, %s5029_s1 }
 0x55a   : > { %2200 = vrot.lane.b32.xlu1 %v1925_v13, %s4985_s25  ;;  %v4442_v13 = vpop.permute.xlu1 %2171 }
 0x561   : > { %1982 = vrot.lane.b32.xlu0 %v4375_v23, %s4970_s29  ;;  %1980 = vrot.lane.b32.xlu2 %v4367_v51, %s4970_s29 }
 0x562   : > { %2242 = vrot.lane.b32.xlu1 %v1924_v18, %s4974_s30  ;;  %v2373_v18 = vld [vmem:[%s4773_s19] sm:$0xf]  ;;  %v4452_v42 = vpop.permute.xlu1 %2223 }
 0x569   : > { %1988 = vrot.lane.b32.xlu0 %v4384_v56, %s4970_s29  ;;  %1986 = vrot.lane.b32.xlu2 %v4361_v58, %s4970_s29  ;;  %s2551_s29 = sshll.u32 %s2894_s2, 3 }
 0x56a   : > { %2076 = vrot.lane.b32.xlu1 %v4367_v51, %s4969_s4  ;;  %s2434_s3 = scalar_lea.hbm %s4774_s20, %s2551_s29 }
 0x571   : > { %2150 = vrot.lane.b32.xlu0 %v4375_v23, %s4973_s27  ;;  %2028 = vrot.lane.b32.xlu2 %v4367_v51, %s5028_s24 }
 0x572   : > { %2154 = vrot.lane.b32.xlu1 %v4361_v58, %s4973_s27 }
 0x579   : > { %2298 = vrot.lane.b32.xlu0 %v4361_v58, %s4982_s0  ;;  %2082 = vrot.lane.b32.xlu2 %v4361_v58, %s4969_s4 }
 0x57a   : > { %2250 = vrot.lane.b32.xlu1 %v4361_v58, %s4974_s30 }
 0x581   : > { %2353 = vperm.xlu0 %2679, %v2340_v50   ;;  %2148 = vrot.lane.b32.xlu2 %v4367_v51, %s4973_s27 }
 0x582   : > { %2292 = vrot.lane.b32.xlu1 %v4367_v51, %s4982_s0 }
 0x583   : > { %v2033_v11 = vpop.permute.xlu2 %2032 }
 0x589   : > { %2376 = vperm.xlu0 %2679, %v2373_v18   ;;  %2202 = vrot.lane.b32.xlu2 %v4361_v58, %s4985_s25 }
 0x58a   : > { %2030 = vrot.lane.b32.xlu1 %v4375_v23, %s5028_s24 }
 0x58b   : > { %v2075_v16 = vpop.permute.xlu2 %2074 }
 0x591   : > { %2244 = vrot.lane.b32.xlu2 %v4367_v51, %s4974_s30 }
 0x592   : > { %2036 = vrot.lane.b32.xlu1 %v4384_v56, %s5028_s24  ;;  %s620_s24 = sand.u32 1, %s2741_s22  }
 0x593   : > { %v4456_v57 = vpop.permute.xlu2 %2194  ;;  %s2502_s1 = sshll.u32 %s620_s24, 3  ;;  %s2423_s2 = scalar_lea.sflag [#allocation3], %s620_s24 }
 0x599   : > { %2078 = vrot.lane.b32.xlu2 %v4375_v23, %s4969_s4 }
 0x59a   : > { %2084 = vrot.lane.b32.xlu1 %v4384_v56, %s4969_s4  ;;  %s622_s4 = scalar_lea.vmem [#allocation2], %s2502_s1 }
 0x59b   : > { %v2081_v15 = vpop.permute.xlu0 %2080  ;;  %v2291_v35 = vpop.permute.xlu2 %2290 }
 0x59c   : > { %v2086_v31 = vsel %vm914_vm5, %v2075_v16, %v2081_v15  ;;  %v2089_v60 = vsel %vm914_vm5, %v2081_v15, %v2075_v16  ;;  %v1931_v26 = vpop.permute.xlu1 %1930 }
 0x5a1   : > { %2271 = vperm.xlu2 %2682, %v4017_v59  }
 0x5a2   : > { %2267 = vperm.xlu1 %2681, %v4051_v32  }
 0x5a3   : > { %v2297_v5 = vpop.permute.xlu2 %2296 }
 0x5a4   : > { %v4470_v22 = vsel %vm1154_vm9, %v2291_v35, %v2297_v5  ;;  %v4474_v8 = vsel %vm1154_vm9, %v2297_v5, %v2291_v35  ;;  %v1937_v50 = vpop.permute.xlu1 %1936 }
 0x5a5   : > { %5034 = vst [vmem:[#allocation36_spill] sm:$0xff] %v4470_v22  ;;  %v1942_v18 = vsel %vm752_vm3, %v1931_v26, %v1937_v50  ;;  %v1945_v16 = vsel %vm752_vm3, %v1937_v50, %v1931_v26 }
 0x5a6   : > { %5035 = vst [vmem:[#allocation34_spill] sm:$0xff] %v4474_v8  ;;  %v1948_v26 = vmul.f32 %v1945_v16, %v3277_v40  ;;  %v1949_v50 = vmul.f32 %v1942_v18, %v3279_v25  ;;  %v2153_v16 = vpop.permute.xlu0 %2152 }
 0x5a8   : > { %v1972_v18 = vmul.f32 %v4390_v36, %v1948_v26  ;;  %v1973_v48 = vmul.f32 %v4390_v36, %v1949_v50 }
 0x5a9   : > { %2204 = vrot.lane.b32.xlu2 %v4384_v56, %s4985_s25 }
 0x5aa   : > { %2156 = vrot.lane.b32.xlu1 %v4384_v56, %s4973_s27  ;;  %2684 = vset.pattern.permute.xlu2 %v5021_v49 }
 0x5ab   : > { %v1933_v15 = vpop.permute.xlu2 %1932  ;;  %2683 = vset.pattern.permute.xlu1 %v5021_v49 }
 0x5ac   : > { %v1979_v35 = vpop.permute.xlu1 %1978 }
 0x5ad   : > { %v5042_v41 = vld [vmem:[#allocation34_spill] sm:$0xff] }
 0x5ae   : > { %v4520_v50 = vpop.permute.xlu0 %2248 }
 0x5b1   : > { %2252 = vrot.lane.b32.xlu2 %v4384_v56, %s4974_s30 }
 0x5b2   : > { %2198 = vrot.lane.b32.xlu1 %v4375_v23, %s4985_s25 }
 0x5b3   : > { %v1939_v5 = vpop.permute.xlu2 %1938 }
 0x5b4   : > { %v1943_v53 = vsel %vm752_vm3, %v1933_v15, %v1939_v5  ;;  %v1946_v47 = vsel %vm752_vm3, %v1939_v5, %v1933_v15  ;;  %v1985_v8 = vpop.permute.xlu1 %1984 }
 0x5b5   : > { %v1990_v49 = vsel %vm806_vm2, %v1979_v35, %v1985_v8  ;;  %v1993_v22 = vsel %vm806_vm2, %v1985_v8, %v1979_v35 }
 0x5b6   : > { %v1996_v20 = vmul.f32 %v1993_v22, %v3268_v2  ;;  %v1997_v1 = vmul.f32 %v1990_v49, %v3270_v17 }
 0x5b8   : > { %v2014_v27 = vmul.f32 %v4399_v38, %v1996_v20  ;;  %v2015_v15 = vmul.f32 %v4399_v38, %v1997_v1  ;;  %v2092_v20 = vmul.f32 %v2089_v60, %v3318_v62  ;;  %v2093_v1 = vmul.f32 %v2086_v31, %v3320_v54 }
 0x5b9   : > { %2294 = vrot.lane.b32.xlu2 %v4375_v23, %s4982_s0  ;;  %v1950_v31 = vmul.f32 %v1946_v47, %v3277_v40 }
 0x5ba   : > { %v2020_v5 = vadd.f32 %v2014_v27, %v1972_v18  ;;  %v2021_v37 = vadd.f32 %v2015_v15, %v1973_v48  ;;  %2246 = vrot.lane.b32.xlu1 %v4375_v23, %s4974_s30  ;;  %v2110_v49 = vmul.f32 %v4393_v63, %v2092_v20  ;;  %v1951_v15 = vmul.f32 %v1943_v53, %v3279_v25  ;;  %s2436_s30 = sshll.u32 %s622_s4, 4  ;;  %s2437_s30 = int_to_ptr.vmem [resolvable:$true] %s2436_s30 }
 0x5bb   : > { %v1981_v22 = vpop.permute.xlu2 %1980 }
 0x5bc   : > { %v2027_v8 = vpop.permute.xlu1 %2026 }
 0x5bd   : > { %v2038_v35 = vsel %vm860_vm4, %v2027_v8, %v2033_v11  ;;  %v2041_v36 = vsel %vm860_vm4, %v2033_v11, %v2027_v8  ;;  %v2111_v11 = vmul.f32 %v4393_v63, %v2093_v1 }
 0x5be   : > { %v2044_v38 = vmul.f32 %v2041_v36, %v3314_v9  ;;  %v2045_v27 = vmul.f32 %v2038_v35, %v3316_v7 }
 0x5c0   : > { %v2062_v48 = vmul.f32 %v4369_v14, %v2044_v38  ;;  %v2063_v26 = vmul.f32 %v4369_v14, %v2045_v27 }
 0x5c1   : > { %2319 = vperm.xlu2 %2684, %v4017_v59  }
 0x5c2   : > { %v2068_v18 = vadd.f32 %v2062_v48, %v2020_v5  ;;  %v2069_v60 = vadd.f32 %v2063_v26, %v2021_v37  ;;  %2300 = vrot.lane.b32.xlu1 %v4384_v56, %s4982_s0  ;;  %v1975_v48 = vmul.f32 %v4352_v30, %v1951_v15  ;;  %s2438_s0 = sshll.u32 %s2434_s3, 4  ;;  %s2439_s0 = int_to_ptr.hbm [resolvable:$true] %s2438_s0 }
 0x5c3   : > { %v1987_v8 = vpop.permute.xlu2 %1986  ;;  %s2701_s25 = sshra.s32 %s2439_s0, 4  ;;  %s2702_s25 = int_to_ptr.hbm [resolvable:$true] %s2701_s25 }
 0x5c4   : > { %v2116_v35 = vadd.f32 %v2110_v49, %v2068_v18  ;;  %v2117_v14 = vadd.f32 %v2111_v11, %v2069_v60  ;;  %v1991_v36 = vsel %vm806_vm2, %v1981_v22, %v1987_v8  ;;  %v1994_v59 = vsel %vm806_vm2, %v1987_v8, %v1981_v22  ;;  %v2147_v20 = vpop.permute.xlu1 %2146  ;;  %s2703_s23 = scalar_lea.hbm %s2702_s25, 8  ;;  %p2708_p0 = scmp.lt.s32.totalorder %s2702_s25, %s4774_s20 }
 0x5c5   : > { %v1998_v63 = vmul.f32 %v1994_v59, %v3268_v2  ;;  %v1999_v37 = vmul.f32 %v1991_v36, %v3270_v17  ;;  %v2158_v5 = vsel %vm992_vm7, %v2147_v20, %v2153_v16  ;;  %v2161_v53 = vsel %vm992_vm7, %v2153_v16, %v2147_v20  ;;  %v2339_v16 = vld [vmem:[%s4771_s17 + $0x8] sm:$0xff]  ;;  %p2704_p11 = scmp.ne.s32.totalorder %s2702_s25, %s2703_s23  ;;  %p2709_p1 = scmp.lt.s32.totalorder %s2707_s5, %s2703_s23 }
 0x5c6   : > { %v2141_v47 = vadd.f32 %v4342_v34, %v2117_v14  ;;  %v2140_v1 = vadd.f32 %v4340_v6, %v2116_v35  ;;  %v2164_v38 = vmul.f32 %v2158_v5, %v3413_v43  ;;  %v2165_v27 = vmul.f32 %v2161_v53, %v3415_v29  ;;  %v2338_v5 = vld [vmem:[%s4771_s17] sm:$0xff] }
 0x5c7   : > { %v1974_v22 = vmul.f32 %v4352_v30, %v1950_v31  ;;  %v2016_v26 = vmul.f32 %v4359_v46, %v1998_v63  ;;  %v2017_v49 = vmul.f32 %v4359_v46, %v1999_v37  ;;  %v2035_v30 = vpop.permute.xlu0 %2034  ;;  %p2705_p12 = pnand %p2704_p11, %p2911_p5  ;;  %p2710_p2 = por %p2709_p1, %p2708_p0 }
 0x5c8   : > { %v2182_v34 = vmul.f32 %v4442_v13, %v2164_v38  ;;  %v2183_v6 = vmul.f32 %v4442_v13, %v2165_v27 }
 0x5c9   : > { %v2022_v11 = vadd.f32 %v2016_v26, %v1974_v22  ;;  %v2023_v18 = vadd.f32 %v2017_v49, %v1975_v48  ;;  %2686 = vset.pattern.permute.xlu2 %v5023_v33  ;;  %p2706_p13 = pneg %p2705_p12 }
 0x5ca   : > { %v2188_v60 = vadd.f32 %v2182_v34, %v2140_v1  ;;  %v2189_v31 = vadd.f32 %v2183_v6, %v2141_v47  ;;  %2315 = vperm.xlu1 %2683, %v4051_v32   ;;  %2348 = vperm.xlu2 %2686, %v2339_v16  }
 0x5cb   : > { %v2029_v15 = vpop.permute.xlu2 %2028  ;;  %p2711_p3 = pnand %p2710_p2, %p2706_p13 }
 0x5cc   : > { %v2039_v46 = vsel %vm860_vm4, %v2029_v15, %v2035_v30  ;;  %v2042_v8 = vsel %vm860_vm4, %v2035_v30, %v2029_v15  ;;  %v2201_v35 = vpop.permute.xlu1 %2200 }
 0x5cd   : > { %v2046_v13 = vmul.f32 %v2042_v8, %v3314_v9  ;;  %v2047_v14 = vmul.f32 %v2039_v46, %v3316_v7  ;;  %v2206_v36 = vsel %vm1046_vm6, %v4456_v57, %v2201_v35  ;;  %v2209_v32 = vsel %vm1046_vm6, %v2201_v35, %v4456_v57 }
 0x5ce   : > { %v2212_v63 = vmul.f32 %v2206_v36, %v3383_v10  ;;  %v2213_v37 = vmul.f32 %v2209_v32, %v4995_v0 }
 0x5cf   : > { %v2064_v59 = vmul.f32 %v4334_v55, %v2046_v13  ;;  %v2065_v20 = vmul.f32 %v4334_v55, %v2047_v14 }
 0x5d0   : > { %v2230_v1 = vmul.f32 %v4357_v24, %v2212_v63  ;;  %v2231_v38 = vmul.f32 %v4357_v24, %v2213_v37  ;;  %v2197_v24 = vpop.permute.xlu0 %2196 }
 0x5d1   : > { %v2070_v53 = vadd.f32 %v2064_v59, %v2022_v11  ;;  %v2071_v47 = vadd.f32 %v2065_v20, %v2023_v18 }
 0x5d2   : > { %2685 = vset.pattern.permute.xlu1 %v5023_v33  ;;  %v4576_v55 = vadd.f32 %v2231_v38, %v2189_v31  ;;  %v4578_v22 = vadd.f32 %v2230_v1, %v2188_v60  ;;  %v2137_v31 = vmul.f32 %v4433_v52, %v4361_v58 }
 0x5d3   : > { %2343 = vperm.xlu1 %2685, %v2338_v5   ;;  %v2083_v57 = vpop.permute.xlu2 %2082 }
 0x5d4   : > { %v2243_v27 = vpop.permute.xlu1 %2242 }
 0x5d5   : > { %v4583_v48 = vsel %vm1100_vm8, %v2243_v27, %v4520_v50  ;;  %v4588_v26 = vsel %vm1100_vm8, %v4520_v50, %v2243_v27  ;;  %v2136_v50 = vmul.f32 %v4433_v52, %v4367_v51 }
 0x5d8   : > { %v1935_v30 = vpop.permute.xlu0 %1934 }
 0x5db   : > { %v2149_v49 = vpop.permute.xlu2 %2148 }
 0x5dc   : > { %v2077_v33 = vpop.permute.xlu1 %2076 }
 0x5dd   : > { %v2087_v16 = vsel %vm914_vm5, %v2077_v33, %v2083_v57  ;;  %v2090_v34 = vsel %vm914_vm5, %v2083_v57, %v2077_v33 }
 0x5de   : > { %v2094_v6 = vmul.f32 %v2090_v34, %v3318_v62  ;;  %v2095_v11 = vmul.f32 %v2087_v16, %v3320_v54 }
 0x5e0   : > { %v2112_v18 = vmul.f32 %v4336_v45, %v2094_v6  ;;  %v2113_v60 = vmul.f32 %v4336_v45, %v2095_v11  ;;  %v1941_v37 = vpop.permute.xlu0 %1940 }
 0x5e2   : > { %v2118_v15 = vadd.f32 %v2112_v18, %v2070_v53  ;;  %v2119_v46 = vadd.f32 %v2113_v60, %v2071_v47 }
 0x5e3   : > { %v2203_v8 = vpop.permute.xlu2 %2202 }
 0x5e4   : > { %v2142_v35 = vadd.f32 %v2136_v50, %v2118_v15  ;;  %v2143_v13 = vadd.f32 %v2137_v31, %v2119_v46  ;;  %v2155_v14 = vpop.permute.xlu1 %2154  ;;  %v2207_v53 = vsel %vm1046_vm6, %v2197_v24, %v2203_v8  ;;  %v2210_v47 = vsel %vm1046_vm6, %v2203_v8, %v2197_v24 }
 0x5e5   : > { %v2159_v36 = vsel %vm992_vm7, %v2149_v49, %v2155_v14  ;;  %v2162_v32 = vsel %vm992_vm7, %v2155_v14, %v2149_v49  ;;  %v2214_v27 = vmul.f32 %v2207_v53, %v3383_v10  ;;  %v2215_v49 = vmul.f32 %v2210_v47, %v4995_v0 }
 0x5e6   : > { %v2166_v45 = vmul.f32 %v2159_v36, %v3413_v43  ;;  %v2167_v51 = vmul.f32 %v2162_v32, %v3415_v29  ;;  %v1944_v32 = vsel %vm752_vm3, %v1935_v30, %v1941_v37 }
 0x5e7   : > { %v2232_v16 = vmul.f32 %v4452_v42, %v2214_v27  ;;  %v2233_v34 = vmul.f32 %v4452_v42, %v2215_v49 }
 0x5e8   : > { %v2184_v59 = vmul.f32 %v4412_v61, %v2166_v45  ;;  %v2185_v58 = vmul.f32 %v4412_v61, %v2167_v51  ;;  %v1983_v57 = vpop.permute.xlu0 %1982  ;;  %v1947_v45 = vsel %vm752_vm3, %v1941_v37, %v1935_v30 }
 0x5ea   : > { %v2190_v52 = vadd.f32 %v2184_v59, %v2142_v35  ;;  %v2191_v20 = vadd.f32 %v2185_v58, %v2143_v13 }
 0x5eb   : > { %v2245_v63 = vpop.permute.xlu2 %2244 }
 0x5ec   : > { %v2251_v5 = vpop.permute.xlu1 %2250  ;;  %v2238_v18 = vadd.f32 %v2232_v16, %v2190_v52  ;;  %v2239_v60 = vadd.f32 %v2233_v34, %v2191_v20  ;;  %v1952_v20 = vmul.f32 %v1947_v45, %v3277_v40 }
 0x5ed   : > { %v2255_v61 = vsel %vm1100_vm8, %v2245_v63, %v2251_v5  ;;  %v2258_v33 = vsel %vm1100_vm8, %v2251_v5, %v2245_v63  ;;  %v1953_v63 = vmul.f32 %v1944_v32, %v3279_v25 }
 0x5ee   : > { %v2262_v24 = vmul.f32 %v2255_v61, %v4996_v19  ;;  %v2263_v6 = vmul.f32 %v2258_v33, %v4997_v39 }
 0x5ef   : > { %v1977_v27 = vmul.f32 %v4454_v28, %v1953_v63 }
 0x5f0   : > { %v1989_v35 = vpop.permute.xlu0 %1988 }
 0x5f1   : > { %v1992_v13 = vsel %vm806_vm2, %v1983_v57, %v1989_v35  ;;  %v1995_v14 = vsel %vm806_vm2, %v1989_v35, %v1983_v57  ;;  %v1976_v57 = vmul.f32 %v4454_v28, %v1952_v20 }
 0x5f2   : > { %v2000_v58 = vmul.f32 %v1995_v14, %v3268_v2  ;;  %v2001_v52 = vmul.f32 %v1992_v13, %v3270_v17  ;;  %v5036_v13 = vld [vmem:[#allocation13_spill] sm:$0xff] }
 0x5f3   : > { %v2079_v1 = vpop.permute.xlu2 %2078 }
 0x5f4   : > { %v4614_v38 = vpop.permute.xlu1 %2292  ;;  %v2018_v30 = vmul.f32 %v4332_v4, %v2000_v58  ;;  %v2019_v37 = vmul.f32 %v4332_v4, %v2001_v52 }
 0x5f6   : > { %v2025_v61 = vadd.f32 %v2019_v37, %v1977_v27 }
 0x5f8   : > { %v2151_v2 = vpop.permute.xlu0 %2150 }
 0x5fb   : > { %v2272_v11 = vpop.permute.xlu2 %2271 }
 0x5fc   : > { %v2280_v50 = vmul.f32 %v2272_v11, %v2262_v24  ;;  %v2281_v31 = vmul.f32 %v2272_v11, %v2263_v6  ;;  %v2031_v15 = vpop.permute.xlu1 %2030  ;;  %v2138_v11 = vmul.f32 %v4338_v12, %v4375_v23 }
 0x5fe   : > { %v2286_v46 = vadd.f32 %v2280_v50, %v2238_v18  ;;  %v2287_v8 = vadd.f32 %v2281_v31, %v2239_v60  ;;  %v2260_v18 = vmul.f32 %v4583_v48, %v4996_v19 }
 0x600   : > { %v2299_v35 = vpop.permute.xlu0 %2298 }
 0x601   : > { %v2303_v23 = vsel %vm1154_vm9, %v4614_v38, %v2299_v35 }
 0x603   : > { %v2205_v42 = vpop.permute.xlu2 %2204 }
 0x604   : > { %v2037_v36 = vpop.permute.xlu1 %2036 }
 0x605   : > { %v2040_v51 = vsel %vm860_vm4, %v2031_v15, %v2037_v36  ;;  %v2043_v59 = vsel %vm860_vm4, %v2037_v36, %v2031_v15 }
 0x606   : > { %v2048_v5 = vmul.f32 %v2043_v59, %v3314_v9  ;;  %v2049_v53 = vmul.f32 %v2040_v51, %v3316_v7  ;;  %v2024_v9 = vadd.f32 %v2018_v30, %v1976_v57  ;;  %v5037_v57 = vld [vmem:[#allocation29_spill] sm:$0xff] }
 0x608   : > { %v2066_v17 = vmul.f32 %v4410_v21, %v2048_v5  ;;  %v2067_v40 = vmul.f32 %v4410_v21, %v2049_v53 }
 0x60a   : > { %v2072_v16 = vadd.f32 %v2066_v17, %v2024_v9  ;;  %v2073_v28 = vadd.f32 %v2067_v40, %v2025_v61 }
 0x60b   : > { %v2253_v47 = vpop.permute.xlu2 %2252 }
 0x60c   : > { %v2085_v49 = vpop.permute.xlu1 %2084 }
 0x60d   : > { %v2088_v25 = vsel %vm914_vm5, %v2079_v1, %v2085_v49  ;;  %v2091_v7 = vsel %vm914_vm5, %v2085_v49, %v2079_v1  ;;  %v2139_v1 = vmul.f32 %v4338_v12, %v4384_v56  ;;  %v2306_v12 = vsel %vm1154_vm9, %v2299_v35, %v4614_v38 }
 0x60e   : > { %v2096_v4 = vmul.f32 %v2091_v7, %v3318_v62  ;;  %v2097_v33 = vmul.f32 %v2088_v25, %v3320_v54  ;;  %v2261_v54 = vmul.f32 %v4588_v26, %v4997_v39  ;;  %v2310_v26 = vmul.f32 %v2303_v23, %v5015_v44  ;;  %v5039_v7 = vld [vmem:[#allocation25_spill] sm:$0xff] }
 0x60f   : > { %v2311_v14 = vmul.f32 %v2306_v12, %v5036_v13 }
 0x610   : > { %v2114_v34 = vmul.f32 %v4381_v3, %v2096_v4  ;;  %v2115_v24 = vmul.f32 %v4381_v3, %v2097_v33 }
 0x612   : > { %v2120_v21 = vadd.f32 %v2114_v34, %v2072_v16  ;;  %v2121_v6 = vadd.f32 %v2115_v24, %v2073_v28  ;;  %v5040_v34 = vld [vmem:[#allocation32_spill] sm:$0xff] }
 0x613   : > { %v2295_v62 = vpop.permute.xlu2 %2294 }
 0x614   : > { %v2268_v60 = vpop.permute.xlu1 %2267  ;;  %v2144_v50 = vadd.f32 %v2138_v11, %v2120_v21  ;;  %v2145_v31 = vadd.f32 %v2139_v1, %v2121_v6  ;;  %v5041_v1 = vld [vmem:[#allocation36_spill] sm:$0xff] }
 0x615   : > { %v2278_v15 = vmul.f32 %v2268_v60, %v2260_v18  ;;  %v2279_v3 = vmul.f32 %v2268_v60, %v2261_v54  ;;  %v2308_v18 = vmul.f32 %v5041_v1, %v5015_v44  ;;  %v2309_v54 = vmul.f32 %v5042_v41, %v5036_v13 }
 0x617   : > { %v2284_v56 = vadd.f32 %v2278_v15, %v4578_v22  ;;  %v2285_v48 = vadd.f32 %v2279_v3, %v4576_v55 }
 0x61b   : > { %v2320_v36 = vpop.permute.xlu2 %2319 }
 0x61c   : > { %v2328_v32 = vmul.f32 %v2320_v36, %v2310_v26  ;;  %v2329_v45 = vmul.f32 %v2320_v36, %v2311_v14  ;;  %v2157_v51 = vpop.permute.xlu1 %2156 }
 0x61d   : > { %v2160_v20 = vsel %vm992_vm7, %v2151_v2, %v2157_v51  ;;  %v2163_v38 = vsel %vm992_vm7, %v2157_v51, %v2151_v2 }
 0x61e   : > { %v2334_v59 = vadd.f32 %v2328_v32, %v2286_v46  ;;  %v2335_v58 = vadd.f32 %v2329_v45, %v2287_v8  ;;  %v2168_v63 = vmul.f32 %v2160_v20, %v3413_v43  ;;  %v2169_v5 = vmul.f32 %v2163_v38, %v3415_v29  ;;  %v5038_v29 = vld [vmem:[#allocation19_spill] sm:$0xff] }
 0x620   : > { %v2186_v27 = vmul.f32 %v5037_v57, %v2168_v63  ;;  %v2187_v2 = vmul.f32 %v5037_v57, %v2169_v5 }
 0x622   : > { %v2192_v49 = vadd.f32 %v2186_v27, %v2144_v50  ;;  %v2193_v25 = vadd.f32 %v2187_v2, %v2145_v31  ;;  %v5045_v27 = vld [vmem:[#allocation31_spill] sm:$0xff] }
 0x624   : > { %v2199_v52 = vpop.permute.xlu1 %2198  ;;  %v2349_v32 = vpop.permute.xlu2 %2348 }
 0x625   : > { %v2208_v55 = vsel %vm1046_vm6, %v2199_v52, %v2205_v42  ;;  %v2211_v22 = vsel %vm1046_vm6, %v2205_v42, %v2199_v52  ;;  %v2359_v51 = vadd.f32 %v2349_v32, %v2335_v58 }
 0x626   : > { %v2216_v30 = vmul.f32 %v2208_v55, %v3383_v10  ;;  %v2217_v37 = vmul.f32 %v2211_v22, %v4995_v0 }
 0x627   : > { %v2365_v22 = vmax.f32 %v2359_v51, 0.0 }
 0x628   : > { %v2234_v17 = vmul.f32 %v5038_v29, %v2216_v30  ;;  %v2235_v40 = vmul.f32 %v5038_v29, %v2217_v37  ;;  %v5043_v37 = vld [vmem:[#allocation33_spill] sm:$0xff] }
 0x62a   : > { %v2241_v4 = vadd.f32 %v2235_v40, %v2193_v25 }
 0x62c   : > { %v2247_v53 = vpop.permute.xlu1 %2246 }
 0x62d   : > { %v2256_v46 = vsel %vm1100_vm8, %v2247_v53, %v2253_v47  ;;  %v2259_v8 = vsel %vm1100_vm8, %v2253_v47, %v2247_v53  ;;  %v2368_v53 = vld [vmem:[%s4772_s18] sm:$0x3] }
 0x62e   : > { %v2264_v42 = vmul.f32 %v2256_v46, %v4996_v19  ;;  %v2265_v43 = vmul.f32 %v2259_v8, %v4997_v39  ;;  %v2240_v19 = vadd.f32 %v2234_v17, %v2192_v49 }
 0x630   : > { %v2282_v47 = vmul.f32 %v5039_v7, %v2264_v42  ;;  %v2283_v10 = vmul.f32 %v5039_v7, %v2265_v43 }
 0x632   : > { %v2288_v16 = vadd.f32 %v2282_v47, %v2240_v19  ;;  %v2289_v28 = vadd.f32 %v2283_v10, %v2241_v4 }
 0x634   : > { %v2301_v9 = vpop.permute.xlu1 %2300 }
 0x635   : > { %v2304_v0 = vsel %vm1154_vm9, %v2295_v62, %v2301_v9  ;;  %v2307_v61 = vsel %vm1154_vm9, %v2301_v9, %v2295_v62  ;;  %v2354_v62 = vpop.permute.xlu0 %2353 }
 0x636   : > { %v2312_v39 = vmul.f32 %v2304_v0, %v5015_v44  ;;  %v2313_v33 = vmul.f32 %v2307_v61, %v5036_v13  ;;  %v2358_v13 = vadd.f32 %v2349_v32, %v2334_v59 }
 0x638   : > { %v2330_v24 = vmul.f32 %v5040_v34, %v2312_v39  ;;  %v2331_v21 = vmul.f32 %v5040_v34, %v2313_v33  ;;  %v2364_v55 = vmax.f32 %v2358_v13, 0.0 }
 0x63a   : > { %v2336_v6 = vadd.f32 %v2330_v24, %v2288_v16  ;;  %v2337_v11 = vadd.f32 %v2331_v21, %v2289_v28 }
 0x63c   : > { %v2316_v60 = vpop.permute.xlu1 %2315  ;;  %v2360_v50 = vadd.f32 %v2354_v62, %v2336_v6  ;;  %v2361_v31 = vadd.f32 %v2354_v62, %v2337_v11 }
 0x63d   : > { %v2326_v15 = vmul.f32 %v2316_v60, %v2308_v18  ;;  %v2327_v3 = vmul.f32 %v2316_v60, %v2309_v54  ;;  %v2377_v59 = vpop.permute.xlu0 %2376 }
 0x63e   : > { %v2366_v35 = vmax.f32 %v2360_v50, 0.0  ;;  %v2367_v23 = vmax.f32 %v2361_v31, 0.0 }
 0x63f   : > { %v2333_v12 = vadd.f32 %v2327_v3, %v2285_v48  ;;  %v2332_v26 = vadd.f32 %v2326_v15, %v2284_v56 }
 0x640   : > { %v2371_v14 = vpack.c.bf16 %v2366_v35, %v2366_v35  ;;  %v2372_v36 = vpack.c.bf16 %v2367_v23, %v2367_v23 }
 0x642   : > { %v2383_v45 = vsel %vm1241_vm10, %v2371_v14, 0  ;;  %v2386_v44 = vsel %vm1241_vm10, %v2372_v36, 0 }
 0x643   : > { %2394 = vmatpush.bf16.msra.mxu2 %v2383_v45  ;;  %2407 = vmatpush.bf16.msra.mxu3 %v2386_v44 }
 0x645   : > { %v2344_v52 = vpop.permute.xlu1 %2343 }
 0x646   : > { %v2356_v20 = vadd.f32 %v2344_v52, %v2332_v26  ;;  %v2357_v38 = vadd.f32 %v2344_v52, %v2333_v12 }
 0x648   : > { %v2362_v48 = vmax.f32 %v2356_v20, 0.0  ;;  %v2363_v56 = vmax.f32 %v2357_v38, 0.0 }
 0x64a   : > { %v2369_v63 = vpack.c.bf16 %v2364_v55, %v2362_v48  ;;  %v2370_v5 = vpack.c.bf16 %v2365_v22, %v2363_v56 }
 0x64c   : > { %2395 = vmatpush.bf16.msra.mxu2 %v2369_v63  ;;  %2408 = vmatpush.bf16.msra.mxu3 %v2370_v5 }
 0x64f   : > { %2540 = vmatmul.msk.bf16.vlgmr.msra.gmra.mxu2 %vm1237_vm11, %v2368_v53  ;;  %2541 = vmatmul.msk.bf16.vlgmr.msra.gmra.mxu3 %vm1237_vm11, %v2368_v53 }
 0x6d2   : > { %v2397_v58 = vpop.f32.mrf.mxu2  ;;  %v2410_v46 = vpop.f32.mrf.mxu3 }
 0x6d3   : > { %v2398_v8 = vadd.f32 %v2397_v58, %v2377_v59  ;;  %v2411_v30 = vadd.f32 %v2410_v46, %v2377_v59 }
 0x6d5   : > { %v2415_v57 = vadd.f32 %v2411_v30, %v5043_v37  ;;  %v2414_v2 = vadd.f32 %v2398_v8, %v5045_v27 }
 0x6d7   : > { %v2418_v42 = vrot.slane %v2415_v57, 4 }
 0x6d9   : > { %v2419_v43 = vsel %vm1241_vm10, %v2414_v2, %v2418_v42 }
 0x6da   : > { %v2412_v29 = vpop.f32.mrf.mxu3  ;;  %v2399_v17 = vpop.f32.mrf.mxu2  ;;  %2421 = vst [vmem:[%s622_s4] sm:$0xff] %v2419_v43 }
 0x6db   : > { %2714 = shalt.err (!%p2711_p3)
}
 0x6dc   : > { %2552 = dma.vmem_to_hbm [thread:$0]  (%p2911_p5), %s2437_s30, 128, %s2439_s0, %s2423_s2  }
 0x6dd PF: > { %s5046_s24 = sld [smem:[#allocation7_spill]] }
 0x6de   : > { %s5047_s4 = sld [smem:[#allocation5_spill]] }
 0x6e3   : > { %p2558_p4 = scmp.ge.s32.totalorder %s5046_s24, 2 }
 0x6e4   : > { %s2450_s8 = sand.u32 1, %s5047_s4  }
 0x6e5   : > { %p2555_p7 = pnand %p2558_p4, %p2915_p6  ;;  %s2451_s1 = scalar_lea.sflag [#allocation3], %s2450_s8 }
 0x6e7   : > { %p2556_p8 = pneg %p2555_p7 }
 0x6e9   : > { %2732 = dma.done.wait (%p2556_p8), %s2451_s1, 128  }
 0x6ea   : > { %2734 = vsyncadd (%p2556_p8), %s2451_s1, 4294967168  ;;  %s5049_s24 = sld [smem:[#allocation8_spill]]  ;;  %s5052_s1 = smov %s2741_s22 }
 0x6eb   : > { %s5050_s25 = sld [smem:[#allocation6_spill]] }
 0x6ec   : > { %s5051_s23 = sld [smem:[#allocation9_spill]] }
 0x6f0   : > { %p30_p9 = scmp.ge.s32.totalorder %s5049_s24, 4  }
 0x6f1   : > { %s5053_s22 = smov %s5050_s25 }
 0x6f2   :  { %32 = sbr.rel (!%p30_p9) target bundleno = 13 (0xd), region = 142 }
 0x6f7   :  { %2457 = vsyncpa [#allocation3], 1 }
 0x6f8   :  { %2459 = vsyncpa [#allocation3 + $0x1], 1 }

</bundles_post_ra>
